<compile_context>
chip_gen: v5e
topology: v5e:2x2
jax: 0.10.0
libtpu: 0.0.40
codegen_flags: <defaults>
</compile_context>

<pallas_src>
import math

import jax
import jax.numpy as jnp
from jax import lax
from jax.experimental import pallas as pl
from jax.experimental.pallas import tpu as pltpu

# ---- DenselyConnectedBlock defaults (transposed=False) ----------------------
IN_CHANNELS = 4
OUT_CHANNELS = 4
HID_CHANNELS = 8
LAYERS = 5
KERNEL_W = 3        # kernel_size=(1, 3)
PAD_W = 1           # padding=(0, 1)
LAST_KERNEL_W = 4   # last_kernel_size=(1, 4)
LAST_STRIDE_W = 2   # last_stride=(1, 2)
LAST_PAD_W = 1      # last_padding=(0, 1)
BN_EPS = 1e-5

CH_TOTAL = IN_CHANNELS + (LAYERS - 1) * HID_CHANNELS          # 36
BAND = ((CH_TOTAL + 63) // 64) * 64                           # 64 (odd-band lane offset)
DENSE_IN = tuple(IN_CHANNELS + i * HID_CHANNELS
                 for i in range(LAYERS - 1))                  # (4, 12, 20, 28)


def _elu(x):
    return jnp.where(x > 0, x, jnp.exp(jnp.minimum(x, 0.0)) - 1.0)


# ------------------------------ Pallas kernel --------------------------------
def dcb_kernel(x_ref, w0_ref, w1_ref, w2_ref, w3_ref, db_ref, wg_ref, gb_ref,
               o_ref, fb):
    tn, fo, _ = x_ref.shape
    f32 = jnp.float32

    # Zero the two pad rows.  Interior rows are fully overwritten (all read
    # channels are written before being read), so no full clear is needed.
    zrow = jnp.zeros((tn, 1, 2 * BAND), f32)
    fb[:, 0:1, :] = zrow
    fb[:, fo + 1:fo + 2, :] = zrow

    # Scatter the (even | odd) packed input channels into the two bands.
    xd = x_ref[...].astype(f32)                               # (tn, fo, 2*Cin)
    fb[:, 1:fo + 1, 0:IN_CHANNELS] = xd[:, :, 0:IN_CHANNELS]                   # even
    fb[:, 1:fo + 1, BAND:BAND + IN_CHANNELS] = xd[:, :, IN_CHANNELS:2 * IN_CHANNELS]  # odd

    # Densely connected Conv2d(1x3) + BN(folded) + ELU layers.
    w_refs = (w0_ref, w1_ref, w2_ref, w3_ref)
    for li, w_ref in enumerate(w_refs):
        ch = DENSE_IN[li]          # input channels of this layer
        off = ch                   # its output channel offset within each band
        w = w_ref[...]                                         # (3*ch, hid)
        b = db_ref[li:li + 1, :]                               # (1, hid)

        # even output positions f = 2p: taps (feat[2p-1], feat[2p], feat[2p+1])
        #                             = (O[p-1], E[p], O[p])
        slab_e = jnp.concatenate(
            [fb[:, 0:fo, BAND:BAND + ch],
             fb[:, 1:fo + 1, 0:ch],
             fb[:, 1:fo + 1, BAND:BAND + ch]], axis=-1)        # (tn, fo, 3*ch)
        y_e = _elu(jnp.dot(slab_e.reshape(tn * fo, KERNEL_W * ch), w,
                           preferred_element_type=f32) + b)
        fb[:, 1:fo + 1, off:off + HID_CHANNELS] = (
            y_e.reshape(tn, fo, HID_CHANNELS))

        # odd output positions f = 2p+1: taps (E[p], O[p], E[p+1])
        slab_o = jnp.concatenate(
            [fb[:, 1:fo + 1, 0:ch],
             fb[:, 1:fo + 1, BAND:BAND + ch],
             fb[:, 2:fo + 2, 0:ch]], axis=-1)
        y_o = _elu(jnp.dot(slab_o.reshape(tn * fo, KERNEL_W * ch), w,
                           preferred_element_type=f32) + b)
        fb[:, 1:fo + 1, BAND + off:BAND + off + HID_CHANNELS] = (
            y_o.reshape(tn, fo, HID_CHANNELS))

    # Last layer: fused GluConv2d, kernel (1,4), stride (1,2), padding (0,1).
    # Kept output o taps feats[2o-1 .. 2o+2] = (O[o-1], E[o], O[o], E[o+1]):
    # evaluated only at the Fo strided positions, both convs in one matmul.
    slab_g = jnp.concatenate(
        [fb[:, 0:fo, BAND:BAND + CH_TOTAL],
         fb[:, 1:fo + 1, 0:CH_TOTAL],
         fb[:, 1:fo + 1, BAND:BAND + CH_TOTAL],
         fb[:, 2:fo + 2, 0:CH_TOTAL]], axis=-1)                # (tn, fo, 4*36)
    z = jnp.dot(slab_g.reshape(tn * fo, LAST_KERNEL_W * CH_TOTAL), wg_ref[...],
                preferred_element_type=f32) + gb_ref[0:1, :]
    y1 = z[:, 0:OUT_CHANNELS]
    gate = pl.reciprocal(1.0 + jnp.exp(-z[:, OUT_CHANNELS:2 * OUT_CHANNELS]),
                         approx=True)
    o_ref[...] = (y1 * gate).astype(o_ref.dtype)


# ------------------------------ glue / wrapper -------------------------------
def init_params(key):
    params = {'w': [], 'b': [], 'gamma': [], 'beta': [], 'mean': [], 'var': []}
    keys = iter(jax.random.split(key, 64))
    in_ch = IN_CHANNELS
    for _ in range(LAYERS - 1):
        params['w'].append(0.2 * jax.random.normal(
            next(keys), (KERNEL_W, in_ch, HID_CHANNELS), jnp.float32))
        params['b'].append(0.1 * jax.random.normal(
            next(keys), (1, HID_CHANNELS), jnp.float32))
        params['gamma'].append(1.0 + 0.1 * jax.random.normal(
            next(keys), (HID_CHANNELS,), jnp.float32))
        params['beta'].append(0.1 * jax.random.normal(
            next(keys), (HID_CHANNELS,), jnp.float32))
        params['mean'].append(0.1 * jax.random.normal(
            next(keys), (HID_CHANNELS,), jnp.float32))
        params['var'].append(1.0 + 0.1 * jax.random.uniform(
            next(keys), (HID_CHANNELS,), jnp.float32))
        in_ch += HID_CHANNELS
    params['glu_w1'] = 0.2 * jax.random.normal(
        next(keys), (LAST_KERNEL_W, in_ch, OUT_CHANNELS), jnp.float32)
    params['glu_b1'] = 0.1 * jax.random.normal(
        next(keys), (1, OUT_CHANNELS), jnp.float32)
    params['glu_w2'] = 0.2 * jax.random.normal(
        next(keys), (LAST_KERNEL_W, in_ch, OUT_CHANNELS), jnp.float32)
    params['glu_b2'] = 0.1 * jax.random.normal(
        next(keys), (1, OUT_CHANNELS), jnp.float32)
    return params


def fold_bn(params):
    """Fold eval-mode BatchNorm2d into conv weight/bias (per output channel)."""
    ws, bs = [], []
    for w, b, g, be, m, v in zip(params['w'], params['b'], params['gamma'],
                                 params['beta'], params['mean'], params['var']):
        scale = g / jnp.sqrt(v + BN_EPS)
        ws.append(w * scale[None, None, :])          # (K, Cin, hid)
        bs.append((b[0] - m) * scale + be)           # (hid,)
    return ws, bs


def densely_connected_block(x_nchw, params, *, row_tile=128):
    B, C, T, F = x_nchw.shape
    assert C == IN_CHANNELS
    assert F % LAST_STRIDE_W == 0, "F must be even"
    assert CH_TOTAL <= BAND
    N = B * T
    Fo = F // LAST_STRIDE_W

    # Row tile: largest divisor of N that is <= row_tile; keep grid >= 2 when
    # possible so the single "parallel" axis can shard across TensorCores.
    tn = min(row_tile, N)
    if N % tn:
        tn = math.gcd(N, tn)
    if N // tn < 2 and tn % 2 == 0:
        tn //= 2
    grid = (N // tn,)

    # (B,C,T,F) -> (N, Fo, 2*C): even F positions in channels [0:C],
    # odd F positions in channels [C:2C].
    x = jnp.transpose(x_nchw, (0, 2, 3, 1)).reshape(N, Fo, 2 * C)

    # Pack weights/biases host-side (BN folded, im2col layout, fused GLU).
    ws, bs = fold_bn(params)
    w2d = [w.reshape(KERNEL_W * w.shape[1], HID_CHANNELS) for w in ws]
    db = jnp.stack(bs, axis=0)                                     # (L-1, hid)
    wg = jnp.concatenate([params['glu_w1'], params['glu_w2']], axis=-1)
    wg = wg.reshape(LAST_KERNEL_W * CH_TOTAL, 2 * OUT_CHANNELS)    # (144, 8)
    gb = jnp.concatenate([params['glu_b1'][0], params['glu_b2'][0]])[None, :]

    in_specs = [pl.BlockSpec((tn, Fo, 2 * C), lambda i: (i, 0, 0))]
    for a in w2d + [db, wg, gb]:
        in_specs.append(pl.BlockSpec(a.shape, lambda i, nd=a.ndim: (0,) * nd))

    out = pl.pallas_call(
        dcb_kernel,
        out_shape=jax.ShapeDtypeStruct((N * Fo, OUT_CHANNELS), jnp.float32),
        grid=grid,
        in_specs=in_specs,
        out_specs=pl.BlockSpec((tn * Fo, OUT_CHANNELS), lambda i: (i, 0)),
        scratch_shapes=[pltpu.VMEM((tn, Fo + 2, 2 * BAND), jnp.float32)],
        compiler_params=pltpu.CompilerParams(
            dimension_semantics=("parallel",)),
    )(x, *w2d, db, wg, gb)

    # (N*Fo, Co) -> (B, Co, T, Fo), matching PyTorch NCHW output.
    return jnp.transpose(out.reshape(B, T, Fo, OUT_CHANNELS), (0, 3, 1, 2))


# ------------------------------ pure-JAX reference ---------------------------
def reference(x_nchw, params):
    dn = ('NCHW', 'OIHW', 'NCHW')

    def conv(x, w_kcio, b, stride, pad):
        w = jnp.transpose(w_kcio, (2, 1, 0))[:, :, None, :]   # (Co, Ci, 1, K)
        y = lax.conv_general_dilated(x, w, window_strides=(1, stride),
                                     padding=[(0, 0), (pad, pad)],
                                     dimension_numbers=dn,
                                     precision=lax.Precision.HIGHEST)
        return y + b[0][None, :, None, None]

    feats = [x_nchw]
    cur = x_nchw
    for i in range(LAYERS - 1):
        y = conv(cur, params['w'][i], params['b'][i], 1, PAD_W)
        g, be, m, v = (params['gamma'][i], params['beta'][i],
                       params['mean'][i], params['var'][i])
        y = ((y - m[None, :, None, None])
             / jnp.sqrt(v + BN_EPS)[None, :, None, None]
             * g[None, :, None, None] + be[None, :, None, None])
        y = jax.nn.elu(y)
        feats.append(y)
        cur = jnp.concatenate(feats, axis=1)
    y1 = conv(cur, params['glu_w1'], params['glu_b1'], LAST_STRIDE_W, LAST_PAD_W)
    y2 = conv(cur, params['glu_w2'], params['glu_b2'], LAST_STRIDE_W, LAST_PAD_W)
    return y1 * jax.nn.sigmoid(y2)


if __name__ == "__main__":
    key = jax.random.PRNGKey(0)
    kx, kp = jax.random.split(key)
    B, T, F = 2, 8, 16
    x = jax.random.normal(kx, (B, IN_CHANNELS, T, F), jnp.float32)
    params = init_params(kp)

    out = densely_connected_block(x, params)
    out = jax.block_until_ready(out)

    ref = reference(x, params)
    assert out.shape == ref.shape == (B, OUT_CHANNELS, T, F // LAST_STRIDE_W), \
        (out.shape, ref.shape)
    err = float(jnp.max(jnp.abs(out - ref)))
    if err > 5e-2:
        raise AssertionError(f"mismatch vs reference: max abs err {err}")
    print("KERNEL_OK")
</pallas_src>

<mosaic_0001>
module attributes {stable_mosaic.version = 11 : i64} {
  func.func @dcb_kernel(%arg0: i32, %arg1: memref<8x8x8xf32, #tpu.memory_space<vmem>>, %arg2: memref<12x8xf32, #tpu.memory_space<vmem>>, %arg3: memref<36x8xf32, #tpu.memory_space<vmem>>, %arg4: memref<60x8xf32, #tpu.memory_space<vmem>>, %arg5: memref<84x8xf32, #tpu.memory_space<vmem>>, %arg6: memref<4x8xf32, #tpu.memory_space<vmem>>, %arg7: memref<144x8xf32, #tpu.memory_space<vmem>>, %arg8: memref<1x8xf32, #tpu.memory_space<vmem>>, %arg9: memref<64x4xf32, #tpu.memory_space<vmem>>, %arg10: memref<8x10x128xf32, #tpu.memory_space<vmem>>) attributes {dimension_semantics = [#tpu.dimension_semantics<parallel>], iteration_bounds = array<i64: 2>, scalar_prefetch = 0 : i64, scratch_operands = 1 : i64, tpu.core_type = #tpu.core_type<tc>, window_params = [{transform_indices = @transform_0, window_bounds = array<i64: 8, 8, 8>}, {pipeline_mode = #tpu.pipeline_mode<synchronous>, transform_indices = @transform_1, window_bounds = array<i64: 12, 8>}, {pipeline_mode = #tpu.pipeline_mode<synchronous>, transform_indices = @transform_2, window_bounds = array<i64: 36, 8>}, {pipeline_mode = #tpu.pipeline_mode<synchronous>, transform_indices = @transform_3, window_bounds = array<i64: 60, 8>}, {pipeline_mode = #tpu.pipeline_mode<synchronous>, transform_indices = @transform_4, window_bounds = array<i64: 84, 8>}, {pipeline_mode = #tpu.pipeline_mode<synchronous>, transform_indices = @transform_5, window_bounds = array<i64: 4, 8>}, {pipeline_mode = #tpu.pipeline_mode<synchronous>, transform_indices = @transform_6, window_bounds = array<i64: 144, 8>}, {pipeline_mode = #tpu.pipeline_mode<synchronous>, transform_indices = @transform_7, window_bounds = array<i64: 1, 8>}, {transform_indices = @transform_8, window_bounds = array<i64: 64, 4>}]} {
    %cst = arith.constant 0.000000e+00 : f32
    %0 = vector.broadcast %cst : f32 to vector<8x1x128xf32>
    %c0 = arith.constant 0 : index
    %c0_0 = arith.constant 0 : index
    %c0_1 = arith.constant 0 : index
    %1 = vector.load %arg10[%c0, %c0_0, %c0_1] : memref<8x10x128xf32, #tpu.memory_space<vmem>>, vector<8x1x128xf32>
    tpu.vector_store %arg10[%c0, %c0_0, %c0_1], %0 {strides = array<i32>} : memref<8x10x128xf32, #tpu.memory_space<vmem>>, vector<8x1x128xf32>,
    %c0_2 = arith.constant 0 : index
    %c9 = arith.constant 9 : index
    %c0_3 = arith.constant 0 : index
    %2 = vector.load %arg10[%c0_2, %c9, %c0_3] : memref<8x10x128xf32, #tpu.memory_space<vmem>>, vector<8x1x128xf32>
    tpu.vector_store %arg10[%c0_2, %c9, %c0_3], %0 {strides = array<i32>} : memref<8x10x128xf32, #tpu.memory_space<vmem>>, vector<8x1x128xf32>,
    %c0_4 = arith.constant 0 : index
    %c0_5 = arith.constant 0 : index
    %c0_6 = arith.constant 0 : index
    %3 = vector.load %arg1[%c0_4, %c0_5, %c0_6] : memref<8x8x8xf32, #tpu.memory_space<vmem>>, vector<8x8x8xf32>
    %4 = vector.extract_strided_slice %3 {offsets = [0, 0, 0], sizes = [8, 8, 4], strides = [1, 1, 1]} : vector<8x8x8xf32> to vector<8x8x4xf32>
    %c0_7 = arith.constant 0 : index
    %c1 = arith.constant 1 : index
    %c0_8 = arith.constant 0 : index
    %5 = vector.load %arg10[%c0_7, %c1, %c0_8] : memref<8x10x128xf32, #tpu.memory_space<vmem>>, vector<8x8x4xf32>
    tpu.vector_store %arg10[%c0_7, %c1, %c0_8], %4 {strides = array<i32>} : memref<8x10x128xf32, #tpu.memory_space<vmem>>, vector<8x8x4xf32>,
    %6 = vector.extract_strided_slice %3 {offsets = [0, 0, 4], sizes = [8, 8, 4], strides = [1, 1, 1]} : vector<8x8x8xf32> to vector<8x8x4xf32>
    %c0_9 = arith.constant 0 : index
    %c1_10 = arith.constant 1 : index
    %c64 = arith.constant 64 : index
    %7 = vector.load %arg10[%c0_9, %c1_10, %c64] : memref<8x10x128xf32, #tpu.memory_space<vmem>>, vector<8x8x4xf32>
    tpu.vector_store %arg10[%c0_9, %c1_10, %c64], %6 {strides = array<i32>} : memref<8x10x128xf32, #tpu.memory_space<vmem>>, vector<8x8x4xf32>,
    %c0_11 = arith.constant 0 : index
    %c0_12 = arith.constant 0 : index
    %8 = vector.load %arg2[%c0_11, %c0_12] : memref<12x8xf32, #tpu.memory_space<vmem>>, vector<12x8xf32>
    %c0_13 = arith.constant 0 : index
    %c0_14 = arith.constant 0 : index
    %9 = vector.load %arg6[%c0_13, %c0_14] : memref<4x8xf32, #tpu.memory_space<vmem>>, vector<1x8xf32>
    %c0_15 = arith.constant 0 : index
    %c0_16 = arith.constant 0 : index
    %c64_17 = arith.constant 64 : index
    %10 = vector.load %arg10[%c0_15, %c0_16, %c64_17] : memref<8x10x128xf32, #tpu.memory_space<vmem>>, vector<8x8x4xf32>
    %c0_18 = arith.constant 0 : index
    %c1_19 = arith.constant 1 : index
    %c0_20 = arith.constant 0 : index
    %11 = vector.load %arg10[%c0_18, %c1_19, %c0_20] : memref<8x10x128xf32, #tpu.memory_space<vmem>>, vector<8x8x4xf32>
    %c0_21 = arith.constant 0 : index
    %c1_22 = arith.constant 1 : index
    %c64_23 = arith.constant 64 : index
    %12 = vector.load %arg10[%c0_21, %c1_22, %c64_23] : memref<8x10x128xf32, #tpu.memory_space<vmem>>, vector<8x8x4xf32>
    %13 = tpu.concatenate %10, %11, %12 in 2 : vector<8x8x4xf32>, vector<8x8x4xf32>, vector<8x8x4xf32> -> vector<8x8x12xf32>
    %14 = vector.shape_cast %13 : vector<8x8x12xf32> to vector<64x12xf32>
    %cst_24 = arith.constant dense<0.000000e+00> : vector<64x8xf32>
    %15 = tpu.matmul %14, %8, %cst_24 {dimension_numbers = #tpu.dot_dimension_numbers<[1], [0], [0], [1], [0, 0, 1, 1], [], []>} : vector<64x12xf32>, vector<12x8xf32>, vector<64x8xf32> -> vector<64x8xf32>
    %16 = vector.broadcast %9 : vector<1x8xf32> to vector<64x8xf32>
    %17 = arith.addf %15, %16 : vector<64x8xf32>
    %cst_25 = arith.constant 0.000000e+00 : f32
    %18 = vector.broadcast %cst_25 : f32 to vector<64x8xf32>
    %19 = arith.cmpf ogt, %17, %18 : vector<64x8xf32>
    %cst_26 = arith.constant 0.000000e+00 : f32
    %20 = vector.broadcast %cst_26 : f32 to vector<64x8xf32>
    %21 = arith.minimumf %17, %20 : vector<64x8xf32>
    %22 = math.exp %21 : vector<64x8xf32>
    %cst_27 = arith.constant 1.000000e+00 : f32
    %23 = vector.broadcast %cst_27 : f32 to vector<64x8xf32>
    %24 = arith.subf %22, %23 : vector<64x8xf32>
    %25 = arith.select %19, %17, %24 : vector<64x8xi1>, vector<64x8xf32>
    %26 = vector.shape_cast %25 : vector<64x8xf32> to vector<8x8x8xf32>
    %c0_28 = arith.constant 0 : index
    %c1_29 = arith.constant 1 : index
    %c4 = arith.constant 4 : index
    %27 = vector.load %arg10[%c0_28, %c1_29, %c4] : memref<8x10x128xf32, #tpu.memory_space<vmem>>, vector<8x8x8xf32>
    tpu.vector_store %arg10[%c0_28, %c1_29, %c4], %26 {strides = array<i32>} : memref<8x10x128xf32, #tpu.memory_space<vmem>>, vector<8x8x8xf32>,
    %c0_30 = arith.constant 0 : index
    %c1_31 = arith.constant 1 : index
    %c0_32 = arith.constant 0 : index
    %28 = vector.load %arg10[%c0_30, %c1_31, %c0_32] : memref<8x10x128xf32, #tpu.memory_space<vmem>>, vector<8x8x4xf32>
    %c0_33 = arith.constant 0 : index
    %c1_34 = arith.constant 1 : index
    %c64_35 = arith.constant 64 : index
    %29 = vector.load %arg10[%c0_33, %c1_34, %c64_35] : memref<8x10x128xf32, #tpu.memory_space<vmem>>, vector<8x8x4xf32>
    %c0_36 = arith.constant 0 : index
    %c2 = arith.constant 2 : index
    %c0_37 = arith.constant 0 : index
    %30 = vector.load %arg10[%c0_36, %c2, %c0_37] : memref<8x10x128xf32, #tpu.memory_space<vmem>>, vector<8x8x4xf32>
    %31 = tpu.concatenate %28, %29, %30 in 2 : vector<8x8x4xf32>, vector<8x8x4xf32>, vector<8x8x4xf32> -> vector<8x8x12xf32>
    %32 = vector.shape_cast %31 : vector<8x8x12xf32> to vector<64x12xf32>
    %cst_38 = arith.constant dense<0.000000e+00> : vector<64x8xf32>
    %33 = tpu.matmul %32, %8, %cst_38 {dimension_numbers = #tpu.dot_dimension_numbers<[1], [0], [0], [1], [0, 0, 1, 1], [], []>} : vector<64x12xf32>, vector<12x8xf32>, vector<64x8xf32> -> vector<64x8xf32>
    %34 = vector.broadcast %9 : vector<1x8xf32> to vector<64x8xf32>
    %35 = arith.addf %33, %34 : vector<64x8xf32>
    %cst_39 = arith.constant 0.000000e+00 : f32
    %36 = vector.broadcast %cst_39 : f32 to vector<64x8xf32>
    %37 = arith.cmpf ogt, %35, %36 : vector<64x8xf32>
    %cst_40 = arith.constant 0.000000e+00 : f32
    %38 = vector.broadcast %cst_40 : f32 to vector<64x8xf32>
    %39 = arith.minimumf %35, %38 : vector<64x8xf32>
    %40 = math.exp %39 : vector<64x8xf32>
    %cst_41 = arith.constant 1.000000e+00 : f32
    %41 = vector.broadcast %cst_41 : f32 to vector<64x8xf32>
    %42 = arith.subf %40, %41 : vector<64x8xf32>
    %43 = arith.select %37, %35, %42 : vector<64x8xi1>, vector<64x8xf32>
    %44 = vector.shape_cast %43 : vector<64x8xf32> to vector<8x8x8xf32>
    %c0_42 = arith.constant 0 : index
    %c1_43 = arith.constant 1 : index
    %c68 = arith.constant 68 : index
    %45 = vector.load %arg10[%c0_42, %c1_43, %c68] : memref<8x10x128xf32, #tpu.memory_space<vmem>>, vector<8x8x8xf32>
    tpu.vector_store %arg10[%c0_42, %c1_43, %c68], %44 {strides = array<i32>} : memref<8x10x128xf32, #tpu.memory_space<vmem>>, vector<8x8x8xf32>,
    %c0_44 = arith.constant 0 : index
    %c0_45 = arith.constant 0 : index
    %46 = vector.load %arg3[%c0_44, %c0_45] : memref<36x8xf32, #tpu.memory_space<vmem>>, vector<36x8xf32>
    %c1_46 = arith.constant 1 : index
    %c0_47 = arith.constant 0 : index
    %47 = vector.load %arg6[%c1_46, %c0_47] : memref<4x8xf32, #tpu.memory_space<vmem>>, vector<1x8xf32>
    %c0_48 = arith.constant 0 : index
    %c0_49 = arith.constant 0 : index
    %c64_50 = arith.constant 64 : index
    %48 = vector.load %arg10[%c0_48, %c0_49, %c64_50] : memref<8x10x128xf32, #tpu.memory_space<vmem>>, vector<8x8x12xf32>
    %c0_51 = arith.constant 0 : index
    %c1_52 = arith.constant 1 : index
    %c0_53 = arith.constant 0 : index
    %49 = vector.load %arg10[%c0_51, %c1_52, %c0_53] : memref<8x10x128xf32, #tpu.memory_space<vmem>>, vector<8x8x12xf32>
    %c0_54 = arith.constant 0 : index
    %c1_55 = arith.constant 1 : index
    %c64_56 = arith.constant 64 : index
    %50 = vector.load %arg10[%c0_54, %c1_55, %c64_56] : memref<8x10x128xf32, #tpu.memory_space<vmem>>, vector<8x8x12xf32>
    %51 = tpu.concatenate %48, %49, %50 in 2 : vector<8x8x12xf32>, vector<8x8x12xf32>, vector<8x8x12xf32> -> vector<8x8x36xf32>
    %52 = vector.shape_cast %51 : vector<8x8x36xf32> to vector<64x36xf32>
    %cst_57 = arith.constant dense<0.000000e+00> : vector<64x8xf32>
    %53 = tpu.matmul %52, %46, %cst_57 {dimension_numbers = #tpu.dot_dimension_numbers<[1], [0], [0], [1], [0, 0, 1, 1], [], []>} : vector<64x36xf32>, vector<36x8xf32>, vector<64x8xf32> -> vector<64x8xf32>
    %54 = vector.broadcast %47 : vector<1x8xf32> to vector<64x8xf32>
    %55 = arith.addf %53, %54 : vector<64x8xf32>
    %cst_58 = arith.constant 0.000000e+00 : f32
    %56 = vector.broadcast %cst_58 : f32 to vector<64x8xf32>
    %57 = arith.cmpf ogt, %55, %56 : vector<64x8xf32>
    %cst_59 = arith.constant 0.000000e+00 : f32
    %58 = vector.broadcast %cst_59 : f32 to vector<64x8xf32>
    %59 = arith.minimumf %55, %58 : vector<64x8xf32>
    %60 = math.exp %59 : vector<64x8xf32>
    %cst_60 = arith.constant 1.000000e+00 : f32
    %61 = vector.broadcast %cst_60 : f32 to vector<64x8xf32>
    %62 = arith.subf %60, %61 : vector<64x8xf32>
    %63 = arith.select %57, %55, %62 : vector<64x8xi1>, vector<64x8xf32>
    %64 = vector.shape_cast %63 : vector<64x8xf32> to vector<8x8x8xf32>
    %c0_61 = arith.constant 0 : index
    %c1_62 = arith.constant 1 : index
    %c12 = arith.constant 12 : index
    %65 = vector.load %arg10[%c0_61, %c1_62, %c12] : memref<8x10x128xf32, #tpu.memory_space<vmem>>, vector<8x8x8xf32>
    tpu.vector_store %arg10[%c0_61, %c1_62, %c12], %64 {strides = array<i32>} : memref<8x10x128xf32, #tpu.memory_space<vmem>>, vector<8x8x8xf32>,
    %c0_63 = arith.constant 0 : index
    %c1_64 = arith.constant 1 : index
    %c0_65 = arith.constant 0 : index
    %66 = vector.load %arg10[%c0_63, %c1_64, %c0_65] : memref<8x10x128xf32, #tpu.memory_space<vmem>>, vector<8x8x12xf32>
    %c0_66 = arith.constant 0 : index
    %c1_67 = arith.constant 1 : index
    %c64_68 = arith.constant 64 : index
    %67 = vector.load %arg10[%c0_66, %c1_67, %c64_68] : memref<8x10x128xf32, #tpu.memory_space<vmem>>, vector<8x8x12xf32>
    %c0_69 = arith.constant 0 : index
    %c2_70 = arith.constant 2 : index
    %c0_71 = arith.constant 0 : index
    %68 = vector.load %arg10[%c0_69, %c2_70, %c0_71] : memref<8x10x128xf32, #tpu.memory_space<vmem>>, vector<8x8x12xf32>
    %69 = tpu.concatenate %66, %67, %68 in 2 : vector<8x8x12xf32>, vector<8x8x12xf32>, vector<8x8x12xf32> -> vector<8x8x36xf32>
    %70 = vector.shape_cast %69 : vector<8x8x36xf32> to vector<64x36xf32>
    %cst_72 = arith.constant dense<0.000000e+00> : vector<64x8xf32>
    %71 = tpu.matmul %70, %46, %cst_72 {dimension_numbers = #tpu.dot_dimension_numbers<[1], [0], [0], [1], [0, 0, 1, 1], [], []>} : vector<64x36xf32>, vector<36x8xf32>, vector<64x8xf32> -> vector<64x8xf32>
    %72 = vector.broadcast %47 : vector<1x8xf32> to vector<64x8xf32>
    %73 = arith.addf %71, %72 : vector<64x8xf32>
    %cst_73 = arith.constant 0.000000e+00 : f32
    %74 = vector.broadcast %cst_73 : f32 to vector<64x8xf32>
    %75 = arith.cmpf ogt, %73, %74 : vector<64x8xf32>
    %cst_74 = arith.constant 0.000000e+00 : f32
    %76 = vector.broadcast %cst_74 : f32 to vector<64x8xf32>
    %77 = arith.minimumf %73, %76 : vector<64x8xf32>
    %78 = math.exp %77 : vector<64x8xf32>
    %cst_75 = arith.constant 1.000000e+00 : f32
    %79 = vector.broadcast %cst_75 : f32 to vector<64x8xf32>
    %80 = arith.subf %78, %79 : vector<64x8xf32>
    %81 = arith.select %75, %73, %80 : vector<64x8xi1>, vector<64x8xf32>
    %82 = vector.shape_cast %81 : vector<64x8xf32> to vector<8x8x8xf32>
    %c0_76 = arith.constant 0 : index
    %c1_77 = arith.constant 1 : index
    %c76 = arith.constant 76 : index
    %83 = vector.load %arg10[%c0_76, %c1_77, %c76] : memref<8x10x128xf32, #tpu.memory_space<vmem>>, vector<8x8x8xf32>
    tpu.vector_store %arg10[%c0_76, %c1_77, %c76], %82 {strides = array<i32>} : memref<8x10x128xf32, #tpu.memory_space<vmem>>, vector<8x8x8xf32>,
    %c0_78 = arith.constant 0 : index
    %c0_79 = arith.constant 0 : index
    %84 = vector.load %arg4[%c0_78, %c0_79] : memref<60x8xf32, #tpu.memory_space<vmem>>, vector<60x8xf32>
    %c2_80 = arith.constant 2 : index
    %c0_81 = arith.constant 0 : index
    %85 = vector.load %arg6[%c2_80, %c0_81] : memref<4x8xf32, #tpu.memory_space<vmem>>, vector<1x8xf32>
    %c0_82 = arith.constant 0 : index
    %c0_83 = arith.constant 0 : index
    %c64_84 = arith.constant 64 : index
    %86 = vector.load %arg10[%c0_82, %c0_83, %c64_84] : memref<8x10x128xf32, #tpu.memory_space<vmem>>, vector<8x8x20xf32>
    %c0_85 = arith.constant 0 : index
    %c1_86 = arith.constant 1 : index
    %c0_87 = arith.constant 0 : index
    %87 = vector.load %arg10[%c0_85, %c1_86, %c0_87] : memref<8x10x128xf32, #tpu.memory_space<vmem>>, vector<8x8x20xf32>
    %c0_88 = arith.constant 0 : index
    %c1_89 = arith.constant 1 : index
    %c64_90 = arith.constant 64 : index
    %88 = vector.load %arg10[%c0_88, %c1_89, %c64_90] : memref<8x10x128xf32, #tpu.memory_space<vmem>>, vector<8x8x20xf32>
    %89 = tpu.concatenate %86, %87, %88 in 2 : vector<8x8x20xf32>, vector<8x8x20xf32>, vector<8x8x20xf32> -> vector<8x8x60xf32>
    %90 = vector.shape_cast %89 : vector<8x8x60xf32> to vector<64x60xf32>
    %cst_91 = arith.constant dense<0.000000e+00> : vector<64x8xf32>
    %91 = tpu.matmul %90, %84, %cst_91 {dimension_numbers = #tpu.dot_dimension_numbers<[1], [0], [0], [1], [0, 0, 1, 1], [], []>} : vector<64x60xf32>, vector<60x8xf32>, vector<64x8xf32> -> vector<64x8xf32>
    %92 = vector.broadcast %85 : vector<1x8xf32> to vector<64x8xf32>
    %93 = arith.addf %91, %92 : vector<64x8xf32>
    %cst_92 = arith.constant 0.000000e+00 : f32
    %94 = vector.broadcast %cst_92 : f32 to vector<64x8xf32>
    %95 = arith.cmpf ogt, %93, %94 : vector<64x8xf32>
    %cst_93 = arith.constant 0.000000e+00 : f32
    %96 = vector.broadcast %cst_93 : f32 to vector<64x8xf32>
    %97 = arith.minimumf %93, %96 : vector<64x8xf32>
    %98 = math.exp %97 : vector<64x8xf32>
    %cst_94 = arith.constant 1.000000e+00 : f32
    %99 = vector.broadcast %cst_94 : f32 to vector<64x8xf32>
    %100 = arith.subf %98, %99 : vector<64x8xf32>
    %101 = arith.select %95, %93, %100 : vector<64x8xi1>, vector<64x8xf32>
    %102 = vector.shape_cast %101 : vector<64x8xf32> to vector<8x8x8xf32>
    %c0_95 = arith.constant 0 : index
    %c1_96 = arith.constant 1 : index
    %c20 = arith.constant 20 : index
    %103 = vector.load %arg10[%c0_95, %c1_96, %c20] : memref<8x10x128xf32, #tpu.memory_space<vmem>>, vector<8x8x8xf32>
    tpu.vector_store %arg10[%c0_95, %c1_96, %c20], %102 {strides = array<i32>} : memref<8x10x128xf32, #tpu.memory_space<vmem>>, vector<8x8x8xf32>,
    %c0_97 = arith.constant 0 : index
    %c1_98 = arith.constant 1 : index
    %c0_99 = arith.constant 0 : index
    %104 = vector.load %arg10[%c0_97, %c1_98, %c0_99] : memref<8x10x128xf32, #tpu.memory_space<vmem>>, vector<8x8x20xf32>
    %c0_100 = arith.constant 0 : index
    %c1_101 = arith.constant 1 : index
    %c64_102 = arith.constant 64 : index
    %105 = vector.load %arg10[%c0_100, %c1_101, %c64_102] : memref<8x10x128xf32, #tpu.memory_space<vmem>>, vector<8x8x20xf32>
    %c0_103 = arith.constant 0 : index
    %c2_104 = arith.constant 2 : index
    %c0_105 = arith.constant 0 : index
    %106 = vector.load %arg10[%c0_103, %c2_104, %c0_105] : memref<8x10x128xf32, #tpu.memory_space<vmem>>, vector<8x8x20xf32>
    %107 = tpu.concatenate %104, %105, %106 in 2 : vector<8x8x20xf32>, vector<8x8x20xf32>, vector<8x8x20xf32> -> vector<8x8x60xf32>
    %108 = vector.shape_cast %107 : vector<8x8x60xf32> to vector<64x60xf32>
    %cst_106 = arith.constant dense<0.000000e+00> : vector<64x8xf32>
    %109 = tpu.matmul %108, %84, %cst_106 {dimension_numbers = #tpu.dot_dimension_numbers<[1], [0], [0], [1], [0, 0, 1, 1], [], []>} : vector<64x60xf32>, vector<60x8xf32>, vector<64x8xf32> -> vector<64x8xf32>
    %110 = vector.broadcast %85 : vector<1x8xf32> to vector<64x8xf32>
    %111 = arith.addf %109, %110 : vector<64x8xf32>
    %cst_107 = arith.constant 0.000000e+00 : f32
    %112 = vector.broadcast %cst_107 : f32 to vector<64x8xf32>
    %113 = arith.cmpf ogt, %111, %112 : vector<64x8xf32>
    %cst_108 = arith.constant 0.000000e+00 : f32
    %114 = vector.broadcast %cst_108 : f32 to vector<64x8xf32>
    %115 = arith.minimumf %111, %114 : vector<64x8xf32>
    %116 = math.exp %115 : vector<64x8xf32>
    %cst_109 = arith.constant 1.000000e+00 : f32
    %117 = vector.broadcast %cst_109 : f32 to vector<64x8xf32>
    %118 = arith.subf %116, %117 : vector<64x8xf32>
    %119 = arith.select %113, %111, %118 : vector<64x8xi1>, vector<64x8xf32>
    %120 = vector.shape_cast %119 : vector<64x8xf32> to vector<8x8x8xf32>
    %c0_110 = arith.constant 0 : index
    %c1_111 = arith.constant 1 : index
    %c84 = arith.constant 84 : index
    %121 = vector.load %arg10[%c0_110, %c1_111, %c84] : memref<8x10x128xf32, #tpu.memory_space<vmem>>, vector<8x8x8xf32>
    tpu.vector_store %arg10[%c0_110, %c1_111, %c84], %120 {strides = array<i32>} : memref<8x10x128xf32, #tpu.memory_space<vmem>>, vector<8x8x8xf32>,
    %c0_112 = arith.constant 0 : index
    %c0_113 = arith.constant 0 : index
    %122 = vector.load %arg5[%c0_112, %c0_113] : memref<84x8xf32, #tpu.memory_space<vmem>>, vector<84x8xf32>
    %c3 = arith.constant 3 : index
    %c0_114 = arith.constant 0 : index
    %123 = vector.load %arg6[%c3, %c0_114] : memref<4x8xf32, #tpu.memory_space<vmem>>, vector<1x8xf32>
    %c0_115 = arith.constant 0 : index
    %c0_116 = arith.constant 0 : index
    %c64_117 = arith.constant 64 : index
    %124 = vector.load %arg10[%c0_115, %c0_116, %c64_117] : memref<8x10x128xf32, #tpu.memory_space<vmem>>, vector<8x8x28xf32>
    %c0_118 = arith.constant 0 : index
    %c1_119 = arith.constant 1 : index
    %c0_120 = arith.constant 0 : index
    %125 = vector.load %arg10[%c0_118, %c1_119, %c0_120] : memref<8x10x128xf32, #tpu.memory_space<vmem>>, vector<8x8x28xf32>
    %c0_121 = arith.constant 0 : index
    %c1_122 = arith.constant 1 : index
    %c64_123 = arith.constant 64 : index
    %126 = vector.load %arg10[%c0_121, %c1_122, %c64_123] : memref<8x10x128xf32, #tpu.memory_space<vmem>>, vector<8x8x28xf32>
    %127 = tpu.concatenate %124, %125, %126 in 2 : vector<8x8x28xf32>, vector<8x8x28xf32>, vector<8x8x28xf32> -> vector<8x8x84xf32>
    %128 = vector.shape_cast %127 : vector<8x8x84xf32> to vector<64x84xf32>
    %cst_124 = arith.constant dense<0.000000e+00> : vector<64x8xf32>
    %129 = tpu.matmul %128, %122, %cst_124 {dimension_numbers = #tpu.dot_dimension_numbers<[1], [0], [0], [1], [0, 0, 1, 1], [], []>} : vector<64x84xf32>, vector<84x8xf32>, vector<64x8xf32> -> vector<64x8xf32>
    %130 = vector.broadcast %123 : vector<1x8xf32> to vector<64x8xf32>
    %131 = arith.addf %129, %130 : vector<64x8xf32>
    %cst_125 = arith.constant 0.000000e+00 : f32
    %132 = vector.broadcast %cst_125 : f32 to vector<64x8xf32>
    %133 = arith.cmpf ogt, %131, %132 : vector<64x8xf32>
    %cst_126 = arith.constant 0.000000e+00 : f32
    %134 = vector.broadcast %cst_126 : f32 to vector<64x8xf32>
    %135 = arith.minimumf %131, %134 : vector<64x8xf32>
    %136 = math.exp %135 : vector<64x8xf32>
    %cst_127 = arith.constant 1.000000e+00 : f32
    %137 = vector.broadcast %cst_127 : f32 to vector<64x8xf32>
    %138 = arith.subf %136, %137 : vector<64x8xf32>
    %139 = arith.select %133, %131, %138 : vector<64x8xi1>, vector<64x8xf32>
    %140 = vector.shape_cast %139 : vector<64x8xf32> to vector<8x8x8xf32>
    %c0_128 = arith.constant 0 : index
    %c1_129 = arith.constant 1 : index
    %c28 = arith.constant 28 : index
    %141 = vector.load %arg10[%c0_128, %c1_129, %c28] : memref<8x10x128xf32, #tpu.memory_space<vmem>>, vector<8x8x8xf32>
    tpu.vector_store %arg10[%c0_128, %c1_129, %c28], %140 {strides = array<i32>} : memref<8x10x128xf32, #tpu.memory_space<vmem>>, vector<8x8x8xf32>,
    %c0_130 = arith.constant 0 : index
    %c1_131 = arith.constant 1 : index
    %c0_132 = arith.constant 0 : index
    %142 = vector.load %arg10[%c0_130, %c1_131, %c0_132] : memref<8x10x128xf32, #tpu.memory_space<vmem>>, vector<8x8x28xf32>
    %c0_133 = arith.constant 0 : index
    %c1_134 = arith.constant 1 : index
    %c64_135 = arith.constant 64 : index
    %143 = vector.load %arg10[%c0_133, %c1_134, %c64_135] : memref<8x10x128xf32, #tpu.memory_space<vmem>>, vector<8x8x28xf32>
    %c0_136 = arith.constant 0 : index
    %c2_137 = arith.constant 2 : index
    %c0_138 = arith.constant 0 : index
    %144 = vector.load %arg10[%c0_136, %c2_137, %c0_138] : memref<8x10x128xf32, #tpu.memory_space<vmem>>, vector<8x8x28xf32>
    %145 = tpu.concatenate %142, %143, %144 in 2 : vector<8x8x28xf32>, vector<8x8x28xf32>, vector<8x8x28xf32> -> vector<8x8x84xf32>
    %146 = vector.shape_cast %145 : vector<8x8x84xf32> to vector<64x84xf32>
    %cst_139 = arith.constant dense<0.000000e+00> : vector<64x8xf32>
    %147 = tpu.matmul %146, %122, %cst_139 {dimension_numbers = #tpu.dot_dimension_numbers<[1], [0], [0], [1], [0, 0, 1, 1], [], []>} : vector<64x84xf32>, vector<84x8xf32>, vector<64x8xf32> -> vector<64x8xf32>
    %148 = vector.broadcast %123 : vector<1x8xf32> to vector<64x8xf32>
    %149 = arith.addf %147, %148 : vector<64x8xf32>
    %cst_140 = arith.constant 0.000000e+00 : f32
    %150 = vector.broadcast %cst_140 : f32 to vector<64x8xf32>
    %151 = arith.cmpf ogt, %149, %150 : vector<64x8xf32>
    %cst_141 = arith.constant 0.000000e+00 : f32
    %152 = vector.broadcast %cst_141 : f32 to vector<64x8xf32>
    %153 = arith.minimumf %149, %152 : vector<64x8xf32>
    %154 = math.exp %153 : vector<64x8xf32>
    %cst_142 = arith.constant 1.000000e+00 : f32
    %155 = vector.broadcast %cst_142 : f32 to vector<64x8xf32>
    %156 = arith.subf %154, %155 : vector<64x8xf32>
    %157 = arith.select %151, %149, %156 : vector<64x8xi1>, vector<64x8xf32>
    %158 = vector.shape_cast %157 : vector<64x8xf32> to vector<8x8x8xf32>
    %c0_143 = arith.constant 0 : index
    %c1_144 = arith.constant 1 : index
    %c92 = arith.constant 92 : index
    %159 = vector.load %arg10[%c0_143, %c1_144, %c92] : memref<8x10x128xf32, #tpu.memory_space<vmem>>, vector<8x8x8xf32>
    tpu.vector_store %arg10[%c0_143, %c1_144, %c92], %158 {strides = array<i32>} : memref<8x10x128xf32, #tpu.memory_space<vmem>>, vector<8x8x8xf32>,
    %c0_145 = arith.constant 0 : index
    %c0_146 = arith.constant 0 : index
    %c64_147 = arith.constant 64 : index
    %160 = vector.load %arg10[%c0_145, %c0_146, %c64_147] : memref<8x10x128xf32, #tpu.memory_space<vmem>>, vector<8x8x36xf32>
    %c0_148 = arith.constant 0 : index
    %c1_149 = arith.constant 1 : index
    %c0_150 = arith.constant 0 : index
    %161 = vector.load %arg10[%c0_148, %c1_149, %c0_150] : memref<8x10x128xf32, #tpu.memory_space<vmem>>, vector<8x8x36xf32>
    %c0_151 = arith.constant 0 : index
    %c1_152 = arith.constant 1 : index
    %c64_153 = arith.constant 64 : index
    %162 = vector.load %arg10[%c0_151, %c1_152, %c64_153] : memref<8x10x128xf32, #tpu.memory_space<vmem>>, vector<8x8x36xf32>
    %c0_154 = arith.constant 0 : index
    %c2_155 = arith.constant 2 : index
    %c0_156 = arith.constant 0 : index
    %163 = vector.load %arg10[%c0_154, %c2_155, %c0_156] : memref<8x10x128xf32, #tpu.memory_space<vmem>>, vector<8x8x36xf32>
    %164 = tpu.concatenate %160, %161, %162, %163 in 2 : vector<8x8x36xf32>, vector<8x8x36xf32>, vector<8x8x36xf32>, vector<8x8x36xf32> -> vector<8x8x144xf32>
    %165 = vector.shape_cast %164 : vector<8x8x144xf32> to vector<64x144xf32>
    %c0_157 = arith.constant 0 : index
    %c0_158 = arith.constant 0 : index
    %166 = vector.load %arg7[%c0_157, %c0_158] : memref<144x8xf32, #tpu.memory_space<vmem>>, vector<144x8xf32>
    %cst_159 = arith.constant dense<0.000000e+00> : vector<64x8xf32>
    %167 = tpu.matmul %165, %166, %cst_159 {dimension_numbers = #tpu.dot_dimension_numbers<[1], [0], [0], [1], [0, 0, 1, 1], [], []>} : vector<64x144xf32>, vector<144x8xf32>, vector<64x8xf32> -> vector<64x8xf32>
    %c0_160 = arith.constant 0 : index
    %c0_161 = arith.constant 0 : index
    %168 = vector.load %arg8[%c0_160, %c0_161] : memref<1x8xf32, #tpu.memory_space<vmem>>, vector<1x8xf32>
    %169 = vector.broadcast %168 : vector<1x8xf32> to vector<64x8xf32>
    %170 = arith.addf %167, %169 : vector<64x8xf32>
    %171 = vector.extract_strided_slice %170 {offsets = [0, 0], sizes = [64, 4], strides = [1, 1]} : vector<64x8xf32> to vector<64x4xf32>
    %172 = vector.extract_strided_slice %170 {offsets = [0, 4], sizes = [64, 4], strides = [1, 1]} : vector<64x8xf32> to vector<64x4xf32>
    %cst_162 = arith.constant 0.000000e+00 : f32
    %173 = vector.broadcast %cst_162 : f32 to vector<64x4xf32>
    %174 = arith.subf %173, %172 : vector<64x4xf32>
    %175 = math.exp %174 : vector<64x4xf32>
    %cst_163 = arith.constant 1.000000e+00 : f32
    %176 = vector.broadcast %cst_163 : f32 to vector<64x4xf32>
    %177 = arith.addf %176, %175 : vector<64x4xf32>
    %178 = tpu.reciprocal %177 {approx = true} : vector<64x4xf32> -> vector<64x4xf32>
    %179 = arith.mulf %171, %178 : vector<64x4xf32>
    %c0_164 = arith.constant 0 : index
    %c0_165 = arith.constant 0 : index
    %180 = vector.load %arg9[%c0_164, %c0_165] : memref<64x4xf32, #tpu.memory_space<vmem>>, vector<64x4xf32>
    tpu.vector_store %arg9[%c0_164, %c0_165], %179 {strides = array<i32>} : memref<64x4xf32, #tpu.memory_space<vmem>>, vector<64x4xf32>,
    return
  }
  func.func @transform_0(%arg0: i32) -> (i32, i32, i32) {
    %c0_i32 = arith.constant 0 : i32
    %c0_i32_0 = arith.constant 0 : i32
    %c0_i32_1 = arith.constant 0 : i32
    return %arg0, %c0_i32, %c0_i32_0 : i32, i32, i32
  }
  func.func @transform_1(%arg0: i32) -> (i32, i32) {
    %c0_i32 = arith.constant 0 : i32
    %c0_i32_0 = arith.constant 0 : i32
    %c0_i32_1 = arith.constant 0 : i32
    return %c0_i32, %c0_i32_0 : i32, i32
  }
  func.func @transform_2(%arg0: i32) -> (i32, i32) {
    %c0_i32 = arith.constant 0 : i32
    %c0_i32_0 = arith.constant 0 : i32
    %c0_i32_1 = arith.constant 0 : i32
    return %c0_i32, %c0_i32_0 : i32, i32
  }
  func.func @transform_3(%arg0: i32) -> (i32, i32) {
    %c0_i32 = arith.constant 0 : i32
    %c0_i32_0 = arith.constant 0 : i32
    %c0_i32_1 = arith.constant 0 : i32
    return %c0_i32, %c0_i32_0 : i32, i32
  }
  func.func @transform_4(%arg0: i32) -> (i32, i32) {
    %c0_i32 = arith.constant 0 : i32
    %c0_i32_0 = arith.constant 0 : i32
    %c0_i32_1 = arith.constant 0 : i32
    return %c0_i32, %c0_i32_0 : i32, i32
  }
  func.func @transform_5(%arg0: i32) -> (i32, i32) {
    %c0_i32 = arith.constant 0 : i32
    %c0_i32_0 = arith.constant 0 : i32
    %c0_i32_1 = arith.constant 0 : i32
    return %c0_i32, %c0_i32_0 : i32, i32
  }
  func.func @transform_6(%arg0: i32) -> (i32, i32) {
    %c0_i32 = arith.constant 0 : i32
    %c0_i32_0 = arith.constant 0 : i32
    %c0_i32_1 = arith.constant 0 : i32
    return %c0_i32, %c0_i32_0 : i32, i32
  }
  func.func @transform_7(%arg0: i32) -> (i32, i32) {
    %c0_i32 = arith.constant 0 : i32
    %c0_i32_0 = arith.constant 0 : i32
    %c0_i32_1 = arith.constant 0 : i32
    return %c0_i32, %c0_i32_0 : i32, i32
  }
  func.func @transform_8(%arg0: i32) -> (i32, i32) {
    %c0_i32 = arith.constant 0 : i32
    %c0_i32_0 = arith.constant 0 : i32
    return %arg0, %c0_i32 : i32, i32
  }
}

</mosaic_0001>

<bundles_post_ra>
// kernel: tpu_custom_call.1
= control target key start
LH: loop header
LB: loop body
LE: loop exit
PB: predicated region body
PF: predicated region fallthrough
CT: control target
= control target key end

     0   :  { %s3456_s27 = smov 0   ;;  %s4325_s0 = inlined_call_operand.vmem [shape: f32[16,8,8], index: 0, kind: input, shape index: {}]   ;;  %s4326_s1 = inlined_call_operand.vmem [shape: f32[12,8], index: 1, kind: input, shape index: {}]   ;;  %s4327_s2 = inlined_call_operand.vmem [shape: f32[36,8], index: 2, kind: input, shape index: {}]   ;;  %s4328_s3 = inlined_call_operand.vmem [shape: f32[60,8], index: 3, kind: input, shape index: {}]   ;;  %s4329_s4 = inlined_call_operand.vmem [shape: f32[84,8], index: 4, kind: input, shape index: {}]   ;;  %s4330_s5 = inlined_call_operand.vmem [shape: f32[4,8], index: 5, kind: input, shape index: {}]   ;;  %s4331_s6 = inlined_call_operand.vmem [shape: f32[144,8], index: 6, kind: input, shape index: {}]   ;;  %s4332_s7 = inlined_call_operand.vmem [shape: f32[1,8], index: 7, kind: input, shape index: {}]   ;;  %s4333_s8 = inlined_call_operand.vmem [shape: f32[128,4], index: 8, kind: output, shape index: {}]  }
   0x1 LB: > { %s2971_s28 = sadd.s32 4294967295, %s3387_s27   ;;  %p2975_p0 = scmp.ge.s32.totalorder %s3387_s27, 1  ;;  %s3387_s27 = sphi %s3456_s27, %s18_s27  }
   0x2   : > { %p263_p1 = scmp.lt.s32.totalorder %s3387_s27, 3 }
   0x4   : > { %p264_p2 = pnand %p2975_p0, %p263_p1 }
   0x5   : > { %s2976_s29 = sshll.u32 (!%p264_p2), %s2971_s28, 3  ;;  %s3389_s12 = smov (!%p264_p2), 60  }
   0x6   : > { %267 = sbr.rel (%p264_p2) target bundleno = 3724 (0xe8c), region = 52  ;;  %p298_p3 = scmp.lt.s32.totalorder (!%p264_p2), %s2976_s29, 15 }
   0x7   : > { %s3391_s13 = smov (!%p264_p2), 4   ;;  %s3392_s14 = smov (!%p264_p2), 64  }
   0x8   : > { %s3393_s15 = smov (!%p264_p2), 72   ;;  %s3394_s22 = smov (!%p264_p2), 68  }
   0x9   : > { %s3395_s23 = smov (!%p264_p2), 8   ;;  %s3396_s24 = smov (!%p264_p2), 12  }
   0xa   : > { %s3397_s25 = smov (!%p264_p2), 88   ;;  %s3398_s20 = smov (!%p264_p2), 76  }
   0xb   : > { %s4335_s29 = smov (!%p298_p3, %s2976_s29), 15  ;;  %vm333_vm0 = vcmask 31744   ;;  %v3390_v7 = vmov 0.0   ;;  %vm374_vm1 = vcmask 556544   ;;  %v384_v30 = vld [vmem:[%s4326_s1 + $0x8] sm:$0xf] }
   0xc   : > { %s2977_s30 = sshll.u32 %s4335_s29, 3  ;;  %309 = vst [vmem:[#allocation2] sm:$0x1] %v3390_v7  ;;  %vm533_vm2 = vcmask 1043456   ;;  %v383_v31 = vld [vmem:[%s4326_s1] sm:$0xff]  ;;  %vm498_vm3 = vcmask 64512  }
   0xd   : > { %s3472_s11 = scalar_lea.vmem %s4325_s0, %s2977_s30  ;;  %310 = vst [vmem:[#allocation2 + $0x10] sm:$0x1] %v3390_v7  ;;  %2980 = vmatpush.msk.msra.mxu0 %vm533_vm2, %v384_v30  ;;  %2997 = vmatpush.msk.msra.mxu1 %vm533_vm2, %v384_v30  ;;  %vm508_vm4 = vcmask 97280   ;;  %vm658_vm12 = vcmask 97312   ;;  %s3399_s21 = smov 24  }
   0xe   : > { %v325_v0 = vld [vmem:[%s3472_s11] sm:$0xff]  ;;  %v327_v1 = vld [vmem:[%s3472_s11 + $0x10] sm:$0xff]  ;;  %v326_v2 = vld [vmem:[%s3472_s11 + $0x8] sm:$0xff]  ;;  %311 = vst [vmem:[#allocation2 + $0x20] sm:$0x1] %v3390_v7  ;;  %3126 = vmatpush.msk.msra.mxu3 %vm533_vm2, %v384_v30  ;;  %s3401_s26 = smov 104  }
   0xf   : > { %350 = vrot.lane.b32.xlu0 %v325_v0, %s3389_s12  ;;  %334 = vst.msk [vmem:[#allocation2 + $0x1] sm:$0xff] %vm333_vm0, %v325_v0  ;;  %354 = vrot.lane.b32.xlu1 %v327_v1, %s3389_s12  ;;  %v329_v3 = vld [vmem:[%s3472_s11 + $0x20] sm:$0xff]  ;;  %v328_v4 = vld [vmem:[%s3472_s11 + $0x18] sm:$0xff]  ;;  %s3402_s28 = smov 40   ;;  %s3403_s9 = smov 84  }
  0x10   : > { %335 = vst.msk [vmem:[#allocation2 + $0x11] sm:$0xff] %vm333_vm0, %v326_v2  ;;  %358 = vrot.lane.b32.xlu2 %v329_v3, %s3389_s12  ;;  %v330_v5 = vld [vmem:[%s3472_s11 + $0x28] sm:$0xff]  ;;  %v331_v6 = vld [vmem:[%s3472_s11 + $0x30] sm:$0xff]  ;;  %v332_v8 = vld [vmem:[%s3472_s11 + $0x38] sm:$0xff]  ;;  %552 = vmatpush.msra.mxu0 %v383_v31  ;;  %s3405_s10 = smov 120  }
  0x11   : > { %336 = vst.msk [vmem:[#allocation2 + $0x21] sm:$0xff] %vm333_vm0, %v327_v1  ;;  %802 = vmatpush.msra.mxu1 %v383_v31  ;;  %3127 = vmatpush.msra.mxu3 %v383_v31 }
  0x12   : > { %337 = vst.msk [vmem:[#allocation2 + $0x31] sm:$0xff] %vm333_vm0, %v328_v4 }
  0x13   : > { %338 = vst.msk [vmem:[#allocation2 + $0x41] sm:$0xff] %vm333_vm0, %v329_v3 }
  0x14   : > { %339 = vst.msk [vmem:[#allocation2 + $0x51] sm:$0xff] %vm333_vm0, %v330_v5 }
  0x15   : > { %340 = vst.msk [vmem:[#allocation2 + $0x61] sm:$0xff] %vm333_vm0, %v331_v6 }
  0x16   : > { %312 = vst [vmem:[#allocation2 + $0x30] sm:$0x1] %v3390_v7 }
  0x17   : > { %352 = vrot.lane.b32.xlu0 %v326_v2, %s3389_s12  ;;  %356 = vrot.lane.b32.xlu1 %v328_v4, %s3389_s12  ;;  %313 = vst [vmem:[#allocation2 + $0x40] sm:$0x1] %v3390_v7 }
  0x18   : > { %360 = vrot.lane.b32.xlu2 %v330_v5, %s3389_s12  ;;  %314 = vst [vmem:[#allocation2 + $0x50] sm:$0x1] %v3390_v7 }
  0x19   : > { %315 = vst [vmem:[#allocation2 + $0x60] sm:$0x1] %v3390_v7 }
  0x1a   : > { %316 = vst [vmem:[#allocation2 + $0x70] sm:$0x1] %v3390_v7 }
  0x1b   : > { %317 = vst [vmem:[#allocation2 + $0x9] sm:$0x1] %v3390_v7 }
  0x1c   : > { %318 = vst [vmem:[#allocation2 + $0x19] sm:$0x1] %v3390_v7 }
  0x1d   : > { %319 = vst [vmem:[#allocation2 + $0x29] sm:$0x1] %v3390_v7 }
  0x1e   : > { %320 = vst [vmem:[#allocation2 + $0x39] sm:$0x1] %v3390_v7 }
  0x1f   : > { %321 = vst [vmem:[#allocation2 + $0x49] sm:$0x1] %v3390_v7 }
  0x20   : > { %362 = vrot.lane.b32.xlu2 %v331_v6, %s3389_s12  ;;  %322 = vst [vmem:[#allocation2 + $0x59] sm:$0x1] %v3390_v7  ;;  %v3563_v6 = vld [vmem:[%s4330_s5] ss:$0 sm:$0xff] }
  0x21   : > { %323 = vst [vmem:[#allocation2 + $0x69] sm:$0x1] %v3390_v7 }
  0x22   : > { %324 = vst [vmem:[#allocation2 + $0x79] sm:$0x1] %v3390_v7 }
  0x23   : > { %341 = vst.msk [vmem:[#allocation2 + $0x71] sm:$0xff] %vm333_vm0, %v332_v8 }
  0x6a   : > { %v359_v11 = vpop.permute.xlu2 %358 }
  0x6b   : > { %379 = vst.msk [vmem:[#allocation2 + $0x41] sm:$0xff] %vm374_vm1, %v359_v11 }
  0x72   : > { %v361_v16 = vpop.permute.xlu2 %360  ;;  %v390_v24 = vld [vmem:[#allocation2 + $0x40] sm:$0xff] }
  0x73   : > { %380 = vst.msk [vmem:[#allocation2 + $0x51] sm:$0xff] %vm374_vm1, %v361_v16  ;;  %v398_v25 = vld [vmem:[#allocation2 + $0x41] sm:$0xff] }
  0x7a   : > { %v363_v20 = vpop.permute.xlu2 %362  ;;  %v391_v26 = vld [vmem:[#allocation2 + $0x50] sm:$0xff] }
  0x7b   : > { %381 = vst.msk [vmem:[#allocation2 + $0x61] sm:$0xff] %vm374_vm1, %v363_v20  ;;  %v399_v27 = vld [vmem:[#allocation2 + $0x51] sm:$0xff] }
  0x81   : > { %v351_v9 = vpop.permute.xlu0 %350  ;;  %v355_v10 = vpop.permute.xlu1 %354 }
  0x82   : > { %375 = vst.msk [vmem:[#allocation2 + $0x1] sm:$0xff] %vm374_vm1, %v351_v9  ;;  %v392_v28 = vld [vmem:[#allocation2 + $0x60] sm:$0xff] }
  0x83   : > { %377 = vst.msk [vmem:[#allocation2 + $0x21] sm:$0xff] %vm374_vm1, %v355_v10  ;;  %v400_v29 = vld [vmem:[#allocation2 + $0x61] sm:$0xff] }
  0x89   : > { %v353_v12 = vpop.permute.xlu0 %352  ;;  %v394_v13 = vld [vmem:[#allocation2 + $0x1] sm:$0xff]  ;;  %v357_v15 = vpop.permute.xlu1 %356 }
  0x8a   : > { %v386_v14 = vld [vmem:[#allocation2] sm:$0xff]  ;;  %376 = vst.msk [vmem:[#allocation2 + $0x11] sm:$0xff] %vm374_vm1, %v353_v12  ;;  %442 = vrot.lane.b32.xlu1 %v394_v13, %s3391_s13 }
  0x8b   : > { %410 = vrot.lane.b32.xlu0 %v386_v14, %s3392_s14  ;;  %378 = vst.msk [vmem:[#allocation2 + $0x31] sm:$0xff] %vm374_vm1, %v357_v15  ;;  %v388_v19 = vld [vmem:[#allocation2 + $0x20] sm:$0xff] }
  0x8c   : > { %v396_v21 = vld [vmem:[#allocation2 + $0x21] sm:$0xff] }
  0x91   : > { %v387_v17 = vld [vmem:[#allocation2 + $0x10] sm:$0xff] }
  0x92   : > { %412 = vrot.lane.b32.xlu1 %v387_v17, %s3392_s14  ;;  %v395_v18 = vld [vmem:[#allocation2 + $0x11] sm:$0xff] }
  0x93   : > { %466 = vrot.lane.b32.xlu0 %v394_v13, %s3393_s15  ;;  %444 = vrot.lane.b32.xlu2 %v395_v18, %s3391_s13  ;;  %v389_v22 = vld [vmem:[#allocation2 + $0x30] sm:$0xff] }
  0x94   : > { %v397_v23 = vld [vmem:[#allocation2 + $0x31] sm:$0xff] }
  0x9a   : > { %468 = vrot.lane.b32.xlu1 %v395_v18, %s3393_s15 }
  0x9b   : > { %364 = vrot.lane.b32.xlu0 %v332_v8, %s3389_s12  ;;  %414 = vrot.lane.b32.xlu2 %v388_v19, %s3392_s14 }
  0xa2   : > { %470 = vrot.lane.b32.xlu1 %v396_v21, %s3393_s15 }
  0xa3   : > { %446 = vrot.lane.b32.xlu0 %v396_v21, %s3391_s13  ;;  %416 = vrot.lane.b32.xlu2 %v389_v22, %s3392_s14 }
  0xaa   : > { %472 = vrot.lane.b32.xlu1 %v397_v23, %s3393_s15 }
  0xab   : > { %448 = vrot.lane.b32.xlu0 %v397_v23, %s3391_s13  ;;  %418 = vrot.lane.b32.xlu2 %v390_v24, %s3392_s14 }
  0xb2   : > { %474 = vrot.lane.b32.xlu1 %v398_v25, %s3393_s15 }
  0xb3   : > { %450 = vrot.lane.b32.xlu0 %v398_v25, %s3391_s13  ;;  %420 = vrot.lane.b32.xlu2 %v391_v26, %s3392_s14 }
  0xba   : > { %476 = vrot.lane.b32.xlu1 %v399_v27, %s3393_s15 }
  0xbb   : > { %452 = vrot.lane.b32.xlu0 %v399_v27, %s3391_s13  ;;  %422 = vrot.lane.b32.xlu2 %v392_v28, %s3392_s14 }
  0xc2   : > { %478 = vrot.lane.b32.xlu1 %v400_v29, %s3393_s15 }
  0xc3   : > { %454 = vrot.lane.b32.xlu0 %v400_v29, %s3391_s13 }
  0xed   : > { %v445_v34 = vpop.permute.xlu2 %444 }
  0xf5   : > { %v415_v39 = vpop.permute.xlu2 %414 }
  0xfc   : > { %v443_v32 = vpop.permute.xlu1 %442 }
  0xfd   : > { %v411_v33 = vpop.permute.xlu0 %410  ;;  %v417_v49 = vpop.permute.xlu2 %416 }
  0xfe   : > { %v490_v35 = vsel %vm333_vm0, %v411_v33, %v443_v32 }
 0x104   : > { %v413_v36 = vpop.permute.xlu1 %412 }
 0x105   : > { %v467_v37 = vpop.permute.xlu0 %466  ;;  %v491_v40 = vsel %vm333_vm0, %v413_v36, %v445_v34  ;;  %v419_v55 = vpop.permute.xlu2 %418 }
 0x106   : > { %v499_v38 = vsel %vm498_vm3, %v490_v35, %v467_v37 }
 0x107   : > { %2981 = vmatmul.msk.f32.vlgmr.msra.gmra.mxu0 %vm508_vm4, %v499_v38 }
 0x10c   : > { %v469_v41 = vpop.permute.xlu1 %468 }
 0x10d   : > { %v365_v42 = vpop.permute.xlu0 %364  ;;  %v500_v43 = vsel %vm498_vm3, %v491_v40, %v469_v41  ;;  %v421_v60 = vpop.permute.xlu2 %420 }
 0x10e   : > { %382 = vst.msk [vmem:[#allocation2 + $0x71] sm:$0xff] %vm374_vm1, %v365_v42 }
 0x10f   : > { %2982 = vmatmul.msk.f32.gmra.mxu0 %vm508_vm4, %v500_v43 }
 0x114   : > { %v471_v45 = vpop.permute.xlu1 %470 }
 0x115   : > { %v447_v44 = vpop.permute.xlu0 %446  ;;  %v401_v46 = vld [vmem:[#allocation2 + $0x71] sm:$0xff]  ;;  %v423_v1 = vpop.permute.xlu2 %422 }
 0x116   : > { %v393_v47 = vld [vmem:[#allocation2 + $0x70] sm:$0xff]  ;;  %v492_v48 = vsel %vm333_vm0, %v415_v39, %v447_v44  ;;  %456 = vrot.lane.b32.xlu0 %v401_v46, %s3391_s13  ;;  %480 = vrot.lane.b32.xlu1 %v401_v46, %s3393_s15  ;;  %s4297_s15 = scalar_lea.vmem %s4333_s8, %s2977_s30 }
 0x117   : > { %v501_v50 = vsel %vm498_vm3, %v492_v48, %v471_v45  ;;  %424 = vrot.lane.b32.xlu2 %v393_v47, %s3392_s14 }
 0x118   : > { %2983 = vmatmul.msk.f32.gmra.mxu0 %vm508_vm4, %v501_v50 }
 0x11c   : > { %v473_v52 = vpop.permute.xlu1 %472 }
 0x11d   : > { %v449_v51 = vpop.permute.xlu0 %448 }
 0x11e   : > { %v493_v53 = vsel %vm333_vm0, %v417_v49, %v449_v51 }
 0x11f   : > { %v502_v54 = vsel %vm498_vm3, %v493_v53, %v473_v52 }
 0x120   : > { %2984 = vmatmul.msk.f32.gmra.mxu0 %vm508_vm4, %v502_v54 }
 0x124   : > { %v475_v57 = vpop.permute.xlu1 %474 }
 0x125   : > { %v451_v56 = vpop.permute.xlu0 %450 }
 0x126   : > { %v494_v58 = vsel %vm333_vm0, %v419_v55, %v451_v56 }
 0x127   : > { %v503_v59 = vsel %vm498_vm3, %v494_v58, %v475_v57 }
 0x128   : > { %2985 = vmatmul.msk.f32.gmra.mxu0 %vm508_vm4, %v503_v59 }
 0x12c   : > { %v477_v62 = vpop.permute.xlu1 %476 }
 0x12d   : > { %v453_v61 = vpop.permute.xlu0 %452 }
 0x12e   : > { %v495_v63 = vsel %vm333_vm0, %v421_v60, %v453_v61 }
 0x12f   : > { %v504_v0 = vsel %vm498_vm3, %v495_v63, %v477_v62 }
 0x130   : > { %2986 = vmatmul.msk.f32.gmra.mxu0 %vm508_vm4, %v504_v0 }
 0x134   : > { %v479_v3 = vpop.permute.xlu1 %478 }
 0x135   : > { %v455_v2 = vpop.permute.xlu0 %454 }
 0x136   : > { %v496_v4 = vsel %vm333_vm0, %v423_v1, %v455_v2 }
 0x137   : > { %v505_v5 = vsel %vm498_vm3, %v496_v4, %v479_v3 }
 0x138   : > { %2987 = vmatmul.msk.f32.gmra.mxu0 %vm508_vm4, %v505_v5 }
 0x171   : > { %v425_v9 = vpop.permute.xlu2 %424 }
 0x184   : > { %v554_v7 = vpop.f32.mrf.mxu0 }
 0x185   : > { %v555_v8 = vadd.f32 %v3563_v6, %v554_v7 }
 0x187   : > { %v586_v10 = vmin.f32 %v555_v8, 0.0  ;;  %vm578_vm5 = vcmp.gt.f32.partialorder %v555_v8, 0.0 }
 0x188   : > { %v457_v11 = vpop.permute.xlu0 %456  ;;  %v481_v12 = vpop.permute.xlu1 %480 }
 0x189   : > { %v594_v13 = vmul.f32 1.442695, %v586_v10  ;;  %v497_v14 = vsel %vm333_vm0, %v425_v9, %v457_v11 }
 0x18a   : > { %v506_v15 = vsel %vm498_vm3, %v497_v14, %v481_v12 }
 0x18b   : > { %3221 = vpow2.f32 %v594_v13  ;;  %2988 = vmatmul.msk.f32.gmra.mxu0 %vm508_vm4, %v506_v15 }
 0x18c   : > { %v557_v16 = vpop.f32.mrf.mxu0 }
 0x18d   : > { %v558_v17 = vadd.f32 %v3563_v6, %v557_v16 }
 0x18f   : > { %v587_v18 = vmin.f32 %v558_v17, 0.0  ;;  %vm579_vm6 = vcmp.gt.f32.partialorder %v558_v17, 0.0 }
 0x191   : > { %v3222_v19 = vpop.eup %3221  ;;  %v596_v20 = vmul.f32 1.442695, %v587_v18 }
 0x192   : > { %v2989_v21 = vadd.f32 -1.0, %v3222_v19 }
 0x193   : > { %3223 = vpow2.f32 %v596_v20 }
 0x194   : > { %v618_v22 = vsel %vm578_vm5, %v555_v8, %v2989_v21 }
 0x195   : > { %634 = vrot.lane.b32.xlu2 %v618_v22, %s3391_s13  ;;  %v560_v23 = vpop.f32.mrf.mxu0 }
 0x196   : > { %v561_v24 = vadd.f32 %v3563_v6, %v560_v23 }
 0x198   : > { %v588_v25 = vmin.f32 %v561_v24, 0.0  ;;  %vm580_vm7 = vcmp.gt.f32.partialorder %v561_v24, 0.0 }
 0x199   : > { %v3224_v26 = vpop.eup %3223 }
 0x19a   : > { %v598_v27 = vmul.f32 1.442695, %v588_v25  ;;  %v2990_v28 = vadd.f32 -1.0, %v3224_v26 }
 0x19c   : > { %3225 = vpow2.f32 %v598_v27  ;;  %v619_v29 = vsel %vm579_vm6, %v558_v17, %v2990_v28 }
 0x19d   : > { %636 = vrot.lane.b32.xlu0 %v619_v29, %s3391_s13  ;;  %v563_v30 = vpop.f32.mrf.mxu0 }
 0x19e   : > { %v564_v31 = vadd.f32 %v3563_v6, %v563_v30 }
 0x1a0   : > { %v589_v32 = vmin.f32 %v564_v31, 0.0  ;;  %vm581_vm8 = vcmp.gt.f32.partialorder %v564_v31, 0.0 }
 0x1a2   : > { %v3226_v33 = vpop.eup %3225  ;;  %v600_v34 = vmul.f32 1.442695, %v589_v32 }
 0x1a3   : > { %v2991_v35 = vadd.f32 -1.0, %v3226_v33 }
 0x1a4   : > { %3227 = vpow2.f32 %v600_v34 }
 0x1a5   : > { %v566_v36 = vpop.f32.mrf.mxu0  ;;  %v620_v37 = vsel %vm580_vm7, %v561_v24, %v2991_v35 }
 0x1a6   : > { %v567_v38 = vadd.f32 %v3563_v6, %v566_v36  ;;  %638 = vrot.lane.b32.xlu1 %v620_v37, %s3391_s13 }
 0x1a8   : > { %v590_v39 = vmin.f32 %v567_v38, 0.0  ;;  %vm582_vm9 = vcmp.gt.f32.partialorder %v567_v38, 0.0 }
 0x1aa   : > { %v3228_v40 = vpop.eup %3227  ;;  %v602_v41 = vmul.f32 1.442695, %v590_v39 }
 0x1ab   : > { %v2992_v42 = vadd.f32 -1.0, %v3228_v40 }
 0x1ac   : > { %3229 = vpow2.f32 %v602_v41 }
 0x1ad   : > { %v569_v43 = vpop.f32.mrf.mxu0  ;;  %v621_v44 = vsel %vm581_vm8, %v564_v31, %v2992_v42  ;;  %vm908_vm8 = vcmask 622112  }
 0x1ae   : > { %v570_v45 = vadd.f32 %v3563_v6, %v569_v43  ;;  %640 = vrot.lane.b32.xlu2 %v621_v44, %s3391_s13 }
 0x1b0   : > { %v591_v46 = vmin.f32 %v570_v45, 0.0  ;;  %vm583_vm10 = vcmp.gt.f32.partialorder %v570_v45, 0.0 }
 0x1b2   : > { %v3230_v47 = vpop.eup %3229  ;;  %v604_v48 = vmul.f32 1.442695, %v591_v46 }
 0x1b3   : > { %v2993_v49 = vadd.f32 -1.0, %v3230_v47 }
 0x1b4   : > { %3231 = vpow2.f32 %v604_v48 }
 0x1b5   : > { %v622_v50 = vsel %vm582_vm9, %v567_v38, %v2993_v49  ;;  %v572_v51 = vpop.f32.mrf.mxu0 }
 0x1b6   : > { %642 = vrot.lane.b32.xlu0 %v622_v50, %s3391_s13  ;;  %v573_v52 = vadd.f32 %v3563_v6, %v572_v51 }
 0x1b8   : > { %v592_v53 = vmin.f32 %v573_v52, 0.0  ;;  %vm584_vm11 = vcmp.gt.f32.partialorder %v573_v52, 0.0 }
 0x1ba   : > { %v3232_v54 = vpop.eup %3231  ;;  %v606_v55 = vmul.f32 1.442695, %v592_v53 }
 0x1bb   : > { %v2994_v56 = vadd.f32 -1.0, %v3232_v54 }
 0x1bc   : > { %3233 = vpow2.f32 %v606_v55 }
 0x1bd   : > { %v623_v57 = vsel %vm583_vm10, %v570_v45, %v2994_v56  ;;  %vm1035_vm10 = vcmask 195584  }
 0x1be   : > { %644 = vrot.lane.b32.xlu1 %v623_v57, %s3391_s13 }
 0x1c2   : > { %v3234_v58 = vpop.eup %3233 }
 0x1c3   : > { %v2995_v59 = vadd.f32 -1.0, %v3234_v58 }
 0x1c5   : > { %v624_v60 = vsel %vm584_vm11, %v573_v52, %v2995_v59  ;;  %vm1045_vm11 = vcmask 293888  }
 0x1c6   : > { %646 = vrot.lane.b32.xlu2 %v624_v60, %s3391_s13 }
 0x1ef   : > { %v635_v61 = vpop.permute.xlu2 %634 }
 0x1f0   : > { %659 = vst.msk [vmem:[#allocation2 + $0x1] sm:$0xff] %vm658_vm12, %v635_v61 }
 0x1f7   : > { %v667_v62 = vld [vmem:[#allocation2 + $0x1] sm:$0xff] }
 0x1f8   : > { %v675_v63 = vld [vmem:[#allocation2 + $0x2] sm:$0xff]  ;;  %691 = vrot.lane.b32.xlu0 %v667_v62, %s3394_s22 }
 0x1f9   : > { %723 = vrot.lane.b32.xlu1 %v675_v63, %s3395_s23 }
 0x208   : > { %v641_v0 = vpop.permute.xlu2 %640  ;;  %v575_v1 = vpop.f32.mrf.mxu0 }
 0x209   : > { %662 = vst.msk [vmem:[#allocation2 + $0x31] sm:$0xff] %vm658_vm12, %v641_v0  ;;  %v576_v2 = vadd.f32 %v3563_v6, %v575_v1 }
 0x20b   : > { %v593_v3 = vmin.f32 %v576_v2, 0.0  ;;  %vm585_vm13 = vcmp.gt.f32.partialorder %v576_v2, 0.0 }
 0x20d   : > { %v608_v4 = vmul.f32 1.442695, %v593_v3 }
 0x20f   : > { %3235 = vpow2.f32 %v608_v4  ;;  %v637_v5 = vpop.permute.xlu0 %636 }
 0x210   : > { %660 = vst.msk [vmem:[#allocation2 + $0x11] sm:$0xff] %vm658_vm12, %v637_v5  ;;  %v670_v13 = vld [vmem:[#allocation2 + $0x31] sm:$0xff] }
 0x211   : > { %v678_v18 = vld [vmem:[#allocation2 + $0x32] sm:$0xff] }
 0x215   : > { %v3236_v7 = vpop.eup %3235 }
 0x216   : > { %v2996_v8 = vadd.f32 -1.0, %v3236_v7 }
 0x217   : > { %v676_v9 = vld [vmem:[#allocation2 + $0x12] sm:$0xff] }
 0x218   : > { %v668_v10 = vld [vmem:[#allocation2 + $0x11] sm:$0xff]  ;;  %v639_v11 = vpop.permute.xlu1 %638  ;;  %725 = vrot.lane.b32.xlu1 %v676_v9, %s3395_s23  ;;  %v625_v12 = vsel %vm585_vm13, %v576_v2, %v2996_v8 }
 0x219   : > { %693 = vrot.lane.b32.xlu0 %v668_v10, %s3394_s22  ;;  %661 = vst.msk [vmem:[#allocation2 + $0x21] sm:$0xff] %vm658_vm12, %v639_v11  ;;  %648 = vrot.lane.b32.xlu2 %v625_v12, %s3391_s13 }
 0x220   : > { %697 = vrot.lane.b32.xlu1 %v670_v13, %s3394_s22  ;;  %v669_v14 = vld [vmem:[#allocation2 + $0x21] sm:$0xff]  ;;  %v647_v16 = vpop.permute.xlu2 %646 }
 0x221   : > { %v677_v15 = vld [vmem:[#allocation2 + $0x22] sm:$0xff]  ;;  %695 = vrot.lane.b32.xlu2 %v669_v14, %s3394_s22  ;;  %665 = vst.msk [vmem:[#allocation2 + $0x61] sm:$0xff] %vm658_vm12, %v647_v16 }
 0x222   : > { %727 = vrot.lane.b32.xlu0 %v677_v15, %s3395_s23 }
 0x228   : > { %v643_v17 = vpop.permute.xlu0 %642  ;;  %v673_v22 = vld [vmem:[#allocation2 + $0x61] sm:$0xff] }
 0x229   : > { %663 = vst.msk [vmem:[#allocation2 + $0x41] sm:$0xff] %vm658_vm12, %v643_v17  ;;  %729 = vrot.lane.b32.xlu2 %v678_v18, %s3395_s23  ;;  %v681_v25 = vld [vmem:[#allocation2 + $0x62] sm:$0xff] }
 0x230   : > { %v645_v19 = vpop.permute.xlu1 %644  ;;  %v679_v20 = vld [vmem:[#allocation2 + $0x42] sm:$0xff] }
 0x231   : > { %v671_v21 = vld [vmem:[#allocation2 + $0x41] sm:$0xff]  ;;  %664 = vst.msk [vmem:[#allocation2 + $0x51] sm:$0xff] %vm658_vm12, %v645_v19  ;;  %731 = vrot.lane.b32.xlu1 %v679_v20, %s3395_s23 }
 0x232   : > { %699 = vrot.lane.b32.xlu0 %v671_v21, %s3394_s22 }
 0x238   : > { %v672_v23 = vld [vmem:[#allocation2 + $0x51] sm:$0xff] }
 0x239   : > { %v680_v24 = vld [vmem:[#allocation2 + $0x52] sm:$0xff]  ;;  %701 = vrot.lane.b32.xlu2 %v672_v23, %s3394_s22  ;;  %703 = vrot.lane.b32.xlu1 %v673_v22, %s3394_s22 }
 0x23a   : > { %733 = vrot.lane.b32.xlu0 %v680_v24, %s3395_s23 }
 0x241   : > { %735 = vrot.lane.b32.xlu2 %v681_v25, %s3395_s23 }
 0x26a   : > { %v692_v27 = vpop.permute.xlu0 %691 }
 0x26b   : > { %v724_v26 = vpop.permute.xlu1 %723  ;;  %v747_v28 = vsel %vm333_vm0, %v667_v62, %v692_v27 }
 0x26c   : > { %v755_v29 = vsel %vm498_vm3, %v747_v28, %v724_v26 }
 0x26d   : > { %2998 = vmatmul.msk.f32.vlgmr.msra.gmra.mxu1 %vm508_vm4, %v755_v29 }
 0x273   : > { %v649_v30 = vpop.permute.xlu2 %648 }
 0x274   : > { %666 = vst.msk [vmem:[#allocation2 + $0x71] sm:$0xff] %vm658_vm12, %v649_v30 }
 0x27b   : > { %v682_v31 = vld [vmem:[#allocation2 + $0x72] sm:$0xff]  ;;  %v696_v37 = vpop.permute.xlu2 %695 }
 0x27c   : > { %v674_v32 = vld [vmem:[#allocation2 + $0x71] sm:$0xff]  ;;  %737 = vrot.lane.b32.xlu1 %v682_v31, %s3395_s23  ;;  %v749_v38 = vsel %vm333_vm0, %v669_v14, %v696_v37 }
 0x27d   : > { %705 = vrot.lane.b32.xlu0 %v674_v32, %s3394_s22 }
 0x283   : > { %v730_v43 = vpop.permute.xlu2 %729 }
 0x28a   : > { %v726_v33 = vpop.permute.xlu1 %725 }
 0x28b   : > { %v694_v34 = vpop.permute.xlu0 %693 }
 0x28c   : > { %v748_v35 = vsel %vm333_vm0, %v668_v10, %v694_v34 }
 0x28d   : > { %v756_v36 = vsel %vm498_vm3, %v748_v35, %v726_v33 }
 0x28e   : > { %2999 = vmatmul.msk.f32.gmra.mxu1 %vm508_vm4, %v756_v36 }
 0x292   : > { %v698_v41 = vpop.permute.xlu1 %697 }
 0x293   : > { %v750_v42 = vsel %vm333_vm0, %v670_v13, %v698_v41  ;;  %v702_v49 = vpop.permute.xlu2 %701 }
 0x294   : > { %v728_v39 = vpop.permute.xlu0 %727  ;;  %v758_v44 = vsel %vm498_vm3, %v750_v42, %v730_v43  ;;  %v752_v50 = vsel %vm333_vm0, %v672_v23, %v702_v49 }
 0x295   : > { %v757_v40 = vsel %vm498_vm3, %v749_v38, %v728_v39 }
 0x296   : > { %3000 = vmatmul.msk.f32.gmra.mxu1 %vm508_vm4, %v757_v40 }
 0x29b   : > { %v736_v55 = vpop.permute.xlu2 %735 }
 0x29e   : > { %3001 = vmatmul.msk.f32.gmra.mxu1 %vm508_vm4, %v758_v44 }
 0x2a3   : > { %v732_v45 = vpop.permute.xlu1 %731 }
 0x2a4   : > { %v700_v46 = vpop.permute.xlu0 %699 }
 0x2a5   : > { %v751_v47 = vsel %vm333_vm0, %v671_v21, %v700_v46 }
 0x2a6   : > { %v759_v48 = vsel %vm498_vm3, %v751_v47, %v732_v45 }
 0x2a7   : > { %3002 = vmatmul.msk.f32.gmra.mxu1 %vm508_vm4, %v759_v48 }
 0x2ab   : > { %v704_v53 = vpop.permute.xlu1 %703 }
 0x2ac   : > { %v734_v51 = vpop.permute.xlu0 %733  ;;  %v753_v54 = vsel %vm333_vm0, %v673_v22, %v704_v53 }
 0x2ad   : > { %v760_v52 = vsel %vm498_vm3, %v752_v50, %v734_v51  ;;  %v761_v56 = vsel %vm498_vm3, %v753_v54, %v736_v55 }
 0x2ae   : > { %3003 = vmatmul.msk.f32.vlgmr.msra.gmra.mxu3 %vm508_vm4, %v760_v52 }
 0x2b6   : > { %3004 = vmatmul.msk.f32.gmra.mxu3 %vm508_vm4, %v761_v56 }
 0x2ea   : > { %v804_v57 = vpop.f32.mrf.mxu1 }
 0x2eb   : > { %v805_v58 = vadd.f32 %v3563_v6, %v804_v57 }
 0x2ed   : > { %v836_v59 = vmin.f32 %v805_v58, 0.0  ;;  %vm828_vm14 = vcmp.gt.f32.partialorder %v805_v58, 0.0 }
 0x2ee   : > { %v738_v60 = vpop.permute.xlu1 %737 }
 0x2ef   : > { %v706_v61 = vpop.permute.xlu0 %705  ;;  %v844_v62 = vmul.f32 1.442695, %v836_v59 }
 0x2f0   : > { %v754_v63 = vsel %vm333_vm0, %v674_v32, %v706_v61 }
 0x2f1   : > { %v762_v0 = vsel %vm498_vm3, %v754_v63, %v738_v60  ;;  %3237 = vpow2.f32 %v844_v62 }
 0x2f2   : > { %3005 = vmatmul.msk.f32.gmra.mxu3 %vm508_vm4, %v762_v0 }
 0x2f7   : > { %v3238_v1 = vpop.eup %3237 }
 0x2f8   : > { %v3006_v2 = vadd.f32 -1.0, %v3238_v1 }
 0x2fa   : > { %v868_v3 = vsel %vm828_vm14, %v805_v58, %v3006_v2  ;;  %v921_v2 = vld [vmem:[%s4327_s2 + $0x20] sm:$0xf] }
 0x2fb   : > { %884 = vrot.lane.b32.xlu2 %v868_v3, %s3394_s22  ;;  %v920_v3 = vld [vmem:[%s4327_s2 + $0x18] sm:$0xff]  ;;  %3014 = vmatpush.msk.msra.mxu2 %vm533_vm2, %v921_v2 }
 0x2fc   : > { %3031 = vmatpush.msk.msrb.mxu3 %vm533_vm2, %v921_v2 }
 0x2fd   : > { %1085 = vmatpush.msra.mxu2 %v920_v3 }
 0x2fe   : > { %1335 = vmatpush.msrb.mxu3 %v920_v3 }
 0x30b   : > { %v807_v4 = vpop.f32.mrf.mxu1 }
 0x30c   : > { %v808_v5 = vadd.f32 %v3563_v6, %v807_v4  ;;  %v919_v4 = vld [vmem:[%s4327_s2 + $0x10] sm:$0xff] }
 0x30d   : > { %1086 = vmatpush.msra.mxu2 %v919_v4  ;;  %1336 = vmatpush.msrb.mxu3 %v919_v4 }
 0x30e   : > { %v837_v7 = vmin.f32 %v808_v5, 0.0  ;;  %vm829_vm15 = vcmp.gt.f32.partialorder %v808_v5, 0.0 }
 0x310   : > { %v846_v8 = vmul.f32 1.442695, %v837_v7 }
 0x312   : > { %3239 = vpow2.f32 %v846_v8 }
 0x313   : > { %v810_v9 = vpop.f32.mrf.mxu1 }
 0x314   : > { %v811_v10 = vadd.f32 %v3563_v6, %v810_v9  ;;  %v917_v9 = vld [vmem:[%s4327_s2] sm:$0xff] }
 0x316   : > { %v838_v11 = vmin.f32 %v811_v10, 0.0  ;;  %vm830_vm1 = vcmp.gt.f32.partialorder %v811_v10, 0.0 }
 0x318   : > { %v3240_v12 = vpop.eup %3239  ;;  %v848_v13 = vmul.f32 1.442695, %v838_v11 }
 0x319   : > { %v3007_v14 = vadd.f32 -1.0, %v3240_v12 }
 0x31a   : > { %3241 = vpow2.f32 %v848_v13 }
 0x31b   : > { %v813_v15 = vpop.f32.mrf.mxu1  ;;  %v869_v16 = vsel %vm829_vm15, %v808_v5, %v3007_v14  ;;  %v918_v5 = vld [vmem:[%s4327_s2 + $0x8] sm:$0xff] }
 0x31c   : > { %v814_v17 = vadd.f32 %v3563_v6, %v813_v15  ;;  %886 = vrot.lane.b32.xlu0 %v869_v16, %s3394_s22  ;;  %1087 = vmatpush.msra.mxu2 %v918_v5 }
 0x31d   : > { %1337 = vmatpush.msrb.mxu3 %v918_v5 }
 0x31e   : > { %v839_v18 = vmin.f32 %v814_v17, 0.0  ;;  %vm831_vm3 = vcmp.gt.f32.partialorder %v814_v17, 0.0  ;;  %1088 = vmatpush.msra.mxu2 %v917_v9 }
 0x31f   : > { %1338 = vmatpush.msrb.mxu3 %v917_v9 }
 0x320   : > { %v3242_v19 = vpop.eup %3241  ;;  %v850_v20 = vmul.f32 1.442695, %v839_v18 }
 0x321   : > { %v3008_v21 = vadd.f32 -1.0, %v3242_v19 }
 0x322   : > { %3243 = vpow2.f32 %v850_v20 }
 0x323   : > { %v870_v22 = vsel %vm830_vm1, %v811_v10, %v3008_v21 }
 0x324   : > { %888 = vrot.lane.b32.xlu1 %v870_v22, %s3394_s22  ;;  %v816_v23 = vpop.f32.mrf.mxu1 }
 0x325   : > { %v817_v24 = vadd.f32 %v3563_v6, %v816_v23 }
 0x327   : > { %v840_v25 = vmin.f32 %v817_v24, 0.0  ;;  %vm832_vm5 = vcmp.gt.f32.partialorder %v817_v24, 0.0 }
 0x328   : > { %v3244_v26 = vpop.eup %3243 }
 0x329   : > { %v852_v27 = vmul.f32 1.442695, %v840_v25  ;;  %v3009_v28 = vadd.f32 -1.0, %v3244_v26 }
 0x32b   : > { %3245 = vpow2.f32 %v852_v27  ;;  %v871_v29 = vsel %vm831_vm3, %v814_v17, %v3009_v28 }
 0x32c   : > { %890 = vrot.lane.b32.xlu2 %v871_v29, %s3394_s22 }
 0x331   : > { %v3246_v30 = vpop.eup %3245  ;;  %v819_v31 = vpop.f32.mrf.mxu3 }
 0x332   : > { %v3010_v32 = vadd.f32 -1.0, %v3246_v30  ;;  %v820_v33 = vadd.f32 %v3563_v6, %v819_v31 }
 0x334   : > { %v872_v34 = vsel %vm832_vm5, %v817_v24, %v3010_v32  ;;  %v841_v35 = vmin.f32 %v820_v33, 0.0  ;;  %vm833_vm6 = vcmp.gt.f32.partialorder %v820_v33, 0.0 }
 0x335   : > { %892 = vrot.lane.b32.xlu0 %v872_v34, %s3394_s22 }
 0x336   : > { %v854_v36 = vmul.f32 1.442695, %v841_v35 }
 0x338   : > { %3247 = vpow2.f32 %v854_v36 }
 0x339   : > { %v822_v37 = vpop.f32.mrf.mxu3 }
 0x33a   : > { %v823_v38 = vadd.f32 %v3563_v6, %v822_v37 }
 0x33c   : > { %v842_v39 = vmin.f32 %v823_v38, 0.0  ;;  %vm834_vm7 = vcmp.gt.f32.partialorder %v823_v38, 0.0 }
 0x33e   : > { %v3248_v40 = vpop.eup %3247  ;;  %v856_v41 = vmul.f32 1.442695, %v842_v39 }
 0x33f   : > { %v3011_v42 = vadd.f32 -1.0, %v3248_v40 }
 0x340   : > { %3249 = vpow2.f32 %v856_v41 }
 0x341   : > { %v873_v43 = vsel %vm833_vm6, %v820_v33, %v3011_v42  ;;  %vm1194_vm6 = vcmask 162912  }
 0x342   : > { %894 = vrot.lane.b32.xlu1 %v873_v43, %s3394_s22 }
 0x346   : > { %v3250_v44 = vpop.eup %3249 }
 0x347   : > { %v3012_v45 = vadd.f32 -1.0, %v3250_v44 }
 0x349   : > { %v874_v46 = vsel %vm834_vm7, %v823_v38, %v3012_v45 }
 0x34a   : > { %896 = vrot.lane.b32.xlu1 %v874_v46, %s3394_s22 }
 0x355   : > { %v885_v47 = vpop.permute.xlu2 %884 }
 0x356   : > { %909 = vst.msk [vmem:[#allocation2 + $0x1] sm:$0xff] %vm908_vm8, %v885_v47 }
 0x35d   : > { %v923_v48 = vld [vmem:[#allocation2] sm:$0xff] }
 0x35e   : > { %v931_v49 = vld [vmem:[#allocation2 + $0x1] sm:$0xff]  ;;  %947 = vrot.lane.b32.xlu2 %v923_v48, %s3392_s14 }
 0x35f   : > { %979 = vrot.lane.b32.xlu0 %v931_v49, %s3396_s24 }
 0x366   : > { %1003 = vrot.lane.b32.xlu2 %v931_v49, %s3397_s25 }
 0x375   : > { %v825_v50 = vpop.f32.mrf.mxu3 }
 0x376   : > { %v826_v51 = vadd.f32 %v3563_v6, %v825_v50 }
 0x378   : > { %v843_v52 = vmin.f32 %v826_v51, 0.0  ;;  %vm835_vm9 = vcmp.gt.f32.partialorder %v826_v51, 0.0 }
 0x37a   : > { %v858_v53 = vmul.f32 1.442695, %v843_v52 }
 0x37c   : > { %3251 = vpow2.f32 %v858_v53 }
 0x382   : > { %v3252_v54 = vpop.eup %3251 }
 0x383   : > { %v3013_v55 = vadd.f32 -1.0, %v3252_v54  ;;  %v3721_v54 = vld [vmem:[%s4330_s5 + $0x1] ss:$0 sm:$0xff] }
 0x385   : > { %v875_v56 = vsel %vm835_vm9, %v826_v51, %v3013_v55 }
 0x386   : > { %v891_v57 = vpop.permute.xlu2 %890  ;;  %898 = vrot.lane.b32.xlu2 %v875_v56, %s3394_s22  ;;  %s3409_s22 = smov 108  }
 0x387   : > { %912 = vst.msk [vmem:[#allocation2 + $0x31] sm:$0xff] %vm908_vm8, %v891_v57 }
 0x38e   : > { %v887_v58 = vpop.permute.xlu0 %886  ;;  %v934_v63 = vld [vmem:[#allocation2 + $0x31] sm:$0xff] }
 0x38f   : > { %910 = vst.msk [vmem:[#allocation2 + $0x11] sm:$0xff] %vm908_vm8, %v887_v58  ;;  %v926_v0 = vld [vmem:[#allocation2 + $0x30] sm:$0xff] }
 0x396   : > { %v889_v59 = vpop.permute.xlu1 %888  ;;  %v932_v60 = vld [vmem:[#allocation2 + $0x11] sm:$0xff] }
 0x397   : > { %v924_v61 = vld [vmem:[#allocation2 + $0x10] sm:$0xff]  ;;  %911 = vst.msk [vmem:[#allocation2 + $0x21] sm:$0xff] %vm908_vm8, %v889_v59  ;;  %981 = vrot.lane.b32.xlu1 %v932_v60, %s3396_s24 }
 0x398   : > { %949 = vrot.lane.b32.xlu0 %v924_v61, %s3392_s14 }
 0x39e   : > { %v933_v6 = vld [vmem:[#allocation2 + $0x21] sm:$0xff] }
 0x39f   : > { %v925_v62 = vld [vmem:[#allocation2 + $0x20] sm:$0xff]  ;;  %983 = vrot.lane.b32.xlu2 %v933_v6, %s3396_s24 }
 0x3a0   : > { %951 = vrot.lane.b32.xlu1 %v925_v62, %s3392_s14  ;;  %1005 = vrot.lane.b32.xlu0 %v932_v60, %s3397_s25 }
 0x3a7   : > { %985 = vrot.lane.b32.xlu2 %v934_v63, %s3396_s24  ;;  %v893_v1 = vpop.permute.xlu0 %892 }
 0x3a8   : > { %953 = vrot.lane.b32.xlu1 %v926_v0, %s3392_s14  ;;  %1007 = vrot.lane.b32.xlu0 %v933_v6, %s3397_s25  ;;  %913 = vst.msk [vmem:[#allocation2 + $0x41] sm:$0xff] %vm908_vm8, %v893_v1 }
 0x3af   : > { %v935_v7 = vld [vmem:[#allocation2 + $0x41] sm:$0xff] }
 0x3b0   : > { %v927_v8 = vld [vmem:[#allocation2 + $0x40] sm:$0xff]  ;;  %1009 = vrot.lane.b32.xlu0 %v934_v63, %s3397_s25  ;;  %987 = vrot.lane.b32.xlu2 %v935_v7, %s3396_s24 }
 0x3b1   : > { %955 = vrot.lane.b32.xlu1 %v927_v8, %s3392_s14 }
 0x3b4   : > { %v895_v10 = vpop.permute.xlu1 %894 }
 0x3b5   : > { %914 = vst.msk [vmem:[#allocation2 + $0x51] sm:$0xff] %vm908_vm8, %v895_v10 }
 0x3b8   : > { %1011 = vrot.lane.b32.xlu0 %v935_v7, %s3397_s25  ;;  %v948_v16 = vpop.permute.xlu2 %947 }
 0x3bc   : > { %v897_v11 = vpop.permute.xlu1 %896  ;;  %v936_v12 = vld [vmem:[#allocation2 + $0x51] sm:$0xff] }
 0x3bd   : > { %v928_v13 = vld [vmem:[#allocation2 + $0x50] sm:$0xff]  ;;  %915 = vst.msk [vmem:[#allocation2 + $0x61] sm:$0xff] %vm908_vm8, %v897_v11  ;;  %989 = vrot.lane.b32.xlu2 %v936_v12, %s3396_s24 }
 0x3be   : > { %957 = vrot.lane.b32.xlu1 %v928_v13, %s3392_s14 }
 0x3c0   : > { %1013 = vrot.lane.b32.xlu0 %v936_v12, %s3397_s25  ;;  %v1004_v18 = vpop.permute.xlu2 %1003 }
 0x3c4   : > { %v937_v14 = vld [vmem:[#allocation2 + $0x61] sm:$0xff] }
 0x3c5   : > { %v929_v15 = vld [vmem:[#allocation2 + $0x60] sm:$0xff]  ;;  %991 = vrot.lane.b32.xlu2 %v937_v14, %s3396_s24 }
 0x3c6   : > { %959 = vrot.lane.b32.xlu1 %v929_v15, %s3392_s14 }
 0x3c8   : > { %1015 = vrot.lane.b32.xlu0 %v937_v14, %s3397_s25 }
 0x3d1   : > { %v980_v17 = vpop.permute.xlu0 %979 }
 0x3d2   : > { %v1027_v19 = vsel %vm508_vm4, %v948_v16, %v980_v17 }
 0x3d3   : > { %v1036_v20 = vsel %vm1035_vm10, %v1027_v19, %v1004_v18 }
 0x3d4   : > { %3015 = vmatmul.msk.f32.vlgmr.msra.gmra.mxu2 %vm1045_vm11, %v1036_v20 }
 0x3e0   : > { %v899_v21 = vpop.permute.xlu2 %898 }
 0x3e1   : > { %916 = vst.msk [vmem:[#allocation2 + $0x71] sm:$0xff] %vm908_vm8, %v899_v21 }
 0x3e8   : > { %v938_v22 = vld [vmem:[#allocation2 + $0x71] sm:$0xff] }
 0x3e9   : > { %v930_v23 = vld [vmem:[#allocation2 + $0x70] sm:$0xff]  ;;  %1017 = vrot.lane.b32.xlu0 %v938_v22, %s3397_s25  ;;  %993 = vrot.lane.b32.xlu2 %v938_v22, %s3396_s24  ;;  %s3400_s25 = smov 20  }
 0x3ea   : > { %961 = vrot.lane.b32.xlu1 %v930_v23, %s3392_s14 }
 0x3f9   : > { %v984_v26 = vpop.permute.xlu2 %983 }
 0x401   : > { %v986_v34 = vpop.permute.xlu2 %985 }
 0x409   : > { %v982_v24 = vpop.permute.xlu1 %981 }
 0x40a   : > { %v950_v25 = vpop.permute.xlu0 %949  ;;  %v988_v39 = vpop.permute.xlu2 %987 }
 0x40b   : > { %v1028_v27 = vsel %vm508_vm4, %v950_v25, %v982_v24 }
 0x412   : > { %v1006_v28 = vpop.permute.xlu0 %1005  ;;  %v952_v29 = vpop.permute.xlu1 %951 }
 0x413   : > { %v1037_v30 = vsel %vm1035_vm10, %v1028_v27, %v1006_v28  ;;  %v1029_v31 = vsel %vm508_vm4, %v952_v29, %v984_v26 }
 0x414   : > { %3016 = vmatmul.msk.f32.gmra.mxu2 %vm1045_vm11, %v1037_v30 }
 0x417   : > { %v990_v44 = vpop.permute.xlu2 %989 }
 0x41a   : > { %v1008_v32 = vpop.permute.xlu0 %1007  ;;  %v954_v35 = vpop.permute.xlu1 %953 }
 0x41b   : > { %v1038_v33 = vsel %vm1035_vm10, %v1029_v31, %v1008_v32  ;;  %v1030_v36 = vsel %vm508_vm4, %v954_v35, %v986_v34 }
 0x41c   : > { %3017 = vmatmul.msk.f32.gmra.mxu2 %vm1045_vm11, %v1038_v33 }
 0x41f   : > { %v992_v49 = vpop.permute.xlu2 %991 }
 0x422   : > { %v1010_v37 = vpop.permute.xlu0 %1009 }
 0x423   : > { %v1039_v38 = vsel %vm1035_vm10, %v1030_v36, %v1010_v37  ;;  %v956_v40 = vpop.permute.xlu1 %955 }
 0x424   : > { %3018 = vmatmul.msk.f32.gmra.mxu2 %vm1045_vm11, %v1039_v38  ;;  %v1031_v41 = vsel %vm508_vm4, %v956_v40, %v988_v39 }
 0x42a   : > { %v1012_v42 = vpop.permute.xlu0 %1011 }
 0x42b   : > { %v1040_v43 = vsel %vm1035_vm10, %v1031_v41, %v1012_v42 }
 0x42c   : > { %3019 = vmatmul.msk.f32.gmra.mxu2 %vm1045_vm11, %v1040_v43 }
 0x430   : > { %v958_v45 = vpop.permute.xlu1 %957 }
 0x431   : > { %v1032_v46 = vsel %vm508_vm4, %v958_v45, %v990_v44 }
 0x432   : > { %v1014_v47 = vpop.permute.xlu0 %1013 }
 0x433   : > { %v1041_v48 = vsel %vm1035_vm10, %v1032_v46, %v1014_v47 }
 0x434   : > { %3020 = vmatmul.msk.f32.gmra.mxu2 %vm1045_vm11, %v1041_v48 }
 0x438   : > { %v960_v50 = vpop.permute.xlu1 %959 }
 0x439   : > { %v1033_v51 = vsel %vm508_vm4, %v960_v50, %v992_v49 }
 0x43a   : > { %v1016_v52 = vpop.permute.xlu0 %1015 }
 0x43b   : > { %v1042_v53 = vsel %vm1035_vm10, %v1033_v51, %v1016_v52 }
 0x43c   : > { %3021 = vmatmul.msk.f32.gmra.mxu2 %vm1045_vm11, %v1042_v53 }
 0x443   : > { %v994_v59 = vpop.permute.xlu2 %993 }
 0x457   : > { %v1090_v55 = vpop.f32.mrf.mxu2 }
 0x458   : > { %v1091_v56 = vadd.f32 %v3721_v54, %v1090_v55 }
 0x45a   : > { %v1122_v57 = vmin.f32 %v1091_v56, 0.0  ;;  %vm1114_vm12 = vcmp.gt.f32.partialorder %v1091_v56, 0.0 }
 0x45b   : > { %v1018_v58 = vpop.permute.xlu0 %1017 }
 0x45c   : > { %v1130_v60 = vmul.f32 1.442695, %v1122_v57  ;;  %v962_v61 = vpop.permute.xlu1 %961 }
 0x45d   : > { %v1034_v6 = vsel %vm508_vm4, %v962_v61, %v994_v59 }
 0x45e   : > { %3253 = vpow2.f32 %v1130_v60  ;;  %v1043_v62 = vsel %vm1035_vm10, %v1034_v6, %v1018_v58 }
 0x45f   : > { %3022 = vmatmul.msk.f32.gmra.mxu2 %vm1045_vm11, %v1043_v62 }
 0x464   : > { %v3254_v63 = vpop.eup %3253 }
 0x465   : > { %v3023_v0 = vadd.f32 -1.0, %v3254_v63 }
 0x467   : > { %v1154_v1 = vsel %vm1114_vm12, %v1091_v56, %v3023_v0 }
 0x468   : > { %1170 = vrot.lane.b32.xlu1 %v1154_v1, %s3396_s24 }
 0x497   : > { %v1093_v2 = vpop.f32.mrf.mxu2 }
 0x498   : > { %v1094_v3 = vadd.f32 %v3721_v54, %v1093_v2 }
 0x49a   : > { %v1123_v4 = vmin.f32 %v1094_v3, 0.0  ;;  %vm1115_vm13 = vcmp.gt.f32.partialorder %v1094_v3, 0.0 }
 0x49c   : > { %v1132_v5 = vmul.f32 1.442695, %v1123_v4 }
 0x49e   : > { %3255 = vpow2.f32 %v1132_v5 }
 0x49f   : > { %v1096_v7 = vpop.f32.mrf.mxu2 }
 0x4a0   : > { %v1097_v8 = vadd.f32 %v3721_v54, %v1096_v7 }
 0x4a2   : > { %v1124_v9 = vmin.f32 %v1097_v8, 0.0  ;;  %vm1116_vm14 = vcmp.gt.f32.partialorder %v1097_v8, 0.0 }
 0x4a4   : > { %v3256_v10 = vpop.eup %3255  ;;  %v1134_v11 = vmul.f32 1.442695, %v1124_v9 }
 0x4a5   : > { %v3024_v12 = vadd.f32 -1.0, %v3256_v10 }
 0x4a6   : > { %3257 = vpow2.f32 %v1134_v11 }
 0x4a7   : > { %v1099_v13 = vpop.f32.mrf.mxu2  ;;  %v1155_v14 = vsel %vm1115_vm13, %v1094_v3, %v3024_v12 }
 0x4a8   : > { %v1100_v15 = vadd.f32 %v3721_v54, %v1099_v13  ;;  %1172 = vrot.lane.b32.xlu2 %v1155_v14, %s3396_s24 }
 0x4aa   : > { %v1125_v16 = vmin.f32 %v1100_v15, 0.0  ;;  %vm1117_vm15 = vcmp.gt.f32.partialorder %v1100_v15, 0.0 }
 0x4ac   : > { %v3258_v17 = vpop.eup %3257  ;;  %v1136_v18 = vmul.f32 1.442695, %v1125_v16 }
 0x4ad   : > { %v3025_v19 = vadd.f32 -1.0, %v3258_v17 }
 0x4ae   : > { %3259 = vpow2.f32 %v1136_v18 }
 0x4af   : > { %v1102_v20 = vpop.f32.mrf.mxu2  ;;  %v1156_v21 = vsel %vm1116_vm14, %v1097_v8, %v3025_v19 }
 0x4b0   : > { %v1103_v22 = vadd.f32 %v3721_v54, %v1102_v20  ;;  %1174 = vrot.lane.b32.xlu0 %v1156_v21, %s3396_s24 }
 0x4b2   : > { %v1126_v23 = vmin.f32 %v1103_v22, 0.0  ;;  %vm1118_vm1 = vcmp.gt.f32.partialorder %v1103_v22, 0.0 }
 0x4b4   : > { %v3260_v24 = vpop.eup %3259  ;;  %v1138_v25 = vmul.f32 1.442695, %v1126_v23 }
 0x4b5   : > { %v3026_v26 = vadd.f32 -1.0, %v3260_v24 }
 0x4b6   : > { %3261 = vpow2.f32 %v1138_v25 }
 0x4b7   : > { %v1105_v27 = vpop.f32.mrf.mxu2  ;;  %v1157_v28 = vsel %vm1117_vm15, %v1100_v15, %v3026_v26 }
 0x4b8   : > { %v1106_v29 = vadd.f32 %v3721_v54, %v1105_v27  ;;  %1176 = vrot.lane.b32.xlu1 %v1157_v28, %s3396_s24 }
 0x4ba   : > { %v1127_v30 = vmin.f32 %v1106_v29, 0.0  ;;  %vm1119_vm3 = vcmp.gt.f32.partialorder %v1106_v29, 0.0 }
 0x4bc   : > { %v3262_v31 = vpop.eup %3261  ;;  %v1140_v32 = vmul.f32 1.442695, %v1127_v30 }
 0x4bd   : > { %v3027_v33 = vadd.f32 -1.0, %v3262_v31 }
 0x4be   : > { %3263 = vpow2.f32 %v1140_v32 }
 0x4bf   : > { %v1108_v34 = vpop.f32.mrf.mxu2  ;;  %v1158_v35 = vsel %vm1118_vm1, %v1103_v22, %v3027_v33  ;;  %vm1444_vm1 = vcmask 687712  }
 0x4c0   : > { %v1109_v36 = vadd.f32 %v3721_v54, %v1108_v34  ;;  %1178 = vrot.lane.b32.xlu2 %v1158_v35, %s3396_s24 }
 0x4c2   : > { %v1128_v37 = vmin.f32 %v1109_v36, 0.0  ;;  %vm1120_vm5 = vcmp.gt.f32.partialorder %v1109_v36, 0.0 }
 0x4c4   : > { %v3264_v38 = vpop.eup %3263  ;;  %v1142_v39 = vmul.f32 1.442695, %v1128_v37 }
 0x4c5   : > { %v3028_v40 = vadd.f32 -1.0, %v3264_v38 }
 0x4c6   : > { %3265 = vpow2.f32 %v1142_v39 }
 0x4c7   : > { %v1159_v41 = vsel %vm1119_vm3, %v1106_v29, %v3028_v40  ;;  %vm1566_vm3 = vcmask 162816  }
 0x4c8   : > { %1180 = vrot.lane.b32.xlu0 %v1159_v41, %s3396_s24 }
 0x4cc   : > { %v3266_v42 = vpop.eup %3265 }
 0x4cd   : > { %v3029_v43 = vadd.f32 -1.0, %v3266_v42 }
 0x4cf   : > { %v1160_v44 = vsel %vm1120_vm5, %v1109_v36, %v3029_v43  ;;  %vm1575_vm5 = vcmask 326656  }
 0x4d0   : > { %1182 = vrot.lane.b32.xlu2 %v1160_v44, %s3396_s24 }
 0x4da   : > { %v1171_v45 = vpop.permute.xlu1 %1170 }
 0x4db   : > { %1195 = vst.msk [vmem:[#allocation2 + $0x1] sm:$0xff] %vm1194_vm6, %v1171_v45 }
 0x4e2   : > { %v1111_v46 = vpop.f32.mrf.mxu2  ;;  %v1203_v47 = vld [vmem:[#allocation2 + $0x1] sm:$0xff] }
 0x4e3   : > { %v1211_v48 = vld [vmem:[#allocation2 + $0x2] sm:$0xff]  ;;  %v1112_v49 = vadd.f32 %v3721_v54, %v1111_v46  ;;  %1227 = vrot.lane.b32.xlu1 %v1203_v47, %s3398_s20 }
 0x4e4   : > { %1259 = vrot.lane.b32.xlu0 %v1211_v48, %s3399_s21 }
 0x4e5   : > { %v1129_v50 = vmin.f32 %v1112_v49, 0.0  ;;  %vm1121_vm7 = vcmp.gt.f32.partialorder %v1112_v49, 0.0 }
 0x4e7   : > { %v1144_v51 = vmul.f32 1.442695, %v1129_v50 }
 0x4e9   : > { %3267 = vpow2.f32 %v1144_v51 }
 0x4ef   : > { %v3268_v52 = vpop.eup %3267 }
 0x4f0   : > { %v3030_v53 = vadd.f32 -1.0, %v3268_v52 }
 0x4f2   : > { %v1161_v55 = vsel %vm1121_vm7, %v1112_v49, %v3030_v53 }
 0x4f3   : > { %1184 = vrot.lane.b32.xlu2 %v1161_v55, %s3396_s24 }
 0x502   : > { %v1173_v56 = vpop.permute.xlu2 %1172 }
 0x503   : > { %1196 = vst.msk [vmem:[#allocation2 + $0x11] sm:$0xff] %vm1194_vm6, %v1173_v56 }
 0x50a   : > { %v1204_v57 = vld [vmem:[#allocation2 + $0x11] sm:$0xff] }
 0x50b   : > { %v1212_v58 = vld [vmem:[#allocation2 + $0x12] sm:$0xff]  ;;  %1229 = vrot.lane.b32.xlu1 %v1204_v57, %s3398_s20 }
 0x50c   : > { %1261 = vrot.lane.b32.xlu0 %v1212_v58, %s3399_s21 }
 0x51a   : > { %v1179_v59 = vpop.permute.xlu2 %1178 }
 0x51b   : > { %1199 = vst.msk [vmem:[#allocation2 + $0x41] sm:$0xff] %vm1194_vm6, %v1179_v59 }
 0x522   : > { %v1175_v60 = vpop.permute.xlu0 %1174  ;;  %v1207_v1 = vld [vmem:[#allocation2 + $0x41] sm:$0xff] }
 0x523   : > { %1197 = vst.msk [vmem:[#allocation2 + $0x21] sm:$0xff] %vm1194_vm6, %v1175_v60  ;;  %v1215_v4 = vld [vmem:[#allocation2 + $0x42] sm:$0xff] }
 0x52a   : > { %v1177_v61 = vpop.permute.xlu1 %1176  ;;  %v1183_v6 = vpop.permute.xlu2 %1182  ;;  %v1213_v62 = vld [vmem:[#allocation2 + $0x22] sm:$0xff] }
 0x52b   : > { %v1205_v63 = vld [vmem:[#allocation2 + $0x21] sm:$0xff]  ;;  %1198 = vst.msk [vmem:[#allocation2 + $0x31] sm:$0xff] %vm1194_vm6, %v1177_v61  ;;  %1263 = vrot.lane.b32.xlu2 %v1213_v62, %s3399_s21 }
 0x52c   : > { %1231 = vrot.lane.b32.xlu1 %v1205_v63, %s3398_s20  ;;  %1201 = vst.msk [vmem:[#allocation2 + $0x61] sm:$0xff] %vm1194_vm6, %v1183_v6 }
 0x532   : > { %v1206_v0 = vld [vmem:[#allocation2 + $0x31] sm:$0xff] }
 0x533   : > { %v1214_v2 = vld [vmem:[#allocation2 + $0x32] sm:$0xff]  ;;  %1233 = vrot.lane.b32.xlu0 %v1206_v0, %s3398_s20  ;;  %1235 = vrot.lane.b32.xlu2 %v1207_v1, %s3398_s20  ;;  %v1209_v5 = vld [vmem:[#allocation2 + $0x61] sm:$0xff] }
 0x534   : > { %1265 = vrot.lane.b32.xlu1 %v1214_v2, %s3399_s21  ;;  %v1217_v9 = vld [vmem:[#allocation2 + $0x62] sm:$0xff] }
 0x53a   : > { %v1181_v3 = vpop.permute.xlu0 %1180 }
 0x53b   : > { %1200 = vst.msk [vmem:[#allocation2 + $0x51] sm:$0xff] %vm1194_vm6, %v1181_v3  ;;  %1267 = vrot.lane.b32.xlu0 %v1215_v4, %s3399_s21 }
 0x542   : > { %v1216_v7 = vld [vmem:[#allocation2 + $0x52] sm:$0xff] }
 0x543   : > { %v1208_v8 = vld [vmem:[#allocation2 + $0x51] sm:$0xff]  ;;  %1239 = vrot.lane.b32.xlu0 %v1209_v5, %s3398_s20  ;;  %1269 = vrot.lane.b32.xlu2 %v1216_v7, %s3399_s21 }
 0x544   : > { %1237 = vrot.lane.b32.xlu1 %v1208_v8, %s3398_s20 }
 0x54c   : > { %1271 = vrot.lane.b32.xlu1 %v1217_v9, %s3399_s21 }
 0x54d   : > { %v1185_v10 = vpop.permute.xlu2 %1184 }
 0x54e   : > { %1202 = vst.msk [vmem:[#allocation2 + $0x71] sm:$0xff] %vm1194_vm6, %v1185_v10  ;;  %vm1585_vm6 = vcmask 490496  }
 0x555   : > { %v1228_v11 = vpop.permute.xlu1 %1227  ;;  %v1218_v12 = vld [vmem:[#allocation2 + $0x72] sm:$0xff] }
 0x556   : > { %v1210_v13 = vld [vmem:[#allocation2 + $0x71] sm:$0xff]  ;;  %v1260_v14 = vpop.permute.xlu0 %1259  ;;  %v1283_v15 = vsel %vm508_vm4, %v1203_v47, %v1228_v11  ;;  %1273 = vrot.lane.b32.xlu0 %v1218_v12, %s3399_s21  ;;  %s3407_s21 = smov 56  }
 0x557   : > { %1241 = vrot.lane.b32.xlu2 %v1210_v13, %s3398_s20  ;;  %v1291_v16 = vsel %vm1035_vm10, %v1283_v15, %v1260_v14 }
 0x558   : > { %3032 = vmatmul.msk.f32.vlgmr.msrb.gmra.mxu3 %vm1045_vm11, %v1291_v16 }
 0x57d   : > { %v1230_v17 = vpop.permute.xlu1 %1229 }
 0x57e   : > { %v1262_v18 = vpop.permute.xlu0 %1261  ;;  %v1284_v19 = vsel %vm508_vm4, %v1204_v57, %v1230_v17 }
 0x57f   : > { %v1292_v20 = vsel %vm1035_vm10, %v1284_v19, %v1262_v18 }
 0x580   : > { %3033 = vmatmul.msk.f32.gmra.mxu3 %vm1045_vm11, %v1292_v20 }
 0x585   : > { %v1264_v22 = vpop.permute.xlu2 %1263 }
 0x58d   : > { %v1236_v29 = vpop.permute.xlu2 %1235 }
 0x58e   : > { %v1287_v30 = vsel %vm508_vm4, %v1207_v1, %v1236_v29 }
 0x59d   : > { %v1270_v34 = vpop.permute.xlu2 %1269 }
 0x59e   : > { %v1232_v21 = vpop.permute.xlu1 %1231 }
 0x59f   : > { %v1285_v23 = vsel %vm508_vm4, %v1205_v63, %v1232_v21 }
 0x5a0   : > { %v1293_v24 = vsel %vm1035_vm10, %v1285_v23, %v1264_v22 }
 0x5a1   : > { %3034 = vmatmul.msk.f32.gmra.mxu3 %vm1045_vm11, %v1293_v24 }
 0x5a5   : > { %v1234_v25 = vpop.permute.xlu0 %1233 }
 0x5a6   : > { %v1266_v26 = vpop.permute.xlu1 %1265  ;;  %v1286_v27 = vsel %vm508_vm4, %v1206_v0, %v1234_v25 }
 0x5a7   : > { %v1294_v28 = vsel %vm1035_vm10, %v1286_v27, %v1266_v26 }
 0x5a9   : > { %3035 = vmatmul.msk.f32.gmra.mxu3 %vm1045_vm11, %v1294_v28 }
 0x5ad   : > { %v1268_v31 = vpop.permute.xlu0 %1267 }
 0x5ae   : > { %v1295_v32 = vsel %vm1035_vm10, %v1287_v30, %v1268_v31 }
 0x5b1   : > { %3036 = vmatmul.msk.f32.gmra.mxu3 %vm1045_vm11, %v1295_v32  ;;  %v1242_v41 = vpop.permute.xlu2 %1241 }
 0x5b2   : > { %v1290_v42 = vsel %vm508_vm4, %v1210_v13, %v1242_v41 }
 0x5b5   : > { %v1240_v37 = vpop.permute.xlu0 %1239 }
 0x5b6   : > { %v1238_v33 = vpop.permute.xlu1 %1237  ;;  %v1289_v38 = vsel %vm508_vm4, %v1209_v5, %v1240_v37 }
 0x5b7   : > { %v1288_v35 = vsel %vm508_vm4, %v1208_v8, %v1238_v33 }
 0x5b8   : > { %v1296_v36 = vsel %vm1035_vm10, %v1288_v35, %v1270_v34  ;;  %v1460_v35 = vld [vmem:[%s4328_s3 + $0x38] sm:$0xf] }
 0x5b9   : > { %3037 = vmatmul.msk.f32.gmra.mxu3 %vm1045_vm11, %v1296_v36  ;;  %3048 = vmatpush.msk.msrb.mxu0 %vm533_vm2, %v1460_v35 }
 0x5ba   : > { %3128 = vmatpush.msk.msrb.mxu2 %vm533_vm2, %v1460_v35  ;;  %3065 = vmatpush.msk.msrb.mxu1 %vm533_vm2, %v1460_v35 }
 0x5be   : > { %v1272_v39 = vpop.permute.xlu1 %1271 }
 0x5bf   : > { %v1297_v40 = vsel %vm1035_vm10, %v1289_v38, %v1272_v39 }
 0x5c1   : > { %3038 = vmatmul.msk.f32.gmra.mxu3 %vm1045_vm11, %v1297_v40 }
 0x5c8   : > { %v1274_v43 = vpop.permute.xlu0 %1273 }
 0x5c9   : > { %v1298_v44 = vsel %vm1035_vm10, %v1290_v42, %v1274_v43 }
 0x5ca   : > { %3039 = vmatmul.msk.f32.gmra.mxu3 %vm1045_vm11, %v1298_v44  ;;  %v1459_v44 = vld [vmem:[%s4328_s3 + $0x30] sm:$0xff] }
 0x5cb   : > { %1622 = vmatpush.msrb.mxu0 %v1459_v44  ;;  %3129 = vmatpush.msrb.mxu2 %v1459_v44 }
 0x5cc   : > { %1872 = vmatpush.msrb.mxu1 %v1459_v44 }
 0x5db   : > { %v1340_v45 = vpop.f32.mrf.mxu3 }
 0x5dc   : > { %v1341_v46 = vadd.f32 %v3721_v54, %v1340_v45  ;;  %v1458_v45 = vld [vmem:[%s4328_s3 + $0x28] sm:$0xff] }
 0x5dd   : > { %1623 = vmatpush.msrb.mxu0 %v1458_v45  ;;  %3130 = vmatpush.msrb.mxu2 %v1458_v45 }
 0x5de   : > { %v1372_v47 = vmin.f32 %v1341_v46, 0.0  ;;  %vm1364_vm8 = vcmp.gt.f32.partialorder %v1341_v46, 0.0  ;;  %1873 = vmatpush.msrb.mxu1 %v1458_v45  ;;  %v3892_v45 = vld [vmem:[%s4330_s5 + $0x2] ss:$0 sm:$0xff] }
 0x5e0   : > { %v1380_v48 = vmul.f32 1.442695, %v1372_v47  ;;  %v1456_v47 = vld [vmem:[%s4328_s3 + $0x18] sm:$0xff] }
 0x5e2   : > { %3269 = vpow2.f32 %v1380_v48 }
 0x5e8   : > { %v3270_v49 = vpop.eup %3269 }
 0x5e9   : > { %v3040_v50 = vadd.f32 -1.0, %v3270_v49  ;;  %v1455_v49 = vld [vmem:[%s4328_s3 + $0x10] sm:$0xff] }
 0x5eb   : > { %v1404_v51 = vsel %vm1364_vm8, %v1341_v46, %v3040_v50  ;;  %v1457_v46 = vld [vmem:[%s4328_s3 + $0x20] sm:$0xff] }
 0x5ec   : > { %1420 = vrot.lane.b32.xlu1 %v1404_v51, %s3398_s20  ;;  %1624 = vmatpush.msrb.mxu0 %v1457_v46  ;;  %v1454_v51 = vld [vmem:[%s4328_s3 + $0x8] sm:$0xff] }
 0x5ed   : > { %3131 = vmatpush.msrb.mxu2 %v1457_v46  ;;  %1874 = vmatpush.msrb.mxu1 %v1457_v46 }
 0x5ee   : > { %1625 = vmatpush.msrb.mxu0 %v1456_v47 }
 0x5ef   : > { %3132 = vmatpush.msrb.mxu2 %v1456_v47  ;;  %1875 = vmatpush.msrb.mxu1 %v1456_v47 }
 0x5f0   : > { %1626 = vmatpush.msrb.mxu0 %v1455_v49 }
 0x5f1   : > { %3133 = vmatpush.msrb.mxu2 %v1455_v49  ;;  %1876 = vmatpush.msrb.mxu1 %v1455_v49 }
 0x5f2   : > { %1627 = vmatpush.msrb.mxu0 %v1454_v51 }
 0x5f3   : > { %3134 = vmatpush.msrb.mxu2 %v1454_v51  ;;  %1877 = vmatpush.msrb.mxu1 %v1454_v51 }
 0x603   : > { %v1343_v52 = vpop.f32.mrf.mxu3 }
 0x604   : > { %v1344_v53 = vadd.f32 %v3721_v54, %v1343_v52 }
 0x606   : > { %v1373_v55 = vmin.f32 %v1344_v53, 0.0  ;;  %vm1365_vm4 = vcmp.gt.f32.partialorder %v1344_v53, 0.0 }
 0x608   : > { %v1382_v56 = vmul.f32 1.442695, %v1373_v55 }
 0x60a   : > { %3271 = vpow2.f32 %v1382_v56  ;;  %v1453_v56 = vld [vmem:[%s4328_s3] sm:$0xff] }
 0x60b   : > { %1628 = vmatpush.msrb.mxu0 %v1453_v56  ;;  %3135 = vmatpush.msrb.mxu2 %v1453_v56 }
 0x60c   : > { %1878 = vmatpush.msrb.mxu1 %v1453_v56 }
 0x610   : > { %v3272_v57 = vpop.eup %3271 }
 0x611   : > { %v3041_v58 = vadd.f32 -1.0, %v3272_v57 }
 0x613   : > { %v1405_v59 = vsel %vm1365_vm4, %v1344_v53, %v3041_v58 }
 0x614   : > { %1422 = vrot.lane.b32.xlu2 %v1405_v59, %s3398_s20 }
 0x624   : > { %v1346_v60 = vpop.f32.mrf.mxu3 }
 0x625   : > { %v1347_v61 = vadd.f32 %v3721_v54, %v1346_v60 }
 0x627   : > { %v1374_v6 = vmin.f32 %v1347_v61, 0.0  ;;  %vm1366_vm9 = vcmp.gt.f32.partialorder %v1347_v61, 0.0 }
 0x629   : > { %v1384_v62 = vmul.f32 1.442695, %v1374_v6 }
 0x62b   : > { %3273 = vpow2.f32 %v1384_v62 }
 0x62c   : > { %v1349_v63 = vpop.f32.mrf.mxu3 }
 0x62d   : > { %v1350_v0 = vadd.f32 %v3721_v54, %v1349_v63 }
 0x62f   : > { %v1375_v1 = vmin.f32 %v1350_v0, 0.0  ;;  %vm1367_vm10 = vcmp.gt.f32.partialorder %v1350_v0, 0.0 }
 0x631   : > { %v3274_v2 = vpop.eup %3273  ;;  %v1386_v3 = vmul.f32 1.442695, %v1375_v1 }
 0x632   : > { %v3042_v4 = vadd.f32 -1.0, %v3274_v2 }
 0x633   : > { %3275 = vpow2.f32 %v1386_v3 }
 0x634   : > { %v1352_v5 = vpop.f32.mrf.mxu3  ;;  %v1406_v7 = vsel %vm1366_vm9, %v1347_v61, %v3042_v4 }
 0x635   : > { %v1353_v8 = vadd.f32 %v3721_v54, %v1352_v5  ;;  %1424 = vrot.lane.b32.xlu0 %v1406_v7, %s3398_s20 }
 0x637   : > { %v1376_v9 = vmin.f32 %v1353_v8, 0.0  ;;  %vm1368_vm12 = vcmp.gt.f32.partialorder %v1353_v8, 0.0 }
 0x639   : > { %v3276_v10 = vpop.eup %3275  ;;  %v1388_v11 = vmul.f32 1.442695, %v1376_v9 }
 0x63a   : > { %v3043_v12 = vadd.f32 -1.0, %v3276_v10 }
 0x63b   : > { %3277 = vpow2.f32 %v1388_v11 }
 0x63c   : > { %v1407_v13 = vsel %vm1367_vm10, %v1350_v0, %v3043_v12  ;;  %v1355_v14 = vpop.f32.mrf.mxu3 }
 0x63d   : > { %1426 = vrot.lane.b32.xlu1 %v1407_v13, %s3398_s20  ;;  %v1356_v15 = vadd.f32 %v3721_v54, %v1355_v14 }
 0x63f   : > { %v1377_v16 = vmin.f32 %v1356_v15, 0.0  ;;  %vm1369_vm13 = vcmp.gt.f32.partialorder %v1356_v15, 0.0 }
 0x641   : > { %v3278_v17 = vpop.eup %3277  ;;  %v1390_v18 = vmul.f32 1.442695, %v1377_v16 }
 0x642   : > { %v3044_v19 = vadd.f32 -1.0, %v3278_v17 }
 0x643   : > { %3279 = vpow2.f32 %v1390_v18 }
 0x644   : > { %v1408_v20 = vsel %vm1368_vm12, %v1353_v8, %v3044_v19  ;;  %v1358_v21 = vpop.f32.mrf.mxu3 }
 0x645   : > { %1428 = vrot.lane.b32.xlu2 %v1408_v20, %s3398_s20  ;;  %v1359_v22 = vadd.f32 %v3721_v54, %v1358_v21 }
 0x647   : > { %v1378_v23 = vmin.f32 %v1359_v22, 0.0  ;;  %vm1370_vm14 = vcmp.gt.f32.partialorder %v1359_v22, 0.0 }
 0x649   : > { %v3280_v24 = vpop.eup %3279  ;;  %v1392_v25 = vmul.f32 1.442695, %v1378_v23 }
 0x64a   : > { %v3045_v26 = vadd.f32 -1.0, %v3280_v24 }
 0x64b   : > { %3281 = vpow2.f32 %v1392_v25 }
 0x64c   : > { %v1409_v27 = vsel %vm1369_vm13, %v1356_v15, %v3045_v26 }
 0x64d   : > { %1430 = vrot.lane.b32.xlu0 %v1409_v27, %s3398_s20  ;;  %v1361_v28 = vpop.f32.mrf.mxu3 }
 0x64e   : > { %v1362_v29 = vadd.f32 %v3721_v54, %v1361_v28 }
 0x650   : > { %v1379_v30 = vmin.f32 %v1362_v29, 0.0  ;;  %vm1371_vm15 = vcmp.gt.f32.partialorder %v1362_v29, 0.0 }
 0x651   : > { %v3282_v31 = vpop.eup %3281 }
 0x652   : > { %v1394_v32 = vmul.f32 1.442695, %v1379_v30  ;;  %v3046_v33 = vadd.f32 -1.0, %v3282_v31 }
 0x654   : > { %3283 = vpow2.f32 %v1394_v32  ;;  %v1410_v34 = vsel %vm1370_vm14, %v1359_v22, %v3046_v33  ;;  %vm1734_vm14 = vcmask 228512  }
 0x655   : > { %1432 = vrot.lane.b32.xlu1 %v1410_v34, %s3398_s20 }
 0x65a   : > { %v3284_v36 = vpop.eup %3283 }
 0x65b   : > { %v3047_v54 = vadd.f32 -1.0, %v3284_v36 }
 0x65d   : > { %v1411_v37 = vsel %vm1371_vm15, %v1362_v29, %v3047_v54 }
 0x65e   : > { %1434 = vrot.lane.b32.xlu2 %v1411_v37, %s3398_s20  ;;  %v1421_v38 = vpop.permute.xlu1 %1420  ;;  %s3406_s20 = smov 92  }
 0x65f   : > { %1445 = vst.msk [vmem:[#allocation2 + $0x1] sm:$0xff] %vm1444_vm1, %v1421_v38 }
 0x666   : > { %v1470_v39 = vld [vmem:[#allocation2 + $0x1] sm:$0xff] }
 0x667   : > { %v1462_v40 = vld [vmem:[#allocation2] sm:$0xff]  ;;  %1518 = vrot.lane.b32.xlu0 %v1470_v39, %s3400_s25  ;;  %1542 = vrot.lane.b32.xlu1 %v1470_v39, %s3401_s26 }
 0x668   : > { %1486 = vrot.lane.b32.xlu2 %v1462_v40, %s3392_s14 }
 0x66e   : > { %v1423_v41 = vpop.permute.xlu2 %1422 }
 0x66f   : > { %1446 = vst.msk [vmem:[#allocation2 + $0x11] sm:$0xff] %vm1444_vm1, %v1423_v41 }
 0x676   : > { %v1463_v42 = vld [vmem:[#allocation2 + $0x10] sm:$0xff] }
 0x677   : > { %v1471_v43 = vld [vmem:[#allocation2 + $0x11] sm:$0xff]  ;;  %1488 = vrot.lane.b32.xlu0 %v1463_v42, %s3392_s14 }
 0x678   : > { %1520 = vrot.lane.b32.xlu1 %v1471_v43, %s3400_s25  ;;  %1544 = vrot.lane.b32.xlu2 %v1471_v43, %s3401_s26 }
 0x69f   : > { %v1429_v48 = vpop.permute.xlu2 %1428 }
 0x6a0   : > { %1449 = vst.msk [vmem:[#allocation2 + $0x41] sm:$0xff] %vm1444_vm1, %v1429_v48 }
 0x6a7   : > { %v1425_v50 = vpop.permute.xlu0 %1424  ;;  %v1474_v60 = vld [vmem:[#allocation2 + $0x41] sm:$0xff] }
 0x6a8   : > { %1447 = vst.msk [vmem:[#allocation2 + $0x21] sm:$0xff] %vm1444_vm1, %v1425_v50  ;;  %v1466_v6 = vld [vmem:[#allocation2 + $0x40] sm:$0xff] }
 0x6af   : > { %v1427_v52 = vpop.permute.xlu1 %1426  ;;  %v1472_v53 = vld [vmem:[#allocation2 + $0x21] sm:$0xff] }
 0x6b0   : > { %v1464_v55 = vld [vmem:[#allocation2 + $0x20] sm:$0xff]  ;;  %1448 = vst.msk [vmem:[#allocation2 + $0x31] sm:$0xff] %vm1444_vm1, %v1427_v52  ;;  %1546 = vrot.lane.b32.xlu2 %v1472_v53, %s3401_s26  ;;  %1522 = vrot.lane.b32.xlu1 %v1472_v53, %s3400_s25 }
 0x6b1   : > { %1490 = vrot.lane.b32.xlu0 %v1464_v55, %s3392_s14 }
 0x6b7   : > { %v1473_v57 = vld [vmem:[#allocation2 + $0x31] sm:$0xff] }
 0x6b8   : > { %v1465_v58 = vld [vmem:[#allocation2 + $0x30] sm:$0xff]  ;;  %1548 = vrot.lane.b32.xlu2 %v1473_v57, %s3401_s26  ;;  %1524 = vrot.lane.b32.xlu1 %v1473_v57, %s3400_s25  ;;  %v1435_v59 = vpop.permute.xlu2 %1434 }
 0x6b9   : > { %1492 = vrot.lane.b32.xlu0 %v1465_v58, %s3392_s14  ;;  %1452 = vst.msk [vmem:[#allocation2 + $0x71] sm:$0xff] %vm1444_vm1, %v1435_v59 }
 0x6bf   : > { %v1431_v61 = vpop.permute.xlu0 %1430 }
 0x6c0   : > { %1550 = vrot.lane.b32.xlu2 %v1474_v60, %s3401_s26  ;;  %1526 = vrot.lane.b32.xlu1 %v1474_v60, %s3400_s25  ;;  %1450 = vst.msk [vmem:[#allocation2 + $0x51] sm:$0xff] %vm1444_vm1, %v1431_v61  ;;  %v1477_v3 = vld [vmem:[#allocation2 + $0x71] sm:$0xff] }
 0x6c1   : > { %1494 = vrot.lane.b32.xlu0 %v1466_v6, %s3392_s14  ;;  %v1469_v5 = vld [vmem:[#allocation2 + $0x70] sm:$0xff] }
 0x6c2   : > { %v1487_v4 = vpop.permute.xlu2 %1486 }
 0x6c7   : > { %v1433_v62 = vpop.permute.xlu1 %1432  ;;  %v1475_v63 = vld [vmem:[#allocation2 + $0x51] sm:$0xff] }
 0x6c8   : > { %v1467_v0 = vld [vmem:[#allocation2 + $0x50] sm:$0xff]  ;;  %1451 = vst.msk [vmem:[#allocation2 + $0x61] sm:$0xff] %vm1444_vm1, %v1433_v62  ;;  %1552 = vrot.lane.b32.xlu2 %v1475_v63, %s3401_s26  ;;  %1528 = vrot.lane.b32.xlu1 %v1475_v63, %s3400_s25 }
 0x6c9   : > { %1496 = vrot.lane.b32.xlu0 %v1467_v0, %s3392_s14 }
 0x6cf   : > { %v1476_v1 = vld [vmem:[#allocation2 + $0x61] sm:$0xff] }
 0x6d0   : > { %v1468_v2 = vld [vmem:[#allocation2 + $0x60] sm:$0xff]  ;;  %1554 = vrot.lane.b32.xlu2 %v1476_v1, %s3401_s26  ;;  %1530 = vrot.lane.b32.xlu1 %v1476_v1, %s3400_s25 }
 0x6d1   : > { %1498 = vrot.lane.b32.xlu0 %v1468_v2, %s3392_s14 }
 0x6d2   : > { %v1545_v13 = vpop.permute.xlu2 %1544 }
 0x6d8   : > { %1556 = vrot.lane.b32.xlu2 %v1477_v3, %s3401_s26  ;;  %1532 = vrot.lane.b32.xlu1 %v1477_v3, %s3400_s25 }
 0x6d9   : > { %1500 = vrot.lane.b32.xlu0 %v1469_v5, %s3392_s14  ;;  %v1543_v7 = vpop.permute.xlu1 %1542  ;;  %v1519_v8 = vpop.permute.xlu0 %1518 }
 0x6da   : > { %v1567_v9 = vsel %vm1566_vm3, %v1487_v4, %v1519_v8 }
 0x6db   : > { %v1576_v10 = vsel %vm1575_vm5, %v1567_v9, %v1543_v7 }
 0x6dc   : > { %3049 = vmatmul.msk.f32.vlgmr.msrb.gmra.mxu0 %vm1585_vm6, %v1576_v10 }
 0x6e9   : > { %v1489_v12 = vpop.permute.xlu0 %1488 }
 0x6ea   : > { %v1521_v11 = vpop.permute.xlu1 %1520 }
 0x6eb   : > { %v1568_v14 = vsel %vm1566_vm3, %v1489_v12, %v1521_v11 }
 0x6ec   : > { %v1577_v15 = vsel %vm1575_vm5, %v1568_v14, %v1545_v13 }
 0x6ed   : > { %3050 = vmatmul.msk.f32.gmra.mxu0 %vm1585_vm6, %v1577_v15 }
 0x70a   : > { %v1547_v16 = vpop.permute.xlu2 %1546 }
 0x712   : > { %v1549_v20 = vpop.permute.xlu2 %1548 }
 0x71a   : > { %v1551_v26 = vpop.permute.xlu2 %1550 }
 0x722   : > { %v1523_v17 = vpop.permute.xlu1 %1522  ;;  %v1553_v31 = vpop.permute.xlu2 %1552 }
 0x723   : > { %v1491_v18 = vpop.permute.xlu0 %1490 }
 0x724   : > { %v1569_v19 = vsel %vm1566_vm3, %v1491_v18, %v1523_v17 }
 0x725   : > { %v1578_v21 = vsel %vm1575_vm5, %v1569_v19, %v1547_v16 }
 0x726   : > { %3051 = vmatmul.msk.f32.gmra.mxu0 %vm1585_vm6, %v1578_v21 }
 0x72a   : > { %v1525_v22 = vpop.permute.xlu1 %1524  ;;  %v1555_v36 = vpop.permute.xlu2 %1554 }
 0x72b   : > { %v1493_v23 = vpop.permute.xlu0 %1492 }
 0x72c   : > { %v1570_v24 = vsel %vm1566_vm3, %v1493_v23, %v1525_v22 }
 0x72d   : > { %v1579_v25 = vsel %vm1575_vm5, %v1570_v24, %v1549_v20 }
 0x72e   : > { %3052 = vmatmul.msk.f32.gmra.mxu0 %vm1585_vm6, %v1579_v25 }
 0x732   : > { %v1527_v27 = vpop.permute.xlu1 %1526  ;;  %v1557_v42 = vpop.permute.xlu2 %1556 }
 0x733   : > { %v1495_v28 = vpop.permute.xlu0 %1494 }
 0x734   : > { %v1571_v29 = vsel %vm1566_vm3, %v1495_v28, %v1527_v27 }
 0x735   : > { %v1580_v30 = vsel %vm1575_vm5, %v1571_v29, %v1551_v26 }
 0x736   : > { %3053 = vmatmul.msk.f32.vlgmr.msrb.gmra.mxu2 %vm1585_vm6, %v1580_v30 }
 0x73a   : > { %v1529_v32 = vpop.permute.xlu1 %1528 }
 0x73b   : > { %v1497_v33 = vpop.permute.xlu0 %1496 }
 0x73c   : > { %v1572_v34 = vsel %vm1566_vm3, %v1497_v33, %v1529_v32 }
 0x73d   : > { %v1581_v35 = vsel %vm1575_vm5, %v1572_v34, %v1553_v31 }
 0x73e   : > { %3054 = vmatmul.msk.f32.gmra.mxu2 %vm1585_vm6, %v1581_v35 }
 0x742   : > { %v1531_v54 = vpop.permute.xlu1 %1530 }
 0x743   : > { %v1499_v37 = vpop.permute.xlu0 %1498 }
 0x744   : > { %v1573_v38 = vsel %vm1566_vm3, %v1499_v37, %v1531_v54 }
 0x745   : > { %v1582_v39 = vsel %vm1575_vm5, %v1573_v38, %v1555_v36 }
 0x746   : > { %3055 = vmatmul.msk.f32.gmra.mxu2 %vm1585_vm6, %v1582_v39 }
 0x74a   : > { %v1533_v40 = vpop.permute.xlu1 %1532 }
 0x74b   : > { %v1501_v41 = vpop.permute.xlu0 %1500 }
 0x74c   : > { %v1574_v43 = vsel %vm1566_vm3, %v1501_v41, %v1533_v40 }
 0x74d   : > { %v1583_v44 = vsel %vm1575_vm5, %v1574_v43, %v1557_v42 }
 0x74e   : > { %3056 = vmatmul.msk.f32.gmra.mxu2 %vm1585_vm6, %v1583_v44 }
 0x759   : > { %v1630_v46 = vpop.f32.mrf.mxu0 }
 0x75a   : > { %v1631_v47 = vadd.f32 %v3892_v45, %v1630_v46 }
 0x75c   : > { %v1662_v48 = vmin.f32 %v1631_v47, 0.0  ;;  %vm1654_vm7 = vcmp.gt.f32.partialorder %v1631_v47, 0.0 }
 0x75e   : > { %v1670_v49 = vmul.f32 1.442695, %v1662_v48 }
 0x760   : > { %3285 = vpow2.f32 %v1670_v49 }
 0x766   : > { %v3286_v50 = vpop.eup %3285 }
 0x767   : > { %v3057_v51 = vadd.f32 -1.0, %v3286_v50 }
 0x769   : > { %v1694_v53 = vsel %vm1654_vm7, %v1631_v47, %v3057_v51 }
 0x76a   : > { %v1633_v52 = vpop.f32.mrf.mxu0  ;;  %1710 = vrot.lane.b32.xlu0 %v1694_v53, %s3400_s25 }
 0x76b   : > { %v1634_v55 = vadd.f32 %v3892_v45, %v1633_v52 }
 0x76d   : > { %v1663_v56 = vmin.f32 %v1634_v55, 0.0  ;;  %vm1655_vm8 = vcmp.gt.f32.partialorder %v1634_v55, 0.0 }
 0x76f   : > { %v1672_v57 = vmul.f32 1.442695, %v1663_v56 }
 0x771   : > { %3287 = vpow2.f32 %v1672_v57 }
 0x777   : > { %v3288_v58 = vpop.eup %3287 }
 0x778   : > { %v3058_v59 = vadd.f32 -1.0, %v3288_v58 }
 0x77a   : > { %v1695_v60 = vsel %vm1655_vm8, %v1634_v55, %v3058_v59 }
 0x77b   : > { %1712 = vrot.lane.b32.xlu1 %v1695_v60, %s3400_s25 }
 0x7a3   : > { %v1636_v61 = vpop.f32.mrf.mxu0 }
 0x7a4   : > { %v1637_v6 = vadd.f32 %v3892_v45, %v1636_v61 }
 0x7a6   : > { %v1664_v62 = vmin.f32 %v1637_v6, 0.0  ;;  %vm1656_vm4 = vcmp.gt.f32.partialorder %v1637_v6, 0.0 }
 0x7a8   : > { %v1674_v63 = vmul.f32 1.442695, %v1664_v62 }
 0x7aa   : > { %3289 = vpow2.f32 %v1674_v63 }
 0x7ab   : > { %v1639_v0 = vpop.f32.mrf.mxu0 }
 0x7ac   : > { %v1640_v1 = vadd.f32 %v3892_v45, %v1639_v0 }
 0x7ae   : > { %v1665_v2 = vmin.f32 %v1640_v1, 0.0  ;;  %vm1657_vm9 = vcmp.gt.f32.partialorder %v1640_v1, 0.0 }
 0x7b0   : > { %v3290_v3 = vpop.eup %3289  ;;  %v1676_v4 = vmul.f32 1.442695, %v1665_v2 }
 0x7b1   : > { %v3059_v5 = vadd.f32 -1.0, %v3290_v3 }
 0x7b2   : > { %3291 = vpow2.f32 %v1676_v4 }
 0x7b3   : > { %v1696_v7 = vsel %vm1656_vm4, %v1637_v6, %v3059_v5 }
 0x7b4   : > { %1714 = vrot.lane.b32.xlu2 %v1696_v7, %s3400_s25 }
 0x7b8   : > { %v3292_v8 = vpop.eup %3291 }
 0x7b9   : > { %v3060_v9 = vadd.f32 -1.0, %v3292_v8  ;;  %v1642_v10 = vpop.f32.mrf.mxu2 }
 0x7ba   : > { %v1643_v11 = vadd.f32 %v3892_v45, %v1642_v10 }
 0x7bb   : > { %v1697_v12 = vsel %vm1657_vm9, %v1640_v1, %v3060_v9  ;;  %vm1984_vm9 = vcmask 753312  }
 0x7bc   : > { %v1666_v13 = vmin.f32 %v1643_v11, 0.0  ;;  %1716 = vrot.lane.b32.xlu0 %v1697_v12, %s3400_s25  ;;  %vm1658_vm10 = vcmp.gt.f32.partialorder %v1643_v11, 0.0 }
 0x7be   : > { %v1678_v14 = vmul.f32 1.442695, %v1666_v13 }
 0x7c0   : > { %3293 = vpow2.f32 %v1678_v14 }
 0x7c1   : > { %v1645_v15 = vpop.f32.mrf.mxu2 }
 0x7c2   : > { %v1646_v16 = vadd.f32 %v3892_v45, %v1645_v15 }
 0x7c4   : > { %v1667_v17 = vmin.f32 %v1646_v16, 0.0  ;;  %vm1659_vm12 = vcmp.gt.f32.partialorder %v1646_v16, 0.0 }
 0x7c6   : > { %v3294_v18 = vpop.eup %3293  ;;  %v1680_v20 = vmul.f32 1.442695, %v1667_v17 }
 0x7c7   : > { %v3061_v19 = vadd.f32 -1.0, %v3294_v18 }
 0x7c8   : > { %3295 = vpow2.f32 %v1680_v20 }
 0x7c9   : > { %v1698_v21 = vsel %vm1658_vm10, %v1643_v11, %v3061_v19  ;;  %v1648_v22 = vpop.f32.mrf.mxu2 }
 0x7ca   : > { %1718 = vrot.lane.b32.xlu1 %v1698_v21, %s3400_s25  ;;  %v1649_v23 = vadd.f32 %v3892_v45, %v1648_v22 }
 0x7cc   : > { %v1668_v24 = vmin.f32 %v1649_v23, 0.0  ;;  %vm1660_vm13 = vcmp.gt.f32.partialorder %v1649_v23, 0.0 }
 0x7ce   : > { %v3296_v25 = vpop.eup %3295  ;;  %v1682_v26 = vmul.f32 1.442695, %v1668_v24 }
 0x7cf   : > { %v3062_v27 = vadd.f32 -1.0, %v3296_v25 }
 0x7d0   : > { %3297 = vpow2.f32 %v1682_v26 }
 0x7d1   : > { %v1651_v28 = vpop.f32.mrf.mxu2  ;;  %v1699_v29 = vsel %vm1659_vm12, %v1646_v16, %v3062_v27  ;;  %vm2118_vm12 = vcmask 457728  }
 0x7d2   : > { %v1652_v30 = vadd.f32 %v3892_v45, %v1651_v28  ;;  %1720 = vrot.lane.b32.xlu2 %v1699_v29, %s3400_s25 }
 0x7d4   : > { %v1669_v31 = vmin.f32 %v1652_v30, 0.0  ;;  %vm1661_vm15 = vcmp.gt.f32.partialorder %v1652_v30, 0.0 }
 0x7d6   : > { %v3298_v32 = vpop.eup %3297  ;;  %v1684_v33 = vmul.f32 1.442695, %v1669_v31 }
 0x7d7   : > { %v3063_v34 = vadd.f32 -1.0, %v3298_v32 }
 0x7d8   : > { %3299 = vpow2.f32 %v1684_v33 }
 0x7d9   : > { %v1700_v35 = vsel %vm1660_vm13, %v1649_v23, %v3063_v34  ;;  %vm2128_vm13 = vcmask 687104  }
 0x7da   : > { %1722 = vrot.lane.b32.xlu1 %v1700_v35, %s3400_s25 }
 0x7dc   : > { %v1711_v36 = vpop.permute.xlu0 %1710 }
 0x7dd   : > { %1735 = vst.msk [vmem:[#allocation2 + $0x1] sm:$0xff] %vm1734_vm14, %v1711_v36 }
 0x7de   : > { %v3300_v54 = vpop.eup %3299 }
 0x7df   : > { %v3064_v37 = vadd.f32 -1.0, %v3300_v54 }
 0x7e1   : > { %v1701_v38 = vsel %vm1661_vm15, %v1652_v30, %v3064_v37 }
 0x7e2   : > { %1724 = vrot.lane.b32.xlu1 %v1701_v38, %s3400_s25  ;;  %s3404_s25 = smov 28  }
 0x7e4   : > { %v1751_v39 = vld [vmem:[#allocation2 + $0x2] sm:$0xff] }
 0x7e5   : > { %v1743_v40 = vld [vmem:[#allocation2 + $0x1] sm:$0xff]  ;;  %1799 = vrot.lane.b32.xlu2 %v1751_v39, %s3402_s28 }
 0x7e6   : > { %1767 = vrot.lane.b32.xlu0 %v1743_v40, %s3403_s9 }
 0x7ed   : > { %v1713_v41 = vpop.permute.xlu1 %1712 }
 0x7ee   : > { %1736 = vst.msk [vmem:[#allocation2 + $0x11] sm:$0xff] %vm1734_vm14, %v1713_v41 }
 0x7f5   : > { %v1752_v42 = vld [vmem:[#allocation2 + $0x12] sm:$0xff] }
 0x7f6   : > { %v1744_v43 = vld [vmem:[#allocation2 + $0x11] sm:$0xff]  ;;  %1801 = vrot.lane.b32.xlu2 %v1752_v42, %s3402_s28 }
 0x7f7   : > { %1769 = vrot.lane.b32.xlu0 %v1744_v43, %s3403_s9 }
 0x80e   : > { %v1715_v44 = vpop.permute.xlu2 %1714 }
 0x80f   : > { %1737 = vst.msk [vmem:[#allocation2 + $0x21] sm:$0xff] %vm1734_vm14, %v1715_v44 }
 0x816   : > { %v1753_v46 = vld [vmem:[#allocation2 + $0x22] sm:$0xff] }
 0x817   : > { %v1745_v47 = vld [vmem:[#allocation2 + $0x21] sm:$0xff]  ;;  %1803 = vrot.lane.b32.xlu1 %v1753_v46, %s3402_s28 }
 0x818   : > { %1771 = vrot.lane.b32.xlu0 %v1745_v47, %s3403_s9 }
 0x82c   : > { %v1721_v48 = vpop.permute.xlu2 %1720 }
 0x82d   : > { %1740 = vst.msk [vmem:[#allocation2 + $0x51] sm:$0xff] %vm1734_vm14, %v1721_v48 }
 0x82e   : > { %v1717_v49 = vpop.permute.xlu0 %1716 }
 0x82f   : > { %1738 = vst.msk [vmem:[#allocation2 + $0x31] sm:$0xff] %vm1734_vm14, %v1717_v49 }
 0x834   : > { %v1748_v53 = vld [vmem:[#allocation2 + $0x51] sm:$0xff] }
 0x835   : > { %v1756_v57 = vld [vmem:[#allocation2 + $0x52] sm:$0xff] }
 0x836   : > { %v1754_v50 = vld [vmem:[#allocation2 + $0x32] sm:$0xff] }
 0x837   : > { %v1746_v51 = vld [vmem:[#allocation2 + $0x31] sm:$0xff]  ;;  %1805 = vrot.lane.b32.xlu0 %v1754_v50, %s3402_s28 }
 0x838   : > { %1773 = vrot.lane.b32.xlu2 %v1746_v51, %s3403_s9 }
 0x83c   : > { %v1719_v52 = vpop.permute.xlu1 %1718 }
 0x83d   : > { %1739 = vst.msk [vmem:[#allocation2 + $0x41] sm:$0xff] %vm1734_vm14, %v1719_v52 }
 0x83f   : > { %1777 = vrot.lane.b32.xlu0 %v1748_v53, %s3403_s9  ;;  %v1800_v62 = vpop.permute.xlu2 %1799 }
 0x844   : > { %v1747_v55 = vld [vmem:[#allocation2 + $0x41] sm:$0xff] }
 0x845   : > { %v1755_v56 = vld [vmem:[#allocation2 + $0x42] sm:$0xff]  ;;  %1775 = vrot.lane.b32.xlu1 %v1747_v55, %s3403_s9 }
 0x846   : > { %1807 = vrot.lane.b32.xlu2 %v1755_v56, %s3402_s28 }
 0x84c   : > { %v1723_v58 = vpop.permute.xlu1 %1722 }
 0x84d   : > { %1809 = vrot.lane.b32.xlu1 %v1756_v57, %s3402_s28  ;;  %1741 = vst.msk [vmem:[#allocation2 + $0x61] sm:$0xff] %vm1734_vm14, %v1723_v58 }
 0x850   : > { %v1802_v4 = vpop.permute.xlu2 %1801 }
 0x854   : > { %v1725_v59 = vpop.permute.xlu1 %1724  ;;  %v1757_v60 = vld [vmem:[#allocation2 + $0x62] sm:$0xff] }
 0x855   : > { %v1749_v61 = vld [vmem:[#allocation2 + $0x61] sm:$0xff]  ;;  %1742 = vst.msk [vmem:[#allocation2 + $0x71] sm:$0xff] %vm1734_vm14, %v1725_v59  ;;  %1811 = vrot.lane.b32.xlu0 %v1757_v60, %s3402_s28 }
 0x856   : > { %1779 = vrot.lane.b32.xlu2 %v1749_v61, %s3403_s9 }
 0x858   : > { %v1768_v6 = vpop.permute.xlu0 %1767 }
 0x859   : > { %v1823_v63 = vsel %vm1566_vm3, %v1743_v40, %v1768_v6 }
 0x85a   : > { %v1831_v0 = vsel %vm1575_vm5, %v1823_v63, %v1800_v62 }
 0x85b   : > { %3066 = vmatmul.msk.f32.vlgmr.msrb.gmra.mxu1 %vm1585_vm6, %v1831_v0 }
 0x85c   : > { %v1750_v1 = vld [vmem:[#allocation2 + $0x71] sm:$0xff] }
 0x85d   : > { %v1758_v2 = vld [vmem:[#allocation2 + $0x72] sm:$0xff]  ;;  %1781 = vrot.lane.b32.xlu1 %v1750_v1, %s3403_s9 }
 0x85e   : > { %1813 = vrot.lane.b32.xlu2 %v1758_v2, %s3402_s28 }
 0x869   : > { %v1770_v3 = vpop.permute.xlu0 %1769 }
 0x86a   : > { %v1824_v5 = vsel %vm1566_vm3, %v1744_v43, %v1770_v3 }
 0x86b   : > { %v1832_v7 = vsel %vm1575_vm5, %v1824_v5, %v1802_v4 }
 0x86c   : > { %3067 = vmatmul.msk.f32.gmra.mxu1 %vm1585_vm6, %v1832_v7 }
 0x889   : > { %v1804_v8 = vpop.permute.xlu1 %1803 }
 0x88a   : > { %v1772_v9 = vpop.permute.xlu0 %1771 }
 0x88b   : > { %v1825_v10 = vsel %vm1566_vm3, %v1745_v47, %v1772_v9 }
 0x88c   : > { %v1833_v11 = vsel %vm1575_vm5, %v1825_v10, %v1804_v8 }
 0x88d   : > { %3068 = vmatmul.msk.f32.gmra.mxu1 %vm1585_vm6, %v1833_v11 }
 0x892   : > { %v1774_v12 = vpop.permute.xlu2 %1773 }
 0x893   : > { %v1826_v13 = vsel %vm1566_vm3, %v1746_v51, %v1774_v12 }
 0x8a0   : > { %v1808_v17 = vpop.permute.xlu2 %1807 }
 0x8a9   : > { %v1806_v14 = vpop.permute.xlu0 %1805 }
 0x8aa   : > { %v1834_v15 = vsel %vm1575_vm5, %v1826_v13, %v1806_v14 }
 0x8ab   : > { %3069 = vmatmul.msk.f32.gmra.mxu1 %vm1585_vm6, %v1834_v15 }
 0x8b0   : > { %v1780_v24 = vpop.permute.xlu2 %1779 }
 0x8b1   : > { %v1778_v20 = vpop.permute.xlu0 %1777  ;;  %v1829_v25 = vsel %vm1566_vm3, %v1749_v61, %v1780_v24 }
 0x8b2   : > { %v1828_v21 = vsel %vm1566_vm3, %v1748_v53, %v1778_v20 }
 0x8b7   : > { %v1776_v16 = vpop.permute.xlu1 %1775 }
 0x8b8   : > { %v1827_v18 = vsel %vm1566_vm3, %v1747_v55, %v1776_v16  ;;  %v1814_v29 = vpop.permute.xlu2 %1813 }
 0x8b9   : > { %v1835_v19 = vsel %vm1575_vm5, %v1827_v18, %v1808_v17 }
 0x8ba   : > { %3070 = vmatmul.msk.f32.gmra.mxu1 %vm1585_vm6, %v1835_v19 }
 0x8bf   : > { %v1810_v22 = vpop.permute.xlu1 %1809 }
 0x8c0   : > { %v1836_v23 = vsel %vm1575_vm5, %v1828_v21, %v1810_v22 }
 0x8c2   : > { %3071 = vmatmul.msk.f32.gmra.mxu1 %vm1585_vm6, %v1836_v23 }
 0x8c7   : > { %v1812_v26 = vpop.permute.xlu0 %1811 }
 0x8c8   : > { %v1837_v27 = vsel %vm1575_vm5, %v1829_v25, %v1812_v26 }
 0x8ca   : > { %3072 = vmatmul.msk.f32.gmra.mxu1 %vm1585_vm6, %v1837_v27 }
 0x8cf   : > { %v1782_v28 = vpop.permute.xlu1 %1781 }
 0x8d0   : > { %v1830_v30 = vsel %vm1566_vm3, %v1750_v1, %v1782_v28 }
 0x8d1   : > { %v1838_v31 = vsel %vm1575_vm5, %v1830_v30, %v1814_v29 }
 0x8d2   : > { %3073 = vmatmul.msk.f32.gmra.mxu1 %vm1585_vm6, %v1838_v31 }
 0x8d8   : > { %v1880_v32 = vpop.f32.mrf.mxu1 }
 0x8d9   : > { %v1881_v33 = vadd.f32 %v3892_v45, %v1880_v32 }
 0x8db   : > { %v1912_v34 = vmin.f32 %v1881_v33, 0.0  ;;  %vm1904_vm1 = vcmp.gt.f32.partialorder %v1881_v33, 0.0 }
 0x8dd   : > { %v1920_v35 = vmul.f32 1.442695, %v1912_v34 }
 0x8df   : > { %3301 = vpow2.f32 %v1920_v35  ;;  %v2003_v35 = vld [vmem:[%s4329_s4 + $0x50] sm:$0xf] }
 0x8e0   : > { %3082 = vmatpush.msk.msra.mxu2 %vm533_vm2, %v2003_v35  ;;  %3099 = vmatpush.msk.msra.mxu3 %vm533_vm2, %v2003_v35  ;;  %vm2109_vm2 = vcmask 228352  }
 0x8e5   : > { %v3302_v36 = vpop.eup %3301 }
 0x8e6   : > { %v3074_v54 = vadd.f32 -1.0, %v3302_v36  ;;  %v2002_v36 = vld [vmem:[%s4329_s4 + $0x48] sm:$0xff] }
 0x8e7   : > { %2162 = vmatpush.msra.mxu2 %v2002_v36  ;;  %2412 = vmatpush.msra.mxu3 %v2002_v36 }
 0x8e8   : > { %v1944_v38 = vsel %vm1904_vm1, %v1881_v33, %v3074_v54  ;;  %v2001_v54 = vld [vmem:[%s4329_s4 + $0x40] sm:$0xff] }
 0x8e9   : > { %v1883_v37 = vpop.f32.mrf.mxu1  ;;  %1960 = vrot.lane.b32.xlu0 %v1944_v38, %s3403_s9  ;;  %2163 = vmatpush.msra.mxu2 %v2001_v54 }
 0x8ea   : > { %v1884_v39 = vadd.f32 %v3892_v45, %v1883_v37  ;;  %v2000_v37 = vld [vmem:[%s4329_s4 + $0x38] sm:$0xff]  ;;  %2413 = vmatpush.msra.mxu3 %v2001_v54 }
 0x8eb   : > { %2164 = vmatpush.msra.mxu2 %v2000_v37 }
 0x8ec   : > { %v1913_v40 = vmin.f32 %v1884_v39, 0.0  ;;  %vm1905_vm3 = vcmp.gt.f32.partialorder %v1884_v39, 0.0  ;;  %2414 = vmatpush.msra.mxu3 %v2000_v37 }
 0x8ee   : > { %v1922_v41 = vmul.f32 1.442695, %v1913_v40 }
 0x8f0   : > { %3303 = vpow2.f32 %v1922_v41  ;;  %v1999_v41 = vld [vmem:[%s4329_s4 + $0x30] sm:$0xff] }
 0x8f1   : > { %2165 = vmatpush.msra.mxu2 %v1999_v41  ;;  %2415 = vmatpush.msra.mxu3 %v1999_v41 }
 0x8f6   : > { %v3304_v42 = vpop.eup %3303 }
 0x8f7   : > { %v3075_v43 = vadd.f32 -1.0, %v3304_v42  ;;  %v1998_v42 = vld [vmem:[%s4329_s4 + $0x28] sm:$0xff] }
 0x8f8   : > { %2166 = vmatpush.msra.mxu2 %v1998_v42  ;;  %2416 = vmatpush.msra.mxu3 %v1998_v42 }
 0x8f9   : > { %v1945_v44 = vsel %vm1905_vm3, %v1884_v39, %v3075_v43  ;;  %v1997_v43 = vld [vmem:[%s4329_s4 + $0x20] sm:$0xff] }
 0x8fa   : > { %1962 = vrot.lane.b32.xlu1 %v1945_v44, %s3403_s9  ;;  %v1996_v44 = vld [vmem:[%s4329_s4 + $0x18] sm:$0xff]  ;;  %2167 = vmatpush.msra.mxu2 %v1997_v43 }
 0x8fb   : > { %2417 = vmatpush.msra.mxu3 %v1997_v43 }
 0x8fc   : > { %2168 = vmatpush.msra.mxu2 %v1996_v44 }
 0x8fd   : > { %2418 = vmatpush.msra.mxu3 %v1996_v44 }
 0x90a   : > { %v1886_v46 = vpop.f32.mrf.mxu1 }
 0x90b   : > { %v1887_v47 = vadd.f32 %v3892_v45, %v1886_v46 }
 0x90d   : > { %v1914_v48 = vmin.f32 %v1887_v47, 0.0  ;;  %vm1906_vm5 = vcmp.gt.f32.partialorder %v1887_v47, 0.0 }
 0x90f   : > { %v1924_v49 = vmul.f32 1.442695, %v1914_v48  ;;  %v1994_v48 = vld [vmem:[%s4329_s4 + $0x8] sm:$0xff] }
 0x911   : > { %3305 = vpow2.f32 %v1924_v49  ;;  %v1993_v49 = vld [vmem:[%s4329_s4] sm:$0xff] }
 0x917   : > { %v3306_v50 = vpop.eup %3305 }
 0x918   : > { %v3076_v51 = vadd.f32 -1.0, %v3306_v50 }
 0x91a   : > { %v1946_v52 = vsel %vm1906_vm5, %v1887_v47, %v3076_v51  ;;  %v1995_v47 = vld [vmem:[%s4329_s4 + $0x10] sm:$0xff] }
 0x91b   : > { %1964 = vrot.lane.b32.xlu2 %v1946_v52, %s3403_s9  ;;  %2169 = vmatpush.msra.mxu2 %v1995_v47 }
 0x91c   : > { %2419 = vmatpush.msra.mxu3 %v1995_v47 }
 0x91d   : > { %2170 = vmatpush.msra.mxu2 %v1994_v48 }
 0x91e   : > { %2420 = vmatpush.msra.mxu3 %v1994_v48 }
 0x91f   : > { %2171 = vmatpush.msra.mxu2 %v1993_v49 }
 0x920   : > { %2421 = vmatpush.msra.mxu3 %v1993_v49 }
 0x928   : > { %v1889_v53 = vpop.f32.mrf.mxu1 }
 0x929   : > { %v1890_v55 = vadd.f32 %v3892_v45, %v1889_v53 }
 0x92b   : > { %v1915_v56 = vmin.f32 %v1890_v55, 0.0  ;;  %vm1907_vm6 = vcmp.gt.f32.partialorder %v1890_v55, 0.0 }
 0x92d   : > { %v1926_v57 = vmul.f32 1.442695, %v1915_v56 }
 0x92f   : > { %3307 = vpow2.f32 %v1926_v57 }
 0x935   : > { %v3308_v58 = vpop.eup %3307 }
 0x936   : > { %v3077_v59 = vadd.f32 -1.0, %v3308_v58 }
 0x937   : > { %v1892_v60 = vpop.f32.mrf.mxu1 }
 0x938   : > { %v1893_v61 = vadd.f32 %v3892_v45, %v1892_v60  ;;  %v1947_v6 = vsel %vm1907_vm6, %v1890_v55, %v3077_v59  ;;  %vm2277_vm6 = vcmask 294112  }
 0x939   : > { %1966 = vrot.lane.b32.xlu0 %v1947_v6, %s3403_s9 }
 0x93a   : > { %v1916_v62 = vmin.f32 %v1893_v61, 0.0  ;;  %vm1908_vm7 = vcmp.gt.f32.partialorder %v1893_v61, 0.0 }
 0x93c   : > { %v1928_v63 = vmul.f32 1.442695, %v1916_v62 }
 0x93e   : > { %3309 = vpow2.f32 %v1928_v63 }
 0x93f   : > { %v1895_v0 = vpop.f32.mrf.mxu1 }
 0x940   : > { %v1896_v1 = vadd.f32 %v3892_v45, %v1895_v0 }
 0x942   : > { %v1917_v2 = vmin.f32 %v1896_v1, 0.0  ;;  %vm1909_vm8 = vcmp.gt.f32.partialorder %v1896_v1, 0.0 }
 0x944   : > { %v3310_v3 = vpop.eup %3309  ;;  %v1930_v4 = vmul.f32 1.442695, %v1917_v2 }
 0x945   : > { %v3078_v5 = vadd.f32 -1.0, %v3310_v3 }
 0x946   : > { %3311 = vpow2.f32 %v1930_v4 }
 0x947   : > { %v1898_v7 = vpop.f32.mrf.mxu1  ;;  %v1948_v8 = vsel %vm1908_vm7, %v1893_v61, %v3078_v5 }
 0x948   : > { %v1899_v9 = vadd.f32 %v3892_v45, %v1898_v7  ;;  %1968 = vrot.lane.b32.xlu1 %v1948_v8, %s3403_s9 }
 0x94a   : > { %v1918_v10 = vmin.f32 %v1899_v9, 0.0  ;;  %vm1910_vm4 = vcmp.gt.f32.partialorder %v1899_v9, 0.0 }
 0x94c   : > { %v3312_v11 = vpop.eup %3311  ;;  %v1932_v12 = vmul.f32 1.442695, %v1918_v10 }
 0x94d   : > { %v3079_v13 = vadd.f32 -1.0, %v3312_v11 }
 0x94e   : > { %3313 = vpow2.f32 %v1932_v12 }
 0x94f   : > { %v1949_v14 = vsel %vm1909_vm8, %v1896_v1, %v3079_v13  ;;  %v1901_v18 = vpop.f32.mrf.mxu1 }
 0x950   : > { %1970 = vrot.lane.b32.xlu2 %v1949_v14, %s3403_s9  ;;  %v1902_v19 = vadd.f32 %v3892_v45, %v1901_v18 }
 0x952   : > { %v1919_v21 = vmin.f32 %v1902_v19, 0.0  ;;  %vm1911_vm10 = vcmp.gt.f32.partialorder %v1902_v19, 0.0 }
 0x954   : > { %v3314_v15 = vpop.eup %3313  ;;  %v1934_v22 = vmul.f32 1.442695, %v1919_v21 }
 0x955   : > { %v3080_v16 = vadd.f32 -1.0, %v3314_v15 }
 0x956   : > { %3315 = vpow2.f32 %v1934_v22 }
 0x957   : > { %v1950_v17 = vsel %vm1910_vm4, %v1899_v9, %v3080_v16 }
 0x958   : > { %1972 = vrot.lane.b32.xlu2 %v1950_v17, %s3403_s9 }
 0x95b   : > { %v1961_v20 = vpop.permute.xlu0 %1960 }
 0x95c   : > { %1985 = vst.msk [vmem:[#allocation2 + $0x1] sm:$0xff] %vm1984_vm9, %v1961_v20  ;;  %v3316_v45 = vpop.eup %3315 }
 0x95d   : > { %v3081_v26 = vadd.f32 -1.0, %v3316_v45 }
 0x95f   : > { %v1951_v30 = vsel %vm1911_vm10, %v1902_v19, %v3081_v26 }
 0x963   : > { %v2013_v23 = vld [vmem:[#allocation2 + $0x1] sm:$0xff] }
 0x964   : > { %v2005_v24 = vld [vmem:[#allocation2] sm:$0xff]  ;;  %2061 = vrot.lane.b32.xlu1 %v2013_v23, %s3404_s25 }
 0x965   : > { %2029 = vrot.lane.b32.xlu0 %v2005_v24, %s3392_s14 }
 0x96c   : > { %v1963_v25 = vpop.permute.xlu1 %1962 }
 0x96d   : > { %1986 = vst.msk [vmem:[#allocation2 + $0x11] sm:$0xff] %vm1984_vm9, %v1963_v25  ;;  %2085 = vrot.lane.b32.xlu0 %v2013_v23, %s3405_s10 }
 0x974   : > { %v2014_v27 = vld [vmem:[#allocation2 + $0x11] sm:$0xff] }
 0x975   : > { %v2006_v28 = vld [vmem:[#allocation2 + $0x10] sm:$0xff]  ;;  %v1965_v29 = vpop.permute.xlu2 %1964  ;;  %2063 = vrot.lane.b32.xlu2 %v2014_v27, %s3404_s25  ;;  %1974 = vrot.lane.b32.xlu0 %v1951_v30, %s3403_s9  ;;  %v4065_v30 = vld [vmem:[%s4330_s5 + $0x3] ss:$0 sm:$0xff] }
 0x976   : > { %2031 = vrot.lane.b32.xlu1 %v2006_v28, %s3392_s14  ;;  %1987 = vst.msk [vmem:[#allocation2 + $0x21] sm:$0xff] %vm1984_vm9, %v1965_v29 }
 0x97d   : > { %v2007_v31 = vld [vmem:[#allocation2 + $0x20] sm:$0xff] }
 0x97e   : > { %2087 = vrot.lane.b32.xlu1 %v2014_v27, %s3405_s10  ;;  %v2015_v32 = vld [vmem:[#allocation2 + $0x21] sm:$0xff]  ;;  %2033 = vrot.lane.b32.xlu2 %v2007_v31, %s3392_s14 }
 0x97f   : > { %2065 = vrot.lane.b32.xlu0 %v2015_v32, %s3404_s25 }
 0x986   : > { %2089 = vrot.lane.b32.xlu1 %v2015_v32, %s3405_s10 }
 0x9aa   : > { %v1971_v33 = vpop.permute.xlu2 %1970 }
 0x9ab   : > { %1990 = vst.msk [vmem:[#allocation2 + $0x51] sm:$0xff] %vm1984_vm9, %v1971_v33  ;;  %v1967_v34 = vpop.permute.xlu0 %1966 }
 0x9ac   : > { %1988 = vst.msk [vmem:[#allocation2 + $0x31] sm:$0xff] %vm1984_vm9, %v1967_v34 }
 0x9b2   : > { %v1973_v38 = vpop.permute.xlu2 %1972  ;;  %v2018_v52 = vld [vmem:[#allocation2 + $0x51] sm:$0xff] }
 0x9b3   : > { %1991 = vst.msk [vmem:[#allocation2 + $0x61] sm:$0xff] %vm1984_vm9, %v1973_v38  ;;  %v2016_v39 = vld [vmem:[#allocation2 + $0x31] sm:$0xff] }
 0x9b4   : > { %v2008_v40 = vld [vmem:[#allocation2 + $0x30] sm:$0xff]  ;;  %2091 = vrot.lane.b32.xlu1 %v2016_v39, %s3405_s10  ;;  %2067 = vrot.lane.b32.xlu0 %v2016_v39, %s3404_s25 }
 0x9b5   : > { %2035 = vrot.lane.b32.xlu2 %v2008_v40, %s3392_s14  ;;  %v2010_v53 = vld [vmem:[#allocation2 + $0x50] sm:$0xff] }
 0x9ba   : > { %v1969_v46 = vpop.permute.xlu1 %1968  ;;  %v2019_v55 = vld [vmem:[#allocation2 + $0x61] sm:$0xff] }
 0x9bb   : > { %1989 = vst.msk [vmem:[#allocation2 + $0x41] sm:$0xff] %vm1984_vm9, %v1969_v46  ;;  %v2011_v56 = vld [vmem:[#allocation2 + $0x60] sm:$0xff] }
 0x9c2   : > { %v2017_v50 = vld [vmem:[#allocation2 + $0x41] sm:$0xff] }
 0x9c3   : > { %v2009_v51 = vld [vmem:[#allocation2 + $0x40] sm:$0xff]  ;;  %2093 = vrot.lane.b32.xlu1 %v2017_v50, %s3405_s10  ;;  %2069 = vrot.lane.b32.xlu0 %v2017_v50, %s3404_s25 }
 0x9c4   : > { %2037 = vrot.lane.b32.xlu2 %v2009_v51, %s3392_s14 }
 0x9cb   : > { %2095 = vrot.lane.b32.xlu1 %v2018_v52, %s3405_s10  ;;  %2071 = vrot.lane.b32.xlu0 %v2018_v52, %s3404_s25 }
 0x9cc   : > { %2039 = vrot.lane.b32.xlu2 %v2010_v53, %s3392_s14 }
 0x9cf   : > { %v2064_v63 = vpop.permute.xlu2 %2063 }
 0x9d3   : > { %2097 = vrot.lane.b32.xlu1 %v2019_v55, %s3405_s10  ;;  %2073 = vrot.lane.b32.xlu0 %v2019_v55, %s3404_s25 }
 0x9d4   : > { %2041 = vrot.lane.b32.xlu2 %v2011_v56, %s3392_s14 }
 0x9d6   : > { %v2062_v58 = vpop.permute.xlu1 %2061 }
 0x9d7   : > { %v2030_v57 = vpop.permute.xlu0 %2029 }
 0x9d8   : > { %v2110_v59 = vsel %vm2109_vm2, %v2030_v57, %v2062_v58  ;;  %v2034_v7 = vpop.permute.xlu2 %2033 }
 0x9df   : > { %v2086_v60 = vpop.permute.xlu0 %2085 }
 0x9e0   : > { %v2119_v61 = vsel %vm2118_vm12, %v2110_v59, %v2086_v60 }
 0x9e1   : > { %3083 = vmatmul.msk.f32.vlgmr.msra.gmra.mxu2 %vm2128_vm13, %v2119_v61 }
 0x9e7   : > { %v1975_v62 = vpop.permute.xlu0 %1974 }
 0x9e8   : > { %v2032_v6 = vpop.permute.xlu1 %2031  ;;  %1992 = vst.msk [vmem:[#allocation2 + $0x71] sm:$0xff] %vm1984_vm9, %v1975_v62 }
 0x9e9   : > { %v2111_v0 = vsel %vm2109_vm2, %v2032_v6, %v2064_v63 }
 0x9ef   : > { %v2020_v3 = vld [vmem:[#allocation2 + $0x71] sm:$0xff] }
 0x9f0   : > { %v2088_v1 = vpop.permute.xlu1 %2087  ;;  %v2012_v4 = vld [vmem:[#allocation2 + $0x70] sm:$0xff]  ;;  %2099 = vrot.lane.b32.xlu1 %v2020_v3, %s3405_s10  ;;  %2075 = vrot.lane.b32.xlu0 %v2020_v3, %s3404_s25 }
 0x9f1   : > { %v2120_v2 = vsel %vm2118_vm12, %v2111_v0, %v2088_v1  ;;  %2043 = vrot.lane.b32.xlu2 %v2012_v4, %s3392_s14  ;;  %v2066_v5 = vpop.permute.xlu0 %2065 }
 0x9f2   : > { %3084 = vmatmul.msk.f32.gmra.mxu2 %vm2128_vm13, %v2120_v2  ;;  %v2112_v8 = vsel %vm2109_vm2, %v2034_v7, %v2066_v5 }
 0x9f8   : > { %v2090_v9 = vpop.permute.xlu1 %2089 }
 0x9f9   : > { %v2121_v10 = vsel %vm2118_vm12, %v2112_v8, %v2090_v9 }
 0x9fa   : > { %3085 = vmatmul.msk.f32.gmra.mxu2 %vm2128_vm13, %v2121_v10 }
 0xa0f   : > { %v2036_v12 = vpop.permute.xlu2 %2035 }
 0xa1e   : > { %v2038_v16 = vpop.permute.xlu2 %2037 }
 0xa26   : > { %v2092_v11 = vpop.permute.xlu1 %2091  ;;  %v2068_v13 = vpop.permute.xlu0 %2067 }
 0xa27   : > { %v2113_v14 = vsel %vm2109_vm2, %v2036_v12, %v2068_v13  ;;  %v2040_v21 = vpop.permute.xlu2 %2039 }
 0xa28   : > { %v2122_v15 = vsel %vm2118_vm12, %v2113_v14, %v2092_v11 }
 0xa29   : > { %3086 = vmatmul.msk.f32.gmra.mxu2 %vm2128_vm13, %v2122_v15 }
 0xa2f   : > { %v2042_v45 = vpop.permute.xlu2 %2041 }
 0xa35   : > { %v2094_v17 = vpop.permute.xlu1 %2093  ;;  %v2070_v18 = vpop.permute.xlu0 %2069 }
 0xa36   : > { %v2114_v19 = vsel %vm2109_vm2, %v2038_v16, %v2070_v18 }
 0xa37   : > { %v2123_v20 = vsel %vm2118_vm12, %v2114_v19, %v2094_v17 }
 0xa38   : > { %3087 = vmatmul.msk.f32.gmra.mxu2 %vm2128_vm13, %v2123_v20 }
 0xa3d   : > { %v2096_v22 = vpop.permute.xlu1 %2095  ;;  %v2072_v23 = vpop.permute.xlu0 %2071 }
 0xa3e   : > { %v2115_v24 = vsel %vm2109_vm2, %v2040_v21, %v2072_v23 }
 0xa3f   : > { %v2124_v25 = vsel %vm2118_vm12, %v2115_v24, %v2096_v22 }
 0xa40   : > { %3088 = vmatmul.msk.f32.gmra.mxu2 %vm2128_vm13, %v2124_v25 }
 0xa45   : > { %v2098_v26 = vpop.permute.xlu1 %2097  ;;  %v2074_v27 = vpop.permute.xlu0 %2073 }
 0xa46   : > { %v2116_v28 = vsel %vm2109_vm2, %v2042_v45, %v2074_v27 }
 0xa47   : > { %v2125_v29 = vsel %vm2118_vm12, %v2116_v28, %v2098_v26 }
 0xa48   : > { %3089 = vmatmul.msk.f32.gmra.mxu2 %vm2128_vm13, %v2125_v29 }
 0xa4b   : > { %v2044_v31 = vpop.permute.xlu2 %2043 }
 0xa62   : > { %v2100_v32 = vpop.permute.xlu1 %2099  ;;  %v2076_v33 = vpop.permute.xlu0 %2075 }
 0xa63   : > { %v2117_v35 = vsel %vm2109_vm2, %v2044_v31, %v2076_v33 }
 0xa64   : > { %v2173_v34 = vpop.f32.mrf.mxu2  ;;  %v2126_v54 = vsel %vm2118_vm12, %v2117_v35, %v2100_v32 }
 0xa65   : > { %v2174_v36 = vadd.f32 %v4065_v30, %v2173_v34  ;;  %3090 = vmatmul.msk.f32.gmra.mxu2 %vm2128_vm13, %v2126_v54 }
 0xa67   : > { %v2205_v37 = vmin.f32 %v2174_v36, 0.0  ;;  %vm2197_vm14 = vcmp.gt.f32.partialorder %v2174_v36, 0.0 }
 0xa69   : > { %v2213_v38 = vmul.f32 1.442695, %v2205_v37 }
 0xa6b   : > { %3317 = vpow2.f32 %v2213_v38 }
 0xa71   : > { %v3318_v39 = vpop.eup %3317 }
 0xa72   : > { %v3091_v40 = vadd.f32 -1.0, %v3318_v39 }
 0xa74   : > { %v2237_v42 = vsel %vm2197_vm14, %v2174_v36, %v3091_v40 }
 0xa75   : > { %v2176_v41 = vpop.f32.mrf.mxu2  ;;  %2253 = vrot.lane.b32.xlu2 %v2237_v42, %s3404_s25 }
 0xa76   : > { %v2177_v43 = vadd.f32 %v4065_v30, %v2176_v41 }
 0xa78   : > { %v2206_v44 = vmin.f32 %v2177_v43, 0.0  ;;  %vm2198_vm15 = vcmp.gt.f32.partialorder %v2177_v43, 0.0 }
 0xa7a   : > { %v2215_v46 = vmul.f32 1.442695, %v2206_v44 }
 0xa7c   : > { %3319 = vpow2.f32 %v2215_v46 }
 0xa7d   : > { %v2179_v47 = vpop.f32.mrf.mxu2 }
 0xa7e   : > { %v2180_v48 = vadd.f32 %v4065_v30, %v2179_v47 }
 0xa80   : > { %v2207_v49 = vmin.f32 %v2180_v48, 0.0  ;;  %vm2199_vm1 = vcmp.gt.f32.partialorder %v2180_v48, 0.0 }
 0xa82   : > { %v3320_v50 = vpop.eup %3319  ;;  %v2217_v51 = vmul.f32 1.442695, %v2207_v49 }
 0xa83   : > { %v3092_v52 = vadd.f32 -1.0, %v3320_v50 }
 0xa84   : > { %3321 = vpow2.f32 %v2217_v51 }
 0xa85   : > { %v2238_v53 = vsel %vm2198_vm15, %v2177_v43, %v3092_v52 }
 0xa86   : > { %2255 = vrot.lane.b32.xlu0 %v2238_v53, %s3404_s25 }
 0xa8a   : > { %v3322_v55 = vpop.eup %3321 }
 0xa8b   : > { %v3093_v56 = vadd.f32 -1.0, %v3322_v55 }
 0xa8d   : > { %v2239_v57 = vsel %vm2199_vm1, %v2180_v48, %v3093_v56 }
 0xa8e   : > { %2257 = vrot.lane.b32.xlu1 %v2239_v57, %s3404_s25 }
 0xaac   : > { %v2182_v58 = vpop.f32.mrf.mxu2 }
 0xaad   : > { %v2183_v59 = vadd.f32 %v4065_v30, %v2182_v58 }
 0xaaf   : > { %v2208_v60 = vmin.f32 %v2183_v59, 0.0  ;;  %vm2200_vm3 = vcmp.gt.f32.partialorder %v2183_v59, 0.0 }
 0xab1   : > { %v2219_v61 = vmul.f32 1.442695, %v2208_v60 }
 0xab3   : > { %3323 = vpow2.f32 %v2219_v61 }
 0xab9   : > { %v3324_v6 = vpop.eup %3323 }
 0xaba   : > { %v3094_v62 = vadd.f32 -1.0, %v3324_v6 }
 0xabb   : > { %v2185_v63 = vpop.f32.mrf.mxu2 }
 0xabc   : > { %v2186_v0 = vadd.f32 %v4065_v30, %v2185_v63  ;;  %v2240_v1 = vsel %vm2200_vm3, %v2183_v59, %v3094_v62 }
 0xabd   : > { %2259 = vrot.lane.b32.xlu2 %v2240_v1, %s3404_s25 }
 0xabe   : > { %v2209_v2 = vmin.f32 %v2186_v0, 0.0  ;;  %vm2201_vm5 = vcmp.gt.f32.partialorder %v2186_v0, 0.0 }
 0xac0   : > { %v2221_v3 = vmul.f32 1.442695, %v2209_v2 }
 0xac2   : > { %3325 = vpow2.f32 %v2221_v3 }
 0xac3   : > { %v2188_v4 = vpop.f32.mrf.mxu2 }
 0xac4   : > { %v2189_v5 = vadd.f32 %v4065_v30, %v2188_v4 }
 0xac6   : > { %v2210_v7 = vmin.f32 %v2189_v5, 0.0  ;;  %vm2202_vm7 = vcmp.gt.f32.partialorder %v2189_v5, 0.0 }
 0xac8   : > { %v3326_v8 = vpop.eup %3325  ;;  %v2223_v9 = vmul.f32 1.442695, %v2210_v7 }
 0xac9   : > { %v3095_v10 = vadd.f32 -1.0, %v3326_v8 }
 0xaca   : > { %3327 = vpow2.f32 %v2223_v9 }
 0xacb   : > { %v2191_v11 = vpop.f32.mrf.mxu2  ;;  %v2241_v12 = vsel %vm2201_vm5, %v2186_v0, %v3095_v10  ;;  %vm2688_vm5 = vcmask 588800  }
 0xacc   : > { %v2192_v13 = vadd.f32 %v4065_v30, %v2191_v11  ;;  %2261 = vrot.lane.b32.xlu0 %v2241_v12, %s3404_s25 }
 0xace   : > { %v2211_v14 = vmin.f32 %v2192_v13, 0.0  ;;  %vm2203_vm8 = vcmp.gt.f32.partialorder %v2192_v13, 0.0 }
 0xacf   : > { %v2254_v15 = vpop.permute.xlu2 %2253 }
 0xad0   : > { %2278 = vst.msk [vmem:[#allocation2 + $0x1] sm:$0xff] %vm2277_vm6, %v2254_v15  ;;  %v3328_v16 = vpop.eup %3327  ;;  %v2225_v17 = vmul.f32 1.442695, %v2211_v14 }
 0xad1   : > { %v3096_v18 = vadd.f32 -1.0, %v3328_v16 }
 0xad2   : > { %3329 = vpow2.f32 %v2225_v17 }
 0xad3   : > { %v2242_v19 = vsel %vm2202_vm7, %v2189_v5, %v3096_v18  ;;  %vm2697_vm7 = vcmask 883712  }
 0xad4   : > { %2263 = vrot.lane.b32.xlu1 %v2242_v19, %s3404_s25 }
 0xad7   : > { %v2286_v20 = vld [vmem:[#allocation2 + $0x1] sm:$0xff] }
 0xad8   : > { %2310 = vrot.lane.b32.xlu2 %v2286_v20, %s3406_s20  ;;  %v3330_v21 = vpop.eup %3329  ;;  %v2294_v23 = vld [vmem:[#allocation2 + $0x2] sm:$0xff] }
 0xad9   : > { %v3097_v22 = vadd.f32 -1.0, %v3330_v21 }
 0xadb   : > { %v2243_v24 = vsel %vm2203_vm8, %v2192_v13, %v3097_v22 }
 0xadc   : > { %2342 = vrot.lane.b32.xlu1 %v2294_v23, %s3407_s21  ;;  %2265 = vrot.lane.b32.xlu0 %v2243_v24, %s3404_s25 }
 0xae8   : > { %v2194_v25 = vpop.f32.mrf.mxu2 }
 0xae9   : > { %v2195_v45 = vadd.f32 %v4065_v30, %v2194_v25 }
 0xaeb   : > { %v2212_v26 = vmin.f32 %v2195_v45, 0.0  ;;  %vm2204_vm4 = vcmp.gt.f32.partialorder %v2195_v45, 0.0 }
 0xaed   : > { %v2227_v27 = vmul.f32 1.442695, %v2212_v26 }
 0xaef   : > { %3331 = vpow2.f32 %v2227_v27 }
 0xaf5   : > { %v3332_v28 = vpop.eup %3331 }
 0xaf6   : > { %v3098_v31 = vadd.f32 -1.0, %v3332_v28 }
 0xaf8   : > { %v2256_v29 = vpop.permute.xlu0 %2255  ;;  %v2244_v32 = vsel %vm2204_vm4, %v2195_v45, %v3098_v31 }
 0xaf9   : > { %2279 = vst.msk [vmem:[#allocation2 + $0x11] sm:$0xff] %vm2277_vm6, %v2256_v29  ;;  %2267 = vrot.lane.b32.xlu0 %v2244_v32, %s3404_s25  ;;  %s3408_s25 = smov 36  }
 0xb00   : > { %v2258_v33 = vpop.permute.xlu1 %2257  ;;  %v2295_v34 = vld [vmem:[#allocation2 + $0x12] sm:$0xff] }
 0xb01   : > { %v2287_v35 = vld [vmem:[#allocation2 + $0x11] sm:$0xff]  ;;  %2280 = vst.msk [vmem:[#allocation2 + $0x21] sm:$0xff] %vm2277_vm6, %v2258_v33  ;;  %2344 = vrot.lane.b32.xlu1 %v2295_v34, %s3407_s21 }
 0xb02   : > { %2312 = vrot.lane.b32.xlu2 %v2287_v35, %s3406_s20 }
 0xb08   : > { %v2296_v36 = vld [vmem:[#allocation2 + $0x22] sm:$0xff] }
 0xb09   : > { %v2288_v54 = vld [vmem:[#allocation2 + $0x21] sm:$0xff]  ;;  %2346 = vrot.lane.b32.xlu0 %v2296_v36, %s3407_s21 }
 0xb0a   : > { %2314 = vrot.lane.b32.xlu2 %v2288_v54, %s3406_s20 }
 0xb17   : > { %v2260_v37 = vpop.permute.xlu2 %2259 }
 0xb18   : > { %2281 = vst.msk [vmem:[#allocation2 + $0x31] sm:$0xff] %vm2277_vm6, %v2260_v37 }
 0xb1f   : > { %v2289_v38 = vld [vmem:[#allocation2 + $0x31] sm:$0xff] }
 0xb20   : > { %v2297_v39 = vld [vmem:[#allocation2 + $0x32] sm:$0xff]  ;;  %2316 = vrot.lane.b32.xlu1 %v2289_v38, %s3406_s20 }
 0xb21   : > { %2348 = vrot.lane.b32.xlu2 %v2297_v39, %s3407_s21 }
 0xb32   : > { %v2311_v44 = vpop.permute.xlu2 %2310 }
 0xb33   : > { %v2366_v46 = vsel %vm2109_vm2, %v2286_v20, %v2311_v44 }
 0xb3e   : > { %v2262_v40 = vpop.permute.xlu0 %2261 }
 0xb3f   : > { %2282 = vst.msk [vmem:[#allocation2 + $0x41] sm:$0xff] %vm2277_vm6, %v2262_v40 }
 0xb46   : > { %v2264_v41 = vpop.permute.xlu1 %2263  ;;  %v2298_v42 = vld [vmem:[#allocation2 + $0x42] sm:$0xff] }
 0xb47   : > { %v2290_v43 = vld [vmem:[#allocation2 + $0x41] sm:$0xff]  ;;  %2283 = vst.msk [vmem:[#allocation2 + $0x51] sm:$0xff] %vm2277_vm6, %v2264_v41  ;;  %2350 = vrot.lane.b32.xlu1 %v2298_v42, %s3407_s21 }
 0xb48   : > { %2318 = vrot.lane.b32.xlu0 %v2290_v43, %s3406_s20 }
 0xb4e   : > { %v2343_v47 = vpop.permute.xlu1 %2342  ;;  %v2266_v48 = vpop.permute.xlu0 %2265  ;;  %v2291_v49 = vld [vmem:[#allocation2 + $0x51] sm:$0xff] }
 0xb4f   : > { %v2299_v50 = vld [vmem:[#allocation2 + $0x52] sm:$0xff]  ;;  %v2374_v51 = vsel %vm2118_vm12, %v2366_v46, %v2343_v47  ;;  %2284 = vst.msk [vmem:[#allocation2 + $0x61] sm:$0xff] %vm2277_vm6, %v2266_v48  ;;  %2320 = vrot.lane.b32.xlu2 %v2291_v49, %s3406_s20 }
 0xb50   : > { %2352 = vrot.lane.b32.xlu0 %v2299_v50, %s3407_s21  ;;  %3100 = vmatmul.msk.f32.vlgmr.msra.gmra.mxu3 %vm2128_vm13, %v2374_v51 }
 0xb56   : > { %v2300_v52 = vld [vmem:[#allocation2 + $0x62] sm:$0xff] }
 0xb57   : > { %v2292_v53 = vld [vmem:[#allocation2 + $0x61] sm:$0xff]  ;;  %2354 = vrot.lane.b32.xlu2 %v2300_v52, %s3407_s21 }
 0xb58   : > { %2322 = vrot.lane.b32.xlu1 %v2292_v53, %s3406_s20 }
 0xb5c   : > { %v2313_v55 = vpop.permute.xlu2 %2312 }
 0xb5d   : > { %v2367_v57 = vsel %vm2109_vm2, %v2287_v35, %v2313_v55 }
 0xb64   : > { %v2315_v6 = vpop.permute.xlu2 %2314 }
 0xb65   : > { %v2368_v62 = vsel %vm2109_vm2, %v2288_v54, %v2315_v6 }
 0xb6b   : > { %v2268_v56 = vpop.permute.xlu0 %2267 }
 0xb6c   : > { %2285 = vst.msk [vmem:[#allocation2 + $0x71] sm:$0xff] %vm2277_vm6, %v2268_v56  ;;  %vm2728_vm6 = vcmask 130048  }
 0xb73   : > { %v2345_v58 = vpop.permute.xlu1 %2344  ;;  %v2301_v60 = vld [vmem:[#allocation2 + $0x72] sm:$0xff] }
 0xb74   : > { %v2375_v59 = vsel %vm2118_vm12, %v2367_v57, %v2345_v58  ;;  %v2293_v61 = vld [vmem:[#allocation2 + $0x71] sm:$0xff]  ;;  %2356 = vrot.lane.b32.xlu1 %v2301_v60, %s3407_s21 }
 0xb75   : > { %3101 = vmatmul.msk.f32.gmra.mxu3 %vm2128_vm13, %v2375_v59  ;;  %2324 = vrot.lane.b32.xlu0 %v2293_v61, %s3406_s20 }
 0xb7b   : > { %v2347_v63 = vpop.permute.xlu0 %2346  ;;  %v2349_v2 = vpop.permute.xlu2 %2348 }
 0xb7c   : > { %v2376_v0 = vsel %vm2118_vm12, %v2368_v62, %v2347_v63 }
 0xb7d   : > { %3102 = vmatmul.msk.f32.gmra.mxu3 %vm2128_vm13, %v2376_v0 }
 0xb92   : > { %v2317_v1 = vpop.permute.xlu1 %2316 }
 0xb93   : > { %v2369_v3 = vsel %vm2109_vm2, %v2289_v38, %v2317_v1 }
 0xb94   : > { %v2377_v4 = vsel %vm2118_vm12, %v2369_v3, %v2349_v2 }
 0xb95   : > { %3103 = vmatmul.msk.f32.gmra.mxu3 %vm2128_vm13, %v2377_v4 }
 0xba9   : > { %v2321_v10 = vpop.permute.xlu2 %2320 }
 0xbaa   : > { %v2371_v11 = vsel %vm2109_vm2, %v2291_v49, %v2321_v10 }
 0xbb1   : > { %v2355_v15 = vpop.permute.xlu2 %2354 }
 0xbb9   : > { %v2351_v5 = vpop.permute.xlu1 %2350 }
 0xbba   : > { %v2319_v7 = vpop.permute.xlu0 %2318 }
 0xbbb   : > { %v2370_v8 = vsel %vm2109_vm2, %v2290_v43, %v2319_v7 }
 0xbbc   : > { %v2378_v9 = vsel %vm2118_vm12, %v2370_v8, %v2351_v5 }
 0xbbd   : > { %3104 = vmatmul.msk.f32.gmra.mxu3 %vm2128_vm13, %v2378_v9 }
 0xbc2   : > { %v2353_v12 = vpop.permute.xlu0 %2352 }
 0xbc3   : > { %v2379_v13 = vsel %vm2118_vm12, %v2371_v11, %v2353_v12 }
 0xbc5   : > { %3105 = vmatmul.msk.f32.gmra.mxu3 %vm2128_vm13, %v2379_v13 }
 0xbca   : > { %v2323_v14 = vpop.permute.xlu1 %2322 }
 0xbcb   : > { %v2372_v16 = vsel %vm2109_vm2, %v2292_v53, %v2323_v14 }
 0xbcc   : > { %v2380_v17 = vsel %vm2118_vm12, %v2372_v16, %v2355_v15 }
 0xbcd   : > { %3106 = vmatmul.msk.f32.gmra.mxu3 %vm2128_vm13, %v2380_v17 }
 0xbd3   : > { %v2423_v18 = vpop.f32.mrf.mxu3 }
 0xbd4   : > { %v2424_v19 = vadd.f32 %v4065_v30, %v2423_v18 }
 0xbd6   : > { %v2455_v20 = vmin.f32 %v2424_v19, 0.0  ;;  %vm2447_vm9 = vcmp.gt.f32.partialorder %v2424_v19, 0.0 }
 0xbd8   : > { %v2463_v21 = vmul.f32 1.442695, %v2455_v20 }
 0xbda   : > { %3333 = vpow2.f32 %v2463_v21 }
 0xbe0   : > { %v3334_v22 = vpop.eup %3333 }
 0xbe1   : > { %v3108_v23 = vadd.f32 -1.0, %v3334_v22 }
 0xbe3   : > { %v2487_v24 = vsel %vm2447_vm9, %v2424_v19, %v3108_v23 }
 0xbe4   : > { %2503 = vrot.lane.b32.xlu2 %v2487_v24, %s3406_s20 }
 0xbe6   : > { %v2357_v25 = vpop.permute.xlu1 %2356 }
 0xbe7   : > { %v2325_v45 = vpop.permute.xlu0 %2324 }
 0xbe8   : > { %v2373_v26 = vsel %vm2109_vm2, %v2293_v61, %v2325_v45 }
 0xbe9   : > { %v2381_v27 = vsel %vm2118_vm12, %v2373_v26, %v2357_v25 }
 0xbea   : > { %3107 = vmatmul.msk.f32.gmra.mxu3 %vm2128_vm13, %v2381_v27  ;;  %vm2527_vm13 = vcmask 818912  }
 0xbf8   : > { %v2426_v28 = vpop.f32.mrf.mxu3 }
 0xbf9   : > { %v2427_v29 = vadd.f32 %v4065_v30, %v2426_v28 }
 0xbfb   : > { %v2456_v31 = vmin.f32 %v2427_v29, 0.0  ;;  %vm2448_vm10 = vcmp.gt.f32.partialorder %v2427_v29, 0.0 }
 0xbfd   : > { %v2465_v32 = vmul.f32 1.442695, %v2456_v31 }
 0xbff   : > { %3335 = vpow2.f32 %v2465_v32 }
 0xc00   : > { %v2429_v33 = vpop.f32.mrf.mxu3 }
 0xc01   : > { %v2430_v34 = vadd.f32 %v4065_v30, %v2429_v33 }
 0xc03   : > { %v2457_v35 = vmin.f32 %v2430_v34, 0.0  ;;  %vm2449_vm2 = vcmp.gt.f32.partialorder %v2430_v34, 0.0 }
 0xc05   : > { %v3336_v36 = vpop.eup %3335  ;;  %v2467_v54 = vmul.f32 1.442695, %v2457_v35  ;;  %v2720_v35 = vld [vmem:[%s4331_s6 + $0x70] sm:$0xff] }
 0xc06   : > { %v3109_v37 = vadd.f32 -1.0, %v3336_v36 }
 0xc07   : > { %3337 = vpow2.f32 %v2467_v54  ;;  %v2719_v54 = vld [vmem:[%s4331_s6 + $0x68] sm:$0xff] }
 0xc08   : > { %v2488_v38 = vsel %vm2448_vm10, %v2427_v29, %v3109_v37  ;;  %v2718_v37 = vld [vmem:[%s4331_s6 + $0x60] sm:$0xff] }
 0xc09   : > { %2505 = vrot.lane.b32.xlu0 %v2488_v38, %s3406_s20  ;;  %v2717_v38 = vld [vmem:[%s4331_s6 + $0x58] sm:$0xff] }
 0xc0d   : > { %v3338_v39 = vpop.eup %3337 }
 0xc0e   : > { %v3110_v40 = vadd.f32 -1.0, %v3338_v39 }
 0xc10   : > { %v2489_v41 = vsel %vm2449_vm2, %v2430_v34, %v3110_v40  ;;  %v2721_v34 = vld [vmem:[%s4331_s6 + $0x78] sm:$0xff]  ;;  %v2716_v40 = vld [vmem:[%s4331_s6 + $0x50] sm:$0xff] }
 0xc11   : > { %2507 = vrot.lane.b32.xlu1 %v2489_v41, %s3406_s20  ;;  %2745 = vmatpush.msra.mxu0 %v2721_v34  ;;  %v2715_v41 = vld [vmem:[%s4331_s6 + $0x48] sm:$0xff] }
 0xc13   : > { %2746 = vmatpush.msra.mxu0 %v2720_v35 }
 0xc15   : > { %2747 = vmatpush.msra.mxu0 %v2719_v54 }
 0xc17   : > { %2748 = vmatpush.msra.mxu0 %v2718_v37 }
 0xc18   : > { %v2432_v42 = vpop.f32.mrf.mxu3 }
 0xc19   : > { %v2433_v43 = vadd.f32 %v4065_v30, %v2432_v42  ;;  %2749 = vmatpush.msra.mxu0 %v2717_v38  ;;  %v2714_v42 = vld [vmem:[%s4331_s6 + $0x40] sm:$0xff] }
 0xc1b   : > { %v2458_v44 = vmin.f32 %v2433_v43, 0.0  ;;  %vm2450_vm12 = vcmp.gt.f32.partialorder %v2433_v43, 0.0  ;;  %2750 = vmatpush.msra.mxu0 %v2716_v40 }
 0xc1d   : > { %v2469_v46 = vmul.f32 1.442695, %v2458_v44  ;;  %2751 = vmatpush.msra.mxu0 %v2715_v41  ;;  %v2713_v44 = vld [vmem:[%s4331_s6 + $0x38] sm:$0xff] }
 0xc1f   : > { %3339 = vpow2.f32 %v2469_v46  ;;  %2752 = vmatpush.msra.mxu0 %v2714_v42 }
 0xc21   : > { %2753 = vmatpush.msra.mxu0 %v2713_v44 }
 0xc25   : > { %v3340_v47 = vpop.eup %3339 }
 0xc26   : > { %v3111_v48 = vadd.f32 -1.0, %v3340_v47 }
 0xc28   : > { %v2490_v49 = vsel %vm2450_vm12, %v2433_v43, %v3111_v48 }
 0xc29   : > { %2509 = vrot.lane.b32.xlu2 %v2490_v49, %s3406_s20 }
 0xc3e   : > { %v2504_v50 = vpop.permute.xlu2 %2503 }
 0xc3f   : > { %2528 = vst.msk [vmem:[#allocation2 + $0x1] sm:$0xff] %vm2527_vm13, %v2504_v50 }
 0xc40   : > { %v2435_v51 = vpop.f32.mrf.mxu3 }
 0xc41   : > { %v2436_v52 = vadd.f32 %v4065_v30, %v2435_v51 }
 0xc43   : > { %v2459_v53 = vmin.f32 %v2436_v52, 0.0  ;;  %vm2451_vm14 = vcmp.gt.f32.partialorder %v2436_v52, 0.0 }
 0xc45   : > { %v2471_v55 = vmul.f32 1.442695, %v2459_v53  ;;  %v2711_v53 = vld [vmem:[%s4331_s6 + $0x28] sm:$0xff] }
 0xc46   : > { %v2544_v17 = vld [vmem:[#allocation2 + $0x1] sm:$0xff] }
 0xc47   : > { %3341 = vpow2.f32 %v2471_v55  ;;  %v2536_v20 = vld [vmem:[#allocation2] sm:$0xff] }
 0xc48   : > { %v2438_v56 = vpop.f32.mrf.mxu3  ;;  %v2552_v25 = vld [vmem:[#allocation2 + $0x2] sm:$0xff] }
 0xc49   : > { %v2439_v57 = vadd.f32 %v4065_v30, %v2438_v56  ;;  %v2710_v55 = vld [vmem:[%s4331_s6 + $0x20] sm:$0xff]  ;;  %v2709_v56 = vld [vmem:[%s4331_s6 + $0x18] sm:$0xff] }
 0xc4b   : > { %v2460_v58 = vmin.f32 %v2439_v57, 0.0  ;;  %vm2452_vm15 = vcmp.gt.f32.partialorder %v2439_v57, 0.0 }
 0xc4d   : > { %v3342_v59 = vpop.eup %3341  ;;  %v2473_v60 = vmul.f32 1.442695, %v2460_v58  ;;  %v2723_v58 = vld [vmem:[%s4331_s6 + $0x88] sm:$0xff] }
 0xc4e   : > { %v3112_v61 = vadd.f32 -1.0, %v3342_v59  ;;  %2800 = vmatpush.msra.mxu1 %v2723_v58 }
 0xc4f   : > { %3343 = vpow2.f32 %v2473_v60  ;;  %v2722_v60 = vld [vmem:[%s4331_s6 + $0x80] sm:$0xff] }
 0xc50   : > { %v2441_v6 = vpop.f32.mrf.mxu3  ;;  %v2491_v62 = vsel %vm2451_vm14, %v2436_v52, %v3112_v61  ;;  %v2712_v52 = vld [vmem:[%s4331_s6 + $0x30] sm:$0xff]  ;;  %2801 = vmatpush.msra.mxu1 %v2722_v60 }
 0xc51   : > { %v2442_v63 = vadd.f32 %v4065_v30, %v2441_v6  ;;  %2511 = vrot.lane.b32.xlu0 %v2491_v62, %s3406_s20  ;;  %2754 = vmatpush.msra.mxu0 %v2712_v52  ;;  %v2707_v6 = vld [vmem:[%s4331_s6 + $0x8] sm:$0xff]  ;;  %v2706_v62 = vld [vmem:[%s4331_s6] sm:$0xff] }
 0xc53   : > { %v2461_v0 = vmin.f32 %v2442_v63, 0.0  ;;  %vm2453_vm1 = vcmp.gt.f32.partialorder %v2442_v63, 0.0  ;;  %2755 = vmatpush.msra.mxu0 %v2711_v53 }
 0xc55   : > { %v3344_v1 = vpop.eup %3343  ;;  %v2475_v2 = vmul.f32 1.442695, %v2461_v0  ;;  %2756 = vmatpush.msra.mxu0 %v2710_v55 }
 0xc56   : > { %v3113_v3 = vadd.f32 -1.0, %v3344_v1 }
 0xc57   : > { %3345 = vpow2.f32 %v2475_v2  ;;  %2757 = vmatpush.msra.mxu0 %v2709_v56 }
 0xc58   : > { %v2492_v4 = vsel %vm2452_vm15, %v2439_v57, %v3113_v3  ;;  %v2708_v57 = vld [vmem:[%s4331_s6 + $0x10] sm:$0xff] }
 0xc59   : > { %2513 = vrot.lane.b32.xlu1 %v2492_v4, %s3406_s20  ;;  %2758 = vmatpush.msra.mxu0 %v2708_v57 }
 0xc5b   : > { %2759 = vmatpush.msra.mxu0 %v2707_v6 }
 0xc5d   : > { %v3346_v5 = vpop.eup %3345  ;;  %2760 = vmatpush.msra.mxu0 %v2706_v62 }
 0xc5e   : > { %v3114_v7 = vadd.f32 -1.0, %v3346_v5 }
 0xc60   : > { %v2493_v8 = vsel %vm2453_vm1, %v2442_v63, %v3114_v7 }
 0xc61   : > { %2515 = vrot.lane.b32.xlu1 %v2493_v8, %s3406_s20 }
 0xc6d   : > { %v2444_v9 = vpop.f32.mrf.mxu3 }
 0xc6e   : > { %v2445_v10 = vadd.f32 %v4065_v30, %v2444_v9 }
 0xc70   : > { %v2462_v11 = vmin.f32 %v2445_v10, 0.0  ;;  %vm2454_vm3 = vcmp.gt.f32.partialorder %v2445_v10, 0.0 }
 0xc72   : > { %v2477_v12 = vmul.f32 1.442695, %v2462_v11 }
 0xc74   : > { %3347 = vpow2.f32 %v2477_v12 }
 0xc7a   : > { %v3348_v14 = vpop.eup %3347 }
 0xc7b   : > { %v2506_v13 = vpop.permute.xlu0 %2505  ;;  %v3115_v15 = vadd.f32 -1.0, %v3348_v14 }
 0xc7c   : > { %2529 = vst.msk [vmem:[#allocation2 + $0x11] sm:$0xff] %vm2527_vm13, %v2506_v13 }
 0xc7d   : > { %v2494_v16 = vsel %vm2454_vm3, %v2445_v10, %v3115_v15 }
 0xc7e   : > { %2517 = vrot.lane.b32.xlu1 %v2494_v16, %s3406_s20 }
 0xc83   : > { %v2508_v18 = vpop.permute.xlu1 %2507  ;;  %v2545_v19 = vld [vmem:[#allocation2 + $0x11] sm:$0xff]  ;;  %v2510_v23 = vpop.permute.xlu2 %2509 }
 0xc84   : > { %v2537_v21 = vld [vmem:[#allocation2 + $0x10] sm:$0xff]  ;;  %2530 = vst.msk [vmem:[#allocation2 + $0x21] sm:$0xff] %vm2527_vm13, %v2508_v18  ;;  %v3171_v30 = vpack.i.bf16 %v2545_v19, %v2544_v17 }
 0xc85   : > { %v3166_v22 = vpack.i.bf16 %v2537_v21, %v2536_v20  ;;  %2531 = vst.msk [vmem:[#allocation2 + $0x31] sm:$0xff] %vm2527_vm13, %v2510_v23  ;;  %v2553_v31 = vld [vmem:[#allocation2 + $0x12] sm:$0xff] }
 0xc86   : > { %3172 = vrot.lane.b32.xlu0 %v3171_v30, %s3408_s25 }
 0xc87   : > { %3167 = vrot.lane.b32.xlu2 %v3166_v22, %s3392_s14 }
 0xc8b   : > { %v2546_v24 = vld [vmem:[#allocation2 + $0x21] sm:$0xff] }
 0xc8c   : > { %v2547_v45 = vld [vmem:[#allocation2 + $0x31] sm:$0xff]  ;;  %v2538_v27 = vld [vmem:[#allocation2 + $0x20] sm:$0xff] }
 0xc8d   : > { %v3186_v26 = vpack.i.bf16 %v2547_v45, %v2546_v24  ;;  %v2539_v28 = vld [vmem:[#allocation2 + $0x30] sm:$0xff]  ;;  %v2554_v33 = vld [vmem:[#allocation2 + $0x22] sm:$0xff] }
 0xc8e   : > { %2656 = vrot.lane.b32.xlu0 %v2552_v25, %s3409_s22  ;;  %v3181_v29 = vpack.i.bf16 %v2539_v28, %v2538_v27  ;;  %v2555_v32 = vld [vmem:[#allocation2 + $0x32] sm:$0xff] }
 0xc8f   : > { %3177 = vrot.lane.b32.xlu2 %v3171_v30, %s3395_s23  ;;  %3187 = vrot.lane.b32.xlu1 %v3186_v26, %s3408_s25 }
 0xc96   : > { %3182 = vrot.lane.b32.xlu0 %v3181_v29, %s3392_s14 }
 0xc97   : > { %2658 = vrot.lane.b32.xlu2 %v2553_v31, %s3409_s22  ;;  %2662 = vrot.lane.b32.xlu1 %v2555_v32, %s3409_s22 }
 0xc9e   : > { %2660 = vrot.lane.b32.xlu0 %v2554_v33, %s3409_s22 }
 0xc9f   : > { %3192 = vrot.lane.b32.xlu2 %v3186_v26, %s3395_s23 }
 0xcc3   : > { %v2512_v36 = vpop.permute.xlu0 %2511 }
 0xcc4   : > { %2532 = vst.msk [vmem:[#allocation2 + $0x41] sm:$0xff] %vm2527_vm13, %v2512_v36 }
 0xccb   : > { %v2514_v39 = vpop.permute.xlu1 %2513  ;;  %v2548_v43 = vld [vmem:[#allocation2 + $0x41] sm:$0xff] }
 0xccc   : > { %2533 = vst.msk [vmem:[#allocation2 + $0x51] sm:$0xff] %vm2527_vm13, %v2514_v39  ;;  %v2540_v48 = vld [vmem:[#allocation2 + $0x40] sm:$0xff] }
 0xccd   : > { %v2556_v61 = vld [vmem:[#allocation2 + $0x42] sm:$0xff] }
 0xcd3   : > { %v2516_v46 = vpop.permute.xlu1 %2515  ;;  %v2549_v47 = vld [vmem:[#allocation2 + $0x51] sm:$0xff] }
 0xcd4   : > { %v2541_v49 = vld [vmem:[#allocation2 + $0x50] sm:$0xff]  ;;  %2534 = vst.msk [vmem:[#allocation2 + $0x61] sm:$0xff] %vm2527_vm13, %v2516_v46  ;;  %v3206_v50 = vpack.i.bf16 %v2549_v47, %v2548_v43 }
 0xcd5   : > { %v3196_v51 = vpack.i.bf16 %v2541_v49, %v2540_v48  ;;  %v2557_v59 = vld [vmem:[#allocation2 + $0x52] sm:$0xff] }
 0xcd6   : > { %3207 = vrot.lane.b32.xlu1 %v3206_v50, %s3395_s23  ;;  %3202 = vrot.lane.b32.xlu0 %v3206_v50, %s3408_s25 }
 0xcd7   : > { %3197 = vrot.lane.b32.xlu2 %v3196_v51, %s3392_s14 }
 0xcdb   : > { %v2550_v63 = vld [vmem:[#allocation2 + $0x61] sm:$0xff] }
 0xcdc   : > { %v2542_v7 = vld [vmem:[#allocation2 + $0x60] sm:$0xff] }
 0xcdd   : > { %v2558_v21 = vld [vmem:[#allocation2 + $0x62] sm:$0xff] }
 0xcde   : > { %2666 = vrot.lane.b32.xlu0 %v2557_v59, %s3409_s22 }
 0xcdf   : > { %2664 = vrot.lane.b32.xlu2 %v2556_v61, %s3409_s22 }
 0xce1   : > { %v3168_v0 = vpop.permute.xlu2 %3167 }
 0xce2   : > { %v3169_v9 = vunpack.i.l.bf16 %v3168_v0  ;;  %v3170_v16 = vunpack.i.h.bf16 %v3168_v0 }
 0xce6   : > { %2636 = vrot.lane.b32.xlu0 %v2550_v63, %s3395_s23 }
 0xce7   : > { %2612 = vrot.lane.b32.xlu2 %v2550_v63, %s3408_s25 }
 0xce9   : > { %v3178_v2 = vpop.permute.xlu2 %3177 }
 0xcea   : > { %v3179_v12 = vunpack.i.l.bf16 %v3178_v2  ;;  %v3180_v20 = vunpack.i.h.bf16 %v3178_v2 }
 0xcf0   : > { %v2518_v1 = vpop.permute.xlu1 %2517 }
 0xcf1   : > { %2535 = vst.msk [vmem:[#allocation2 + $0x71] sm:$0xff] %vm2527_vm13, %v2518_v1  ;;  %v2659_v17 = vpop.permute.xlu2 %2658 }
 0xcf8   : > { %v3173_v3 = vpop.permute.xlu0 %3172  ;;  %v2551_v5 = vld [vmem:[#allocation2 + $0x71] sm:$0xff] }
 0xcf9   : > { %v3174_v4 = vunpack.i.l.bf16 %v3173_v3  ;;  %v2543_v8 = vld [vmem:[#allocation2 + $0x70] sm:$0xff]  ;;  %2638 = vrot.lane.b32.xlu0 %v2551_v5, %s3395_s23  ;;  %2614 = vrot.lane.b32.xlu2 %v2551_v5, %s3408_s25  ;;  %v3175_v13 = vunpack.i.h.bf16 %v3173_v3  ;;  %v3193_v45 = vpop.permute.xlu2 %3192  ;;  %s3410_s25 = smov 124  }
 0xcfa   : > { %v3211_v10 = vpack.i.bf16 %v2543_v8, %v2542_v7  ;;  %v2559_v27 = vld [vmem:[#allocation2 + $0x72] sm:$0xff]  ;;  %v3194_v29 = vunpack.i.l.bf16 %v3193_v45  ;;  %v3195_v54 = vunpack.i.h.bf16 %v3193_v45 }
 0xcfb   : > { %v2680_v11 = vsel %vm1045_vm11, %v3169_v9, %v3174_v4  ;;  %v2681_v19 = vsel %vm1045_vm11, %v3170_v16, %v3175_v13  ;;  %v4265_v4 = vld [vmem:[%s4332_s7] ss:$0 sm:$0xff] }
 0xcfc   : > { %3212 = vrot.lane.b32.xlu1 %v3211_v10, %s3392_s14  ;;  %v2689_v15 = vsel %vm2688_vm5, %v2680_v11, %v3179_v12  ;;  %v2690_v30 = vsel %vm2688_vm5, %v2681_v19, %v3180_v20 }
 0xcfd   : > { %v2699_v25 = vsel %vm2697_vm7, %v2690_v30, %v2659_v17 }
 0xd00   : > { %v2657_v14 = vpop.permute.xlu0 %2656 }
 0xd01   : > { %v2698_v18 = vsel %vm2697_vm7, %v2689_v15, %v2657_v14  ;;  %3116 = vmatmul.msk.f32.vlgmr.msra.gmra.mxu1 %vm2728_vm6, %v2657_v14  ;;  %v3188_v22 = vpop.permute.xlu1 %3187 }
 0xd02   : > { %2761 = vmatmul.f32.vlgmr.msra.gmra.mxu0 %v2698_v18  ;;  %v3189_v26 = vunpack.i.l.bf16 %v3188_v22  ;;  %v3190_v34 = vunpack.i.h.bf16 %v3188_v22 }
 0xd04   : > { %2668 = vrot.lane.b32.xlu1 %v2558_v21, %s3409_s22 }
 0xd08   : > { %v3183_v23 = vpop.permute.xlu0 %3182 }
 0xd09   : > { %v3184_v24 = vunpack.i.l.bf16 %v3183_v23  ;;  %3117 = vmatmul.msk.f32.gmra.mxu1 %vm2728_vm6, %v2659_v17  ;;  %v3185_v31 = vunpack.i.h.bf16 %v3183_v23  ;;  %v2663_v38 = vpop.permute.xlu1 %2662 }
 0xd0a   : > { %2764 = vmatmul.f32.gmra.mxu0 %v2699_v25 }
 0xd0b   : > { %v2682_v28 = vsel %vm1045_vm11, %v3184_v24, %v3189_v26  ;;  %v2683_v36 = vsel %vm1045_vm11, %v3185_v31, %v3190_v34 }
 0xd0c   : > { %2670 = vrot.lane.b32.xlu1 %v2559_v27, %s3409_s22  ;;  %v2691_v33 = vsel %vm2688_vm5, %v2682_v28, %v3194_v29  ;;  %v2692_v37 = vsel %vm2688_vm5, %v2683_v36, %v3195_v54 }
 0xd0d   : > { %v2701_v39 = vsel %vm2697_vm7, %v2692_v37, %v2663_v38 }
 0xd10   : > { %v2661_v32 = vpop.permute.xlu0 %2660 }
 0xd11   : > { %3118 = vmatmul.msk.f32.gmra.mxu1 %vm2728_vm6, %v2661_v32  ;;  %v2700_v35 = vsel %vm2697_vm7, %v2691_v33, %v2661_v32 }
 0xd12   : > { %2767 = vmatmul.f32.gmra.mxu0 %v2700_v35 }
 0xd19   : > { %3119 = vmatmul.msk.f32.gmra.mxu1 %vm2728_vm6, %v2663_v38 }
 0xd1a   : > { %2770 = vmatmul.f32.gmra.mxu0 %v2701_v39 }
 0xd31   : > { %v3198_v40 = vpop.permute.xlu2 %3197 }
 0xd32   : > { %v3199_v44 = vunpack.i.l.bf16 %v3198_v40  ;;  %v3200_v52 = vunpack.i.h.bf16 %v3198_v40 }
 0xd39   : > { %v2665_v41 = vpop.permute.xlu2 %2664 }
 0xd3a   : > { %3120 = vmatmul.msk.f32.gmra.mxu1 %vm2728_vm6, %v2665_v41 }
 0xd41   : > { %v2613_v61 = vpop.permute.xlu2 %2612 }
 0xd48   : > { %v3208_v42 = vpop.permute.xlu1 %3207  ;;  %v3203_v43 = vpop.permute.xlu0 %3202 }
 0xd49   : > { %v3209_v46 = vunpack.i.l.bf16 %v3208_v42  ;;  %v3204_v47 = vunpack.i.l.bf16 %v3203_v43  ;;  %v3205_v50 = vunpack.i.h.bf16 %v3203_v43  ;;  %v3210_v53 = vunpack.i.h.bf16 %v3208_v42 }
 0xd4b   : > { %v2684_v48 = vsel %vm1045_vm11, %v3199_v44, %v3204_v47  ;;  %v2685_v56 = vsel %vm1045_vm11, %v3200_v52, %v3205_v50 }
 0xd4c   : > { %v2693_v49 = vsel %vm2688_vm5, %v2684_v48, %v3209_v46  ;;  %v2694_v57 = vsel %vm2688_vm5, %v2685_v56, %v3210_v53 }
 0xd4d   : > { %v2702_v51 = vsel %vm2697_vm7, %v2693_v49, %v2665_v41 }
 0xd4e   : > { %2773 = vmatmul.f32.gmra.mxu0 %v2702_v51 }
 0xd50   : > { %v2667_v55 = vpop.permute.xlu0 %2666 }
 0xd51   : > { %3121 = vmatmul.msk.f32.gmra.mxu1 %vm2728_vm6, %v2667_v55  ;;  %v2703_v58 = vsel %vm2697_vm7, %v2694_v57, %v2667_v55 }
 0xd53   : > { %v2615_v3 = vpop.permute.xlu2 %2614 }
 0xd56   : > { %2776 = vmatmul.f32.gmra.mxu0 %v2703_v58 }
 0xd58   : > { %v2637_v62 = vpop.permute.xlu0 %2636 }
 0xd6b   : > { %v2639_v7 = vpop.permute.xlu0 %2638 }
 0xd6e   : > { %v3213_v59 = vpop.permute.xlu1 %3212 }
 0xd6f   : > { %v3214_v60 = vunpack.i.l.bf16 %v3213_v59  ;;  %v3215_v1 = vunpack.i.h.bf16 %v3213_v59 }
 0xd71   : > { %v2686_v6 = vsel %vm1045_vm11, %v3214_v60, %v2613_v61  ;;  %v2687_v5 = vsel %vm1045_vm11, %v3215_v1, %v2615_v3 }
 0xd72   : > { %v2695_v0 = vsel %vm2688_vm5, %v2686_v6, %v2637_v62  ;;  %v2696_v11 = vsel %vm2688_vm5, %v2687_v5, %v2639_v7 }
 0xd76   : > { %v2669_v63 = vpop.permute.xlu1 %2668 }
 0xd77   : > { %3122 = vmatmul.msk.f32.gmra.mxu1 %vm2728_vm6, %v2669_v63  ;;  %v2704_v2 = vsel %vm2697_vm7, %v2695_v0, %v2669_v63 }
 0xd78   : > { %2779 = vmatmul.f32.gmra.mxu0 %v2704_v2 }
 0xd7e   : > { %v2803_v8 = vpop.f32.mrf.mxu1  ;;  %v2671_v9 = vpop.permute.xlu1 %2670 }
 0xd7f   : > { %v2762_v10 = vpop.f32.mrf.mxu0  ;;  %3123 = vmatmul.msk.f32.gmra.mxu1 %vm2728_vm6, %v2671_v9  ;;  %v2705_v13 = vsel %vm2697_vm7, %v2696_v11, %v2671_v9 }
 0xd80   : > { %v2763_v12 = vadd.f32 %v4265_v4, %v2762_v10  ;;  %2782 = vmatmul.f32.gmra.mxu0 %v2705_v13 }
 0xd82   : > { %v4272_v14 = vadd.f32 %v2803_v8, %v2763_v12 }
 0xd84   : > { %v2827_v15 = vsub.f32 0.0, %v4272_v14 }
 0xd86   : > { %v2835_v16 = vmul.f32 1.442695, %v2827_v15  ;;  %v2806_v17 = vpop.f32.mrf.mxu1 }
 0xd87   : > { %v2765_v18 = vpop.f32.mrf.mxu0 }
 0xd88   : > { %3349 = vpow2.f32 %v2835_v16  ;;  %v2766_v19 = vadd.f32 %v4265_v4, %v2765_v18 }
 0xd8a   : > { %v4276_v20 = vadd.f32 %v2806_v17, %v2766_v19 }
 0xd8c   : > { %v2828_v21 = vsub.f32 0.0, %v4276_v20 }
 0xd8e   : > { %v3350_v30 = vpop.eup %3349  ;;  %v2837_v22 = vmul.f32 1.442695, %v2828_v21  ;;  %v2809_v24 = vpop.f32.mrf.mxu1 }
 0xd8f   : > { %v2851_v23 = vadd.f32 1.0, %v3350_v30  ;;  %v2768_v25 = vpop.f32.mrf.mxu0 }
 0xd90   : > { %3351 = vpow2.f32 %v2837_v22  ;;  %v2769_v45 = vadd.f32 %v4265_v4, %v2768_v25 }
 0xd91   : > { %3353 = vrcp.f32 %v2851_v23 }
 0xd92   : > { %v4280_v26 = vadd.f32 %v2809_v24, %v2769_v45 }
 0xd94   : > { %v2829_v27 = vsub.f32 0.0, %v4280_v26 }
 0xd96   : > { %v3352_v28 = vpop.eup %3351  ;;  %v2839_v29 = vmul.f32 1.442695, %v2829_v27  ;;  %v2812_v35 = vpop.f32.mrf.mxu1 }
 0xd97   : > { %v3354_v31 = vpop.eup %3353  ;;  %v2852_v32 = vadd.f32 1.0, %v3352_v28  ;;  %v2771_v33 = vpop.f32.mrf.mxu0 }
 0xd98   : > { %3355 = vpow2.f32 %v2839_v29  ;;  %v2772_v34 = vadd.f32 %v4265_v4, %v2771_v33  ;;  %2875 = vrot.lane.b32.xlu2 %v3354_v31, %s3410_s25 }
 0xd99   : > { %3357 = vrcp.f32 %v2852_v32 }
 0xd9a   : > { %v2813_v36 = vadd.f32 %v2812_v35, %v2772_v34 }
 0xd9c   : > { %v2830_v54 = vsub.f32 0.0, %v2813_v36 }
 0xd9e   : > { %v3356_v37 = vpop.eup %3355  ;;  %v2841_v38 = vmul.f32 1.442695, %v2830_v54 }
 0xd9f   : > { %v3358_v39 = vpop.eup %3357  ;;  %v2853_v40 = vadd.f32 1.0, %v3356_v37 }
 0xda0   : > { %3359 = vpow2.f32 %v2841_v38  ;;  %2877 = vrot.lane.b32.xlu0 %v3358_v39, %s3410_s25 }
 0xda1   : > { %3361 = vrcp.f32 %v2853_v40 }
 0xda6   : > { %v3360_v41 = vpop.eup %3359 }
 0xda7   : > { %v3362_v42 = vpop.eup %3361  ;;  %v2854_v43 = vadd.f32 1.0, %v3360_v41 }
 0xda8   : > { %2879 = vrot.lane.b32.xlu1 %v3362_v42, %s3410_s25 }
 0xda9   : > { %3363 = vrcp.f32 %v2854_v43 }
 0xdaf   : > { %v3364_v44 = vpop.eup %3363 }
 0xdb0   : > { %2881 = vrot.lane.b32.xlu2 %v3364_v44, %s3410_s25 }
 0xdb7   : > { %v2815_v48 = vpop.f32.mrf.mxu1 }
 0xdcb   : > { %v2774_v46 = vpop.f32.mrf.mxu0 }
 0xdcc   : > { %v2775_v47 = vadd.f32 %v4265_v4, %v2774_v46 }
 0xdce   : > { %v2816_v49 = vadd.f32 %v2815_v48, %v2775_v47  ;;  %v2818_v55 = vpop.f32.mrf.mxu1 }
 0xdd0   : > { %v2831_v50 = vsub.f32 0.0, %v2816_v49 }
 0xdd2   : > { %v2843_v51 = vmul.f32 1.442695, %v2831_v50 }
 0xdd3   : > { %v2777_v52 = vpop.f32.mrf.mxu0 }
 0xdd4   : > { %3365 = vpow2.f32 %v2843_v51  ;;  %v2778_v53 = vadd.f32 %v4265_v4, %v2777_v52 }
 0xdd6   : > { %v2819_v56 = vadd.f32 %v2818_v55, %v2778_v53 }
 0xdd8   : > { %v2832_v57 = vsub.f32 0.0, %v2819_v56 }
 0xdda   : > { %v3366_v58 = vpop.eup %3365  ;;  %v2845_v59 = vmul.f32 1.442695, %v2832_v57 }
 0xddb   : > { %v2855_v60 = vadd.f32 1.0, %v3366_v58 }
 0xddc   : > { %3367 = vpow2.f32 %v2845_v59 }
 0xddd   : > { %3369 = vrcp.f32 %v2855_v60 }
 0xde2   : > { %v3368_v61 = vpop.eup %3367 }
 0xde3   : > { %v3370_v6 = vpop.eup %3369  ;;  %v2856_v62 = vadd.f32 1.0, %v3368_v61 }
 0xde4   : > { %2883 = vrot.lane.b32.xlu0 %v3370_v6, %s3410_s25 }
 0xde5   : > { %3371 = vrcp.f32 %v2856_v62 }
 0xdeb   : > { %v3372_v63 = vpop.eup %3371 }
 0xdec   : > { %2885 = vrot.lane.b32.xlu1 %v3372_v63, %s3410_s25 }
 0xdf2   : > { %v2876_v0 = vpop.permute.xlu2 %2875 }
 0xdf3   : > { %v2899_v1 = vmul.f32 %v2876_v0, %v4272_v14 }
 0xdf4   : > { %v2821_v2 = vpop.f32.mrf.mxu1 }
 0xdf5   : > { %2907 = vst.msk [vmem:[%s4297_s15] sm:$0xff] %vm333_vm0, %v2899_v1  ;;  %v2780_v3 = vpop.f32.mrf.mxu0 }
 0xdf6   : > { %v2781_v5 = vadd.f32 %v4265_v4, %v2780_v3 }
 0xdf8   : > { %v2822_v7 = vadd.f32 %v2821_v2, %v2781_v5 }
 0xdfa   : > { %v2833_v8 = vsub.f32 0.0, %v2822_v7 }
 0xdfc   : > { %v2847_v9 = vmul.f32 1.442695, %v2833_v8  ;;  %v2824_v12 = vpop.f32.mrf.mxu1 }
 0xdfd   : > { %v2783_v10 = vpop.f32.mrf.mxu0 }
 0xdfe   : > { %3373 = vpow2.f32 %v2847_v9  ;;  %v2784_v11 = vadd.f32 %v4265_v4, %v2783_v10 }
 0xe00   : > { %v2825_v13 = vadd.f32 %v2824_v12, %v2784_v11 }
 0xe02   : > { %v2834_v15 = vsub.f32 0.0, %v2825_v13 }
 0xe04   : > { %v3374_v16 = vpop.eup %3373  ;;  %v2849_v14 = vmul.f32 1.442695, %v2834_v15 }
 0xe05   : > { %v2857_v17 = vadd.f32 1.0, %v3374_v16 }
 0xe06   : > { %3375 = vpow2.f32 %v2849_v14 }
 0xe07   : > { %3377 = vrcp.f32 %v2857_v17 }
 0xe0a   : > { %v2882_v18 = vpop.permute.xlu2 %2881 }
 0xe0b   : > { %v2902_v19 = vmul.f32 %v2882_v18, %v2813_v36 }
 0xe0c   : > { %v3376_v21 = vpop.eup %3375 }
 0xe0d   : > { %2910 = vst.msk [vmem:[%s4297_s15 + $0x18] sm:$0xff] %vm333_vm0, %v2902_v19  ;;  %v3378_v30 = vpop.eup %3377  ;;  %v2858_v22 = vadd.f32 1.0, %v3376_v21 }
 0xe0e   : > { %2887 = vrot.lane.b32.xlu2 %v3378_v30, %s3410_s25 }
 0xe0f   : > { %3379 = vrcp.f32 %v2858_v22 }
 0xe12   : > { %v2878_v4 = vpop.permute.xlu0 %2877 }
 0xe13   : > { %v2900_v23 = vmul.f32 %v2878_v4, %v4276_v20 }
 0xe15   : > { %2908 = vst.msk [vmem:[%s4297_s15 + $0x8] sm:$0xff] %vm333_vm0, %v2900_v23  ;;  %v3380_v24 = vpop.eup %3379 }
 0xe16   : > { %2889 = vrot.lane.b32.xlu0 %v3380_v24, %s3410_s25 }
 0xe1a   : > { %v2880_v25 = vpop.permute.xlu1 %2879 }
 0xe1b   : > { %v2901_v45 = vmul.f32 %v2880_v25, %v4280_v26 }
 0xe1d   : > { %2909 = vst.msk [vmem:[%s4297_s15 + $0x10] sm:$0xff] %vm333_vm0, %v2901_v45 }
 0xe56   : > { %v2884_v27 = vpop.permute.xlu0 %2883 }
 0xe57   : > { %v2903_v28 = vmul.f32 %v2884_v27, %v2816_v49 }
 0xe59   : > { %2911 = vst.msk [vmem:[%s4297_s15 + $0x20] sm:$0xff] %vm333_vm0, %v2903_v28 }
 0xe5e   : > { %v2886_v29 = vpop.permute.xlu1 %2885 }
 0xe5f   : > { %v2904_v31 = vmul.f32 %v2886_v29, %v2819_v56 }
 0xe61   : > { %2912 = vst.msk [vmem:[%s4297_s15 + $0x28] sm:$0xff] %vm333_vm0, %v2904_v31 }
 0xe68   : > { %v2888_v20 = vpop.permute.xlu2 %2887 }
 0xe69   : > { %v2905_v32 = vmul.f32 %v2888_v20, %v2822_v7 }
 0xe6b   : > { %2913 = vst.msk [vmem:[%s4297_s15 + $0x30] sm:$0xff] %vm333_vm0, %v2905_v32 }
 0xe88   : > { %v2890_v33 = vpop.permute.xlu0 %2889 }
 0xe89   : > { %v2906_v34 = vmul.f32 %v2890_v33, %v2825_v13 }
 0xe8b   : > { %2914 = vst.msk [vmem:[%s4297_s15 + $0x38] sm:$0xff] %vm333_vm0, %v2906_v34 }
 0xe8c PF: > { %s18_s27 = sadd.s32 1, %s3387_s27  }
 0xe8d   : > { %p15_p4 = scmp.ge.s32.totalorder %s18_s27, 4  }
 0xe8f   :  { %17 = sbr.rel (!%p15_p4) target bundleno = 1 (0x1), region = 82 }

</bundles_post_ra>
